<compile_context>
chip_gen: v7x
topology: tpu7x:2x2x1
jax: 0.10.0
libtpu: 0.0.40
codegen_flags: <defaults>
</compile_context>

<pallas_src>
import functools

import jax
import jax.numpy as jnp
from jax.experimental import pallas as pl
from jax.experimental.pallas import tpu as pltpu

_GATE_ORDER = (0, 1, 3, 2)   # torch gate chunks (i, f, g, o) -> kernel (i, f, o, g)


def _round_up(x, m):
    return ((x + m - 1) // m) * m


# ----------------------------- kernel ----------------------------------------
def _make_kernel(num_layers: int, hidden: int, seq_len: int, bb: int,
                 n_mlp_layers: int):
    n_lstm_refs = 3 * num_layers     # per layer: W_ih_cat, W_hh_cat, bias
    n_mlp_refs = 2 * n_mlp_layers    # per MLP layer: W^T (padded), bias

    def kernel(*refs):
        idx = 0
        x_ref = refs[idx]; idx += 1                          # (seq*bb, in) bf16
        lstm_refs = refs[idx: idx + n_lstm_refs]; idx += n_lstm_refs
        mlp_refs = refs[idx: idx + n_mlp_refs]; idx += n_mlp_refs
        out_ref = refs[idx]                                  # (bb, 1) f32

        B, H = bb, hidden

        prev_hs = None      # previous layer's per-step h (bf16 register values)
        h = None
        for layer in range(num_layers):
            w_ih = lstm_refs[3 * layer][...]        # (in_l, 4H) bf16
            w_hh = lstm_refs[3 * layer + 1][...]    # (H, 4H)   bf16
            bias = lstm_refs[3 * layer + 2][...]    # (1, 4H)   f32

            if layer == 0:
                # Bulk input projection for all timesteps in one lane-dense
                # MXU pass, off the serial recurrence.
                gx = jnp.dot(x_ref[...], w_ih,
                             preferred_element_type=jnp.float32) + bias

            h = jnp.zeros((B, H), jnp.bfloat16)     # carried bf16 (MXU input)
            c = jnp.zeros((B, H), jnp.float32)      # cell state stays f32

            cur_hs = [] if layer + 1 < num_layers else None
            for t in range(seq_len):
                if layer == 0:
                    pre_x = gx[t * B:(t + 1) * B, :]
                else:
                    # Depends only on the previous layer's step-t output, so
                    # adjacent layer recurrences can overlap (wavefront).
                    pre_x = jnp.dot(prev_hs[t], w_ih,
                                    preferred_element_type=jnp.float32) + bias
                pre = pre_x + jnp.dot(h, w_hh,
                                      preferred_element_type=jnp.float32)
                # Gates packed (i, f, o, g): 1 sigmoid over 3H lanes + 1 tanh.
                sig = jax.nn.sigmoid(pre[:, :3 * H])
                g_g = jnp.tanh(pre[:, 3 * H:])
                i_g = sig[:, 0:H]
                f_g = sig[:, H:2 * H]
                o_g = sig[:, 2 * H:3 * H]
                c = f_g * c + i_g * g_g
                h = (o_g * jnp.tanh(c)).astype(jnp.bfloat16)
                if cur_hs is not None:
                    cur_hs.append(h)
            prev_hs = cur_hs

        # ----------------- MLP head on last-layer, last-step h ---------------
        out = h                                               # (B, H) bf16
        for li in range(n_mlp_layers - 1):                    # 5 ReLU layers
            w = mlp_refs[2 * li][...]                         # bf16, padded
            b = mlp_refs[2 * li + 1][...]                     # f32, padded
            out = jnp.maximum(
                jnp.dot(out.astype(jnp.bfloat16), w,
                        preferred_element_type=jnp.float32) + b, 0.0)
        w = mlp_refs[-2][...]                                 # value head
        b = mlp_refs[-1][...]
        out_ref[...] = jax.nn.sigmoid(
            jnp.dot(out.astype(jnp.bfloat16), w,
                    preferred_element_type=jnp.float32) + b)

    return kernel


# ----------------------------- wrapper ----------------------------------------
def _default_batch_blocks(batch):
    # Split the batch across a "parallel" grid axis only on multi-TensorCore
    # chips (v7x).  On single-TC v5e/v6e a >1 grid runs sequentially and would
    # only lengthen the latency-bound recurrence.
    try:
        kind = jax.devices()[0].device_kind.lower()
    except Exception:  # pragma: no cover - defensive
        return 1
    if "v7" in kind and batch % 2 == 0:
        return 2
    return 1


def erfh5_rnn_forward(x, lstm_params, mlp_params, *, hidden, num_layers,
                      batch_blocks=None):
    """x: (batch, seq, input_dim) f32 -> (batch, 1) f32.

    lstm_params: per layer (w_ih (4H,in), w_hh (4H,H), b_ih (4H,), b_hh (4H,))
                 in PyTorch layout / gate order (i, f, g, o).
    mlp_params:  [(w (out,in), b (out,)), ...] in PyTorch layout.
    """
    batch, seq_len, input_dim = x.shape
    H = hidden

    nb = _default_batch_blocks(batch) if batch_blocks is None else batch_blocks
    if nb < 1 or batch % nb != 0:
        nb = 1
    bb = batch // nb

    # Time-major, then split the batch into nb contiguous blocks:
    # x_blocks[i, t*bb + j, :] == x[i*bb + j, t, :].
    x_tm = jnp.transpose(x, (1, 0, 2))                        # (seq, batch, in)
    x_blocks = (x_tm.reshape(seq_len, nb, bb, input_dim)
                .transpose(1, 0, 2, 3)
                .reshape(nb, seq_len * bb, input_dim)
                .astype(jnp.bfloat16))

    flat_inputs = [x_blocks]

    # ---- LSTM params: fused gate weights in (i, f, o, g) order, transposed,
    #      bf16 weights, combined f32 bias (b_ih + b_hh). ----
    for (w_ih, w_hh, b_ih, b_hh) in lstm_params:
        w_ih_cat = jnp.concatenate(
            [jnp.transpose(w_ih[k * H:(k + 1) * H, :]) for k in _GATE_ORDER],
            axis=1).astype(jnp.bfloat16)                      # (in_l, 4H)
        w_hh_cat = jnp.concatenate(
            [jnp.transpose(w_hh[k * H:(k + 1) * H, :]) for k in _GATE_ORDER],
            axis=1).astype(jnp.bfloat16)                      # (H, 4H)
        bsum = b_ih + b_hh
        bias = jnp.concatenate(
            [bsum[k * H:(k + 1) * H] for k in _GATE_ORDER]).reshape(1, 4 * H)
        flat_inputs += [w_ih_cat, w_hh_cat, bias]

    # ---- MLP params: transpose, zero-pad hidden widths to multiples of 128
    #      (exact: zero rows/cols, ReLU(0)=0), bf16 weights, f32 bias. ----
    dims = [H] + [w.shape[0] for (w, _) in mlp_params]   # [H,750,600,300,150,50,1]
    pad_dims = [dims[0]] + [_round_up(d, 128) for d in dims[1:-1]] + [dims[-1]]
    for li, (w, b) in enumerate(mlp_params):
        din, dout = dims[li], dims[li + 1]
        pin, pout = pad_dims[li], pad_dims[li + 1]
        wt = (jnp.zeros((pin, pout), jnp.float32)
              .at[:din, :dout].set(jnp.transpose(w))
              .astype(jnp.bfloat16))
        bp = jnp.zeros((1, pout), jnp.float32).at[0, :dout].set(b)
        flat_inputs += [wt, bp]

    kernel = _make_kernel(num_layers, H, seq_len, bb, len(mlp_params))

    # Everything stays resident in VMEM; derive the limit from the actual
    # footprint (params + x block, times pipeline double-buffering) plus
    # headroom, capped below v7x's 64 MiB physical VMEM.
    tot_bytes = sum(int(a.size) * a.dtype.itemsize for a in flat_inputs)
    vmem_limit = int(min(max(3 * tot_bytes + (8 << 20), 16 << 20), 64 << 20))

    in_specs = [pl.BlockSpec((None, seq_len * bb, input_dim),
                             lambda i: (i, 0, 0))]
    in_specs += [pl.BlockSpec(a.shape, lambda i: (0, 0))
                 for a in flat_inputs[1:]]

    out = pl.pallas_call(
        kernel,
        out_shape=jax.ShapeDtypeStruct((nb, bb, 1), jnp.float32),
        grid=(nb,),
        in_specs=in_specs,
        out_specs=pl.BlockSpec((None, bb, 1), lambda i: (i, 0, 0)),
        compiler_params=pltpu.CompilerParams(
            dimension_semantics=("parallel",),
            vmem_limit_bytes=vmem_limit),
    )(*flat_inputs)
    return out.reshape(batch, 1)


# ------------------------ pure-JAX reference (f32) -----------------------------
def reference_forward(x, lstm_params, mlp_params, *, hidden, num_layers):
    del num_layers
    H = hidden
    batch = x.shape[0]
    inp = jnp.transpose(x, (1, 0, 2))                   # (seq, B, in)
    for (w_ih, w_hh, b_ih, b_hh) in lstm_params:
        def step(carry, x_t, w_ih=w_ih, w_hh=w_hh, b_ih=b_ih, b_hh=b_hh):
            h, c = carry
            gates = x_t @ w_ih.T + b_ih + h @ w_hh.T + b_hh
            i = jax.nn.sigmoid(gates[:, 0 * H:1 * H])
            f = jax.nn.sigmoid(gates[:, 1 * H:2 * H])
            g = jnp.tanh(gates[:, 2 * H:3 * H])
            o = jax.nn.sigmoid(gates[:, 3 * H:4 * H])
            c = f * c + i * g
            h = o * jnp.tanh(c)
            return (h, c), h
        init = (jnp.zeros((batch, H), jnp.float32),
                jnp.zeros((batch, H), jnp.float32))
        _, outs = jax.lax.scan(step, init, inp)
        inp = outs
    out = inp[-1]
    for li, (w, b) in enumerate(mlp_params):
        out = out @ w.T + b
        if li < len(mlp_params) - 1:
            out = jnp.maximum(out, 0.0)
    return jax.nn.sigmoid(out)


# ------------------------ deterministic parameter init ------------------------
def init_params(key, input_dim, hidden, num_layers):
    k_lstm = 1.0 / jnp.sqrt(hidden)
    lstm_params = []
    for layer in range(num_layers):
        in_size = input_dim if layer == 0 else hidden
        key, k1, k2, k3, k4 = jax.random.split(key, 5)
        w_ih = jax.random.uniform(k1, (4 * hidden, in_size), jnp.float32,
                                  -k_lstm, k_lstm)
        w_hh = jax.random.uniform(k2, (4 * hidden, hidden), jnp.float32,
                                  -k_lstm, k_lstm)
        b_ih = jax.random.uniform(k3, (4 * hidden,), jnp.float32, -k_lstm, k_lstm)
        b_hh = jax.random.uniform(k4, (4 * hidden,), jnp.float32, -k_lstm, k_lstm)
        lstm_params.append((w_ih, w_hh, b_ih, b_hh))

    mlp_dims = [(hidden, 750), (750, 600), (600, 300), (300, 150), (150, 50),
                (50, 1)]
    initrange = 0.1
    mlp_params = []
    for (din, dout) in mlp_dims:
        key, kw = jax.random.split(key)
        w = jax.random.uniform(kw, (dout, din), jnp.float32,
                               -initrange, initrange)     # torch layout (out, in)
        b = jnp.zeros((dout,), jnp.float32)               # bias.fill_(0)
        mlp_params.append((w, b))
    return lstm_params, mlp_params


# --------------------------------- main ---------------------------------------
if __name__ == "__main__":
    BATCH, SEQ, INPUT_DIM = 2, 8, 16
    HIDDEN, NUM_LAYERS = 32, 2

    key = jax.random.PRNGKey(0)
    key, kx = jax.random.split(key)
    x = jax.random.normal(kx, (BATCH, SEQ, INPUT_DIM), jnp.float32)

    lstm_params, mlp_params = init_params(key, INPUT_DIM, HIDDEN, NUM_LAYERS)

    fwd = jax.jit(functools.partial(erfh5_rnn_forward,
                                    hidden=HIDDEN, num_layers=NUM_LAYERS))
    out = fwd(x, lstm_params, mlp_params)
    out = jax.block_until_ready(out)

    ref = reference_forward(x, lstm_params, mlp_params,
                            hidden=HIDDEN, num_layers=NUM_LAYERS)
    ref = jax.block_until_ready(ref)

    assert out.shape == (BATCH, 1), out.shape
    assert bool(jnp.all(jnp.isfinite(out)))
    assert bool(jnp.all((out >= 0.0) & (out <= 1.0)))      # sigmoid range
    # bf16 matmul operands (f32 accumulate) vs. f32 reference -> 1e-2 tolerance.
    assert bool(jnp.allclose(out, ref, rtol=1e-2, atol=1e-2)), (out, ref)
    print("KERNEL_OK")
</pallas_src>

<mosaic_0001>
module attributes {stable_mosaic.version = 11 : i64} {
  func.func @kernel(%arg0: i32, %arg1: memref<1x16x16xbf16, #tpu.memory_space<vmem>>, %arg2: memref<16x128xbf16, #tpu.memory_space<vmem>>, %arg3: memref<32x128xbf16, #tpu.memory_space<vmem>>, %arg4: memref<1x128xf32, #tpu.memory_space<vmem>>, %arg5: memref<32x128xbf16, #tpu.memory_space<vmem>>, %arg6: memref<32x128xbf16, #tpu.memory_space<vmem>>, %arg7: memref<1x128xf32, #tpu.memory_space<vmem>>, %arg8: memref<32x768xbf16, #tpu.memory_space<vmem>>, %arg9: memref<1x768xf32, #tpu.memory_space<vmem>>, %arg10: memref<768x640xbf16, #tpu.memory_space<vmem>>, %arg11: memref<1x640xf32, #tpu.memory_space<vmem>>, %arg12: memref<640x384xbf16, #tpu.memory_space<vmem>>, %arg13: memref<1x384xf32, #tpu.memory_space<vmem>>, %arg14: memref<384x256xbf16, #tpu.memory_space<vmem>>, %arg15: memref<1x256xf32, #tpu.memory_space<vmem>>, %arg16: memref<256x128xbf16, #tpu.memory_space<vmem>>, %arg17: memref<1x128xf32, #tpu.memory_space<vmem>>, %arg18: memref<128x1xbf16, #tpu.memory_space<vmem>>, %arg19: memref<1x1xf32, #tpu.memory_space<vmem>>, %arg20: memref<1x2x1xf32, #tpu.memory_space<vmem>>) attributes {dimension_semantics = [#tpu.dimension_semantics<parallel>], iteration_bounds = array<i64: 1>, scalar_prefetch = 0 : i64, scratch_operands = 0 : i64, tpu.core_type = #tpu.core_type<tc>, window_params = [{transform_indices = @transform_0, window_bounds = array<i64: 1, 16, 16>}, {pipeline_mode = #tpu.pipeline_mode<synchronous>, transform_indices = @transform_1, window_bounds = array<i64: 16, 128>}, {pipeline_mode = #tpu.pipeline_mode<synchronous>, transform_indices = @transform_2, window_bounds = array<i64: 32, 128>}, {pipeline_mode = #tpu.pipeline_mode<synchronous>, transform_indices = @transform_3, window_bounds = array<i64: 1, 128>}, {pipeline_mode = #tpu.pipeline_mode<synchronous>, transform_indices = @transform_4, window_bounds = array<i64: 32, 128>}, {pipeline_mode = #tpu.pipeline_mode<synchronous>, transform_indices = @transform_5, window_bounds = array<i64: 32, 128>}, {pipeline_mode = #tpu.pipeline_mode<synchronous>, transform_indices = @transform_6, window_bounds = array<i64: 1, 128>}, {pipeline_mode = #tpu.pipeline_mode<synchronous>, transform_indices = @transform_7, window_bounds = array<i64: 32, 768>}, {pipeline_mode = #tpu.pipeline_mode<synchronous>, transform_indices = @transform_8, window_bounds = array<i64: 1, 768>}, {pipeline_mode = #tpu.pipeline_mode<synchronous>, transform_indices = @transform_9, window_bounds = array<i64: 768, 640>}, {pipeline_mode = #tpu.pipeline_mode<synchronous>, transform_indices = @transform_10, window_bounds = array<i64: 1, 640>}, {pipeline_mode = #tpu.pipeline_mode<synchronous>, transform_indices = @transform_11, window_bounds = array<i64: 640, 384>}, {pipeline_mode = #tpu.pipeline_mode<synchronous>, transform_indices = @transform_12, window_bounds = array<i64: 1, 384>}, {pipeline_mode = #tpu.pipeline_mode<synchronous>, transform_indices = @transform_13, window_bounds = array<i64: 384, 256>}, {pipeline_mode = #tpu.pipeline_mode<synchronous>, transform_indices = @transform_14, window_bounds = array<i64: 1, 256>}, {pipeline_mode = #tpu.pipeline_mode<synchronous>, transform_indices = @transform_15, window_bounds = array<i64: 256, 128>}, {pipeline_mode = #tpu.pipeline_mode<synchronous>, transform_indices = @transform_16, window_bounds = array<i64: 1, 128>}, {pipeline_mode = #tpu.pipeline_mode<synchronous>, transform_indices = @transform_17, window_bounds = array<i64: 128, 1>}, {pipeline_mode = #tpu.pipeline_mode<synchronous>, transform_indices = @transform_18, window_bounds = array<i64: 1, 1>}, {transform_indices = @transform_19, window_bounds = array<i64: 1, 2, 1>}]} {
    %c0 = arith.constant 0 : index
    %c0_0 = arith.constant 0 : index
    %0 = vector.load %arg2[%c0, %c0_0] : memref<16x128xbf16, #tpu.memory_space<vmem>>, vector<16x128xbf16>
    %c0_1 = arith.constant 0 : index
    %c0_2 = arith.constant 0 : index
    %1 = vector.load %arg3[%c0_1, %c0_2] : memref<32x128xbf16, #tpu.memory_space<vmem>>, vector<32x128xbf16>
    %c0_3 = arith.constant 0 : index
    %c0_4 = arith.constant 0 : index
    %2 = vector.load %arg4[%c0_3, %c0_4] : memref<1x128xf32, #tpu.memory_space<vmem>>, vector<1x128xf32>
    %c0_5 = arith.constant 0 : index
    %c0_6 = arith.constant 0 : index
    %c0_7 = arith.constant 0 : index
    %3 = vector.load %arg1[%c0_5, %c0_6, %c0_7] : memref<1x16x16xbf16, #tpu.memory_space<vmem>>, vector<1x16x16xbf16>
    %4 = vector.shape_cast %3 : vector<1x16x16xbf16> to vector<16x16xbf16>
    %cst = arith.constant dense<0.000000e+00> : vector<16x128xf32>
    %5 = tpu.matmul %4, %0, %cst {dimension_numbers = #tpu.dot_dimension_numbers<[1], [0], [0], [1], [0, 0, 1, 1], [], []>} : vector<16x16xbf16>, vector<16x128xbf16>, vector<16x128xf32> -> vector<16x128xf32>
    %6 = vector.broadcast %2 : vector<1x128xf32> to vector<16x128xf32>
    %7 = arith.addf %5, %6 : vector<16x128xf32>
    %cst_8 = arith.constant 0.000000e+00 : bf16
    %8 = vector.broadcast %cst_8 : bf16 to vector<2x32xbf16>
    %cst_9 = arith.constant 0.000000e+00 : f32
    %9 = vector.broadcast %cst_9 : f32 to vector<2x32xf32>
    %10 = vector.extract_strided_slice %7 {offsets = [0, 0], sizes = [2, 128], strides = [1, 1]} : vector<16x128xf32> to vector<2x128xf32>
    %cst_10 = arith.constant dense<0.000000e+00> : vector<2x128xf32>
    %11 = tpu.matmul %8, %1, %cst_10 {dimension_numbers = #tpu.dot_dimension_numbers<[1], [0], [0], [1], [0, 0, 1, 1], [], []>} : vector<2x32xbf16>, vector<32x128xbf16>, vector<2x128xf32> -> vector<2x128xf32>
    %12 = arith.addf %10, %11 : vector<2x128xf32>
    %13 = vector.extract_strided_slice %12 {offsets = [0, 0], sizes = [2, 96], strides = [1, 1]} : vector<2x128xf32> to vector<2x96xf32>
    %14 = arith.negf %13 : vector<2x96xf32>
    %15 = math.exp %14 : vector<2x96xf32>
    %cst_11 = arith.constant 1.000000e+00 : f32
    %16 = vector.broadcast %cst_11 : f32 to vector<2x96xf32>
    %17 = arith.addf %16, %15 : vector<2x96xf32>
    %18 = arith.divf %16, %17 : vector<2x96xf32>
    %19 = vector.extract_strided_slice %12 {offsets = [0, 96], sizes = [2, 32], strides = [1, 1]} : vector<2x128xf32> to vector<2x32xf32>
    %20 = math.tanh %19 : vector<2x32xf32>
    %21 = vector.extract_strided_slice %18 {offsets = [0, 0], sizes = [2, 32], strides = [1, 1]} : vector<2x96xf32> to vector<2x32xf32>
    %22 = vector.extract_strided_slice %18 {offsets = [0, 32], sizes = [2, 32], strides = [1, 1]} : vector<2x96xf32> to vector<2x32xf32>
    %23 = vector.extract_strided_slice %18 {offsets = [0, 64], sizes = [2, 32], strides = [1, 1]} : vector<2x96xf32> to vector<2x32xf32>
    %24 = arith.mulf %22, %9 : vector<2x32xf32>
    %25 = arith.mulf %21, %20 : vector<2x32xf32>
    %26 = arith.addf %24, %25 : vector<2x32xf32>
    %27 = math.tanh %26 : vector<2x32xf32>
    %28 = arith.mulf %23, %27 : vector<2x32xf32>
    %29 = arith.truncf %28 : vector<2x32xf32> to vector<2x32xbf16>
    %30 = vector.extract_strided_slice %7 {offsets = [2, 0], sizes = [2, 128], strides = [1, 1]} : vector<16x128xf32> to vector<2x128xf32>
    %cst_12 = arith.constant dense<0.000000e+00> : vector<2x128xf32>
    %31 = tpu.matmul %29, %1, %cst_12 {dimension_numbers = #tpu.dot_dimension_numbers<[1], [0], [0], [1], [0, 0, 1, 1], [], []>} : vector<2x32xbf16>, vector<32x128xbf16>, vector<2x128xf32> -> vector<2x128xf32>
    %32 = arith.addf %30, %31 : vector<2x128xf32>
    %33 = vector.extract_strided_slice %32 {offsets = [0, 0], sizes = [2, 96], strides = [1, 1]} : vector<2x128xf32> to vector<2x96xf32>
    %34 = arith.negf %33 : vector<2x96xf32>
    %35 = math.exp %34 : vector<2x96xf32>
    %cst_13 = arith.constant 1.000000e+00 : f32
    %36 = vector.broadcast %cst_13 : f32 to vector<2x96xf32>
    %37 = arith.addf %36, %35 : vector<2x96xf32>
    %38 = arith.divf %36, %37 : vector<2x96xf32>
    %39 = vector.extract_strided_slice %32 {offsets = [0, 96], sizes = [2, 32], strides = [1, 1]} : vector<2x128xf32> to vector<2x32xf32>
    %40 = math.tanh %39 : vector<2x32xf32>
    %41 = vector.extract_strided_slice %38 {offsets = [0, 0], sizes = [2, 32], strides = [1, 1]} : vector<2x96xf32> to vector<2x32xf32>
    %42 = vector.extract_strided_slice %38 {offsets = [0, 32], sizes = [2, 32], strides = [1, 1]} : vector<2x96xf32> to vector<2x32xf32>
    %43 = vector.extract_strided_slice %38 {offsets = [0, 64], sizes = [2, 32], strides = [1, 1]} : vector<2x96xf32> to vector<2x32xf32>
    %44 = arith.mulf %42, %26 : vector<2x32xf32>
    %45 = arith.mulf %41, %40 : vector<2x32xf32>
    %46 = arith.addf %44, %45 : vector<2x32xf32>
    %47 = math.tanh %46 : vector<2x32xf32>
    %48 = arith.mulf %43, %47 : vector<2x32xf32>
    %49 = arith.truncf %48 : vector<2x32xf32> to vector<2x32xbf16>
    %50 = vector.extract_strided_slice %7 {offsets = [4, 0], sizes = [2, 128], strides = [1, 1]} : vector<16x128xf32> to vector<2x128xf32>
    %cst_14 = arith.constant dense<0.000000e+00> : vector<2x128xf32>
    %51 = tpu.matmul %49, %1, %cst_14 {dimension_numbers = #tpu.dot_dimension_numbers<[1], [0], [0], [1], [0, 0, 1, 1], [], []>} : vector<2x32xbf16>, vector<32x128xbf16>, vector<2x128xf32> -> vector<2x128xf32>
    %52 = arith.addf %50, %51 : vector<2x128xf32>
    %53 = vector.extract_strided_slice %52 {offsets = [0, 0], sizes = [2, 96], strides = [1, 1]} : vector<2x128xf32> to vector<2x96xf32>
    %54 = arith.negf %53 : vector<2x96xf32>
    %55 = math.exp %54 : vector<2x96xf32>
    %cst_15 = arith.constant 1.000000e+00 : f32
    %56 = vector.broadcast %cst_15 : f32 to vector<2x96xf32>
    %57 = arith.addf %56, %55 : vector<2x96xf32>
    %58 = arith.divf %56, %57 : vector<2x96xf32>
    %59 = vector.extract_strided_slice %52 {offsets = [0, 96], sizes = [2, 32], strides = [1, 1]} : vector<2x128xf32> to vector<2x32xf32>
    %60 = math.tanh %59 : vector<2x32xf32>
    %61 = vector.extract_strided_slice %58 {offsets = [0, 0], sizes = [2, 32], strides = [1, 1]} : vector<2x96xf32> to vector<2x32xf32>
    %62 = vector.extract_strided_slice %58 {offsets = [0, 32], sizes = [2, 32], strides = [1, 1]} : vector<2x96xf32> to vector<2x32xf32>
    %63 = vector.extract_strided_slice %58 {offsets = [0, 64], sizes = [2, 32], strides = [1, 1]} : vector<2x96xf32> to vector<2x32xf32>
    %64 = arith.mulf %62, %46 : vector<2x32xf32>
    %65 = arith.mulf %61, %60 : vector<2x32xf32>
    %66 = arith.addf %64, %65 : vector<2x32xf32>
    %67 = math.tanh %66 : vector<2x32xf32>
    %68 = arith.mulf %63, %67 : vector<2x32xf32>
    %69 = arith.truncf %68 : vector<2x32xf32> to vector<2x32xbf16>
    %70 = vector.extract_strided_slice %7 {offsets = [6, 0], sizes = [2, 128], strides = [1, 1]} : vector<16x128xf32> to vector<2x128xf32>
    %cst_16 = arith.constant dense<0.000000e+00> : vector<2x128xf32>
    %71 = tpu.matmul %69, %1, %cst_16 {dimension_numbers = #tpu.dot_dimension_numbers<[1], [0], [0], [1], [0, 0, 1, 1], [], []>} : vector<2x32xbf16>, vector<32x128xbf16>, vector<2x128xf32> -> vector<2x128xf32>
    %72 = arith.addf %70, %71 : vector<2x128xf32>
    %73 = vector.extract_strided_slice %72 {offsets = [0, 0], sizes = [2, 96], strides = [1, 1]} : vector<2x128xf32> to vector<2x96xf32>
    %74 = arith.negf %73 : vector<2x96xf32>
    %75 = math.exp %74 : vector<2x96xf32>
    %cst_17 = arith.constant 1.000000e+00 : f32
    %76 = vector.broadcast %cst_17 : f32 to vector<2x96xf32>
    %77 = arith.addf %76, %75 : vector<2x96xf32>
    %78 = arith.divf %76, %77 : vector<2x96xf32>
    %79 = vector.extract_strided_slice %72 {offsets = [0, 96], sizes = [2, 32], strides = [1, 1]} : vector<2x128xf32> to vector<2x32xf32>
    %80 = math.tanh %79 : vector<2x32xf32>
    %81 = vector.extract_strided_slice %78 {offsets = [0, 0], sizes = [2, 32], strides = [1, 1]} : vector<2x96xf32> to vector<2x32xf32>
    %82 = vector.extract_strided_slice %78 {offsets = [0, 32], sizes = [2, 32], strides = [1, 1]} : vector<2x96xf32> to vector<2x32xf32>
    %83 = vector.extract_strided_slice %78 {offsets = [0, 64], sizes = [2, 32], strides = [1, 1]} : vector<2x96xf32> to vector<2x32xf32>
    %84 = arith.mulf %82, %66 : vector<2x32xf32>
    %85 = arith.mulf %81, %80 : vector<2x32xf32>
    %86 = arith.addf %84, %85 : vector<2x32xf32>
    %87 = math.tanh %86 : vector<2x32xf32>
    %88 = arith.mulf %83, %87 : vector<2x32xf32>
    %89 = arith.truncf %88 : vector<2x32xf32> to vector<2x32xbf16>
    %90 = vector.extract_strided_slice %7 {offsets = [8, 0], sizes = [2, 128], strides = [1, 1]} : vector<16x128xf32> to vector<2x128xf32>
    %cst_18 = arith.constant dense<0.000000e+00> : vector<2x128xf32>
    %91 = tpu.matmul %89, %1, %cst_18 {dimension_numbers = #tpu.dot_dimension_numbers<[1], [0], [0], [1], [0, 0, 1, 1], [], []>} : vector<2x32xbf16>, vector<32x128xbf16>, vector<2x128xf32> -> vector<2x128xf32>
    %92 = arith.addf %90, %91 : vector<2x128xf32>
    %93 = vector.extract_strided_slice %92 {offsets = [0, 0], sizes = [2, 96], strides = [1, 1]} : vector<2x128xf32> to vector<2x96xf32>
    %94 = arith.negf %93 : vector<2x96xf32>
    %95 = math.exp %94 : vector<2x96xf32>
    %cst_19 = arith.constant 1.000000e+00 : f32
    %96 = vector.broadcast %cst_19 : f32 to vector<2x96xf32>
    %97 = arith.addf %96, %95 : vector<2x96xf32>
    %98 = arith.divf %96, %97 : vector<2x96xf32>
    %99 = vector.extract_strided_slice %92 {offsets = [0, 96], sizes = [2, 32], strides = [1, 1]} : vector<2x128xf32> to vector<2x32xf32>
    %100 = math.tanh %99 : vector<2x32xf32>
    %101 = vector.extract_strided_slice %98 {offsets = [0, 0], sizes = [2, 32], strides = [1, 1]} : vector<2x96xf32> to vector<2x32xf32>
    %102 = vector.extract_strided_slice %98 {offsets = [0, 32], sizes = [2, 32], strides = [1, 1]} : vector<2x96xf32> to vector<2x32xf32>
    %103 = vector.extract_strided_slice %98 {offsets = [0, 64], sizes = [2, 32], strides = [1, 1]} : vector<2x96xf32> to vector<2x32xf32>
    %104 = arith.mulf %102, %86 : vector<2x32xf32>
    %105 = arith.mulf %101, %100 : vector<2x32xf32>
    %106 = arith.addf %104, %105 : vector<2x32xf32>
    %107 = math.tanh %106 : vector<2x32xf32>
    %108 = arith.mulf %103, %107 : vector<2x32xf32>
    %109 = arith.truncf %108 : vector<2x32xf32> to vector<2x32xbf16>
    %110 = vector.extract_strided_slice %7 {offsets = [10, 0], sizes = [2, 128], strides = [1, 1]} : vector<16x128xf32> to vector<2x128xf32>
    %cst_20 = arith.constant dense<0.000000e+00> : vector<2x128xf32>
    %111 = tpu.matmul %109, %1, %cst_20 {dimension_numbers = #tpu.dot_dimension_numbers<[1], [0], [0], [1], [0, 0, 1, 1], [], []>} : vector<2x32xbf16>, vector<32x128xbf16>, vector<2x128xf32> -> vector<2x128xf32>
    %112 = arith.addf %110, %111 : vector<2x128xf32>
    %113 = vector.extract_strided_slice %112 {offsets = [0, 0], sizes = [2, 96], strides = [1, 1]} : vector<2x128xf32> to vector<2x96xf32>
    %114 = arith.negf %113 : vector<2x96xf32>
    %115 = math.exp %114 : vector<2x96xf32>
    %cst_21 = arith.constant 1.000000e+00 : f32
    %116 = vector.broadcast %cst_21 : f32 to vector<2x96xf32>
    %117 = arith.addf %116, %115 : vector<2x96xf32>
    %118 = arith.divf %116, %117 : vector<2x96xf32>
    %119 = vector.extract_strided_slice %112 {offsets = [0, 96], sizes = [2, 32], strides = [1, 1]} : vector<2x128xf32> to vector<2x32xf32>
    %120 = math.tanh %119 : vector<2x32xf32>
    %121 = vector.extract_strided_slice %118 {offsets = [0, 0], sizes = [2, 32], strides = [1, 1]} : vector<2x96xf32> to vector<2x32xf32>
    %122 = vector.extract_strided_slice %118 {offsets = [0, 32], sizes = [2, 32], strides = [1, 1]} : vector<2x96xf32> to vector<2x32xf32>
    %123 = vector.extract_strided_slice %118 {offsets = [0, 64], sizes = [2, 32], strides = [1, 1]} : vector<2x96xf32> to vector<2x32xf32>
    %124 = arith.mulf %122, %106 : vector<2x32xf32>
    %125 = arith.mulf %121, %120 : vector<2x32xf32>
    %126 = arith.addf %124, %125 : vector<2x32xf32>
    %127 = math.tanh %126 : vector<2x32xf32>
    %128 = arith.mulf %123, %127 : vector<2x32xf32>
    %129 = arith.truncf %128 : vector<2x32xf32> to vector<2x32xbf16>
    %130 = vector.extract_strided_slice %7 {offsets = [12, 0], sizes = [2, 128], strides = [1, 1]} : vector<16x128xf32> to vector<2x128xf32>
    %cst_22 = arith.constant dense<0.000000e+00> : vector<2x128xf32>
    %131 = tpu.matmul %129, %1, %cst_22 {dimension_numbers = #tpu.dot_dimension_numbers<[1], [0], [0], [1], [0, 0, 1, 1], [], []>} : vector<2x32xbf16>, vector<32x128xbf16>, vector<2x128xf32> -> vector<2x128xf32>
    %132 = arith.addf %130, %131 : vector<2x128xf32>
    %133 = vector.extract_strided_slice %132 {offsets = [0, 0], sizes = [2, 96], strides = [1, 1]} : vector<2x128xf32> to vector<2x96xf32>
    %134 = arith.negf %133 : vector<2x96xf32>
    %135 = math.exp %134 : vector<2x96xf32>
    %cst_23 = arith.constant 1.000000e+00 : f32
    %136 = vector.broadcast %cst_23 : f32 to vector<2x96xf32>
    %137 = arith.addf %136, %135 : vector<2x96xf32>
    %138 = arith.divf %136, %137 : vector<2x96xf32>
    %139 = vector.extract_strided_slice %132 {offsets = [0, 96], sizes = [2, 32], strides = [1, 1]} : vector<2x128xf32> to vector<2x32xf32>
    %140 = math.tanh %139 : vector<2x32xf32>
    %141 = vector.extract_strided_slice %138 {offsets = [0, 0], sizes = [2, 32], strides = [1, 1]} : vector<2x96xf32> to vector<2x32xf32>
    %142 = vector.extract_strided_slice %138 {offsets = [0, 32], sizes = [2, 32], strides = [1, 1]} : vector<2x96xf32> to vector<2x32xf32>
    %143 = vector.extract_strided_slice %138 {offsets = [0, 64], sizes = [2, 32], strides = [1, 1]} : vector<2x96xf32> to vector<2x32xf32>
    %144 = arith.mulf %142, %126 : vector<2x32xf32>
    %145 = arith.mulf %141, %140 : vector<2x32xf32>
    %146 = arith.addf %144, %145 : vector<2x32xf32>
    %147 = math.tanh %146 : vector<2x32xf32>
    %148 = arith.mulf %143, %147 : vector<2x32xf32>
    %149 = arith.truncf %148 : vector<2x32xf32> to vector<2x32xbf16>
    %150 = vector.extract_strided_slice %7 {offsets = [14, 0], sizes = [2, 128], strides = [1, 1]} : vector<16x128xf32> to vector<2x128xf32>
    %cst_24 = arith.constant dense<0.000000e+00> : vector<2x128xf32>
    %151 = tpu.matmul %149, %1, %cst_24 {dimension_numbers = #tpu.dot_dimension_numbers<[1], [0], [0], [1], [0, 0, 1, 1], [], []>} : vector<2x32xbf16>, vector<32x128xbf16>, vector<2x128xf32> -> vector<2x128xf32>
    %152 = arith.addf %150, %151 : vector<2x128xf32>
    %153 = vector.extract_strided_slice %152 {offsets = [0, 0], sizes = [2, 96], strides = [1, 1]} : vector<2x128xf32> to vector<2x96xf32>
    %154 = arith.negf %153 : vector<2x96xf32>
    %155 = math.exp %154 : vector<2x96xf32>
    %cst_25 = arith.constant 1.000000e+00 : f32
    %156 = vector.broadcast %cst_25 : f32 to vector<2x96xf32>
    %157 = arith.addf %156, %155 : vector<2x96xf32>
    %158 = arith.divf %156, %157 : vector<2x96xf32>
    %159 = vector.extract_strided_slice %152 {offsets = [0, 96], sizes = [2, 32], strides = [1, 1]} : vector<2x128xf32> to vector<2x32xf32>
    %160 = math.tanh %159 : vector<2x32xf32>
    %161 = vector.extract_strided_slice %158 {offsets = [0, 0], sizes = [2, 32], strides = [1, 1]} : vector<2x96xf32> to vector<2x32xf32>
    %162 = vector.extract_strided_slice %158 {offsets = [0, 32], sizes = [2, 32], strides = [1, 1]} : vector<2x96xf32> to vector<2x32xf32>
    %163 = vector.extract_strided_slice %158 {offsets = [0, 64], sizes = [2, 32], strides = [1, 1]} : vector<2x96xf32> to vector<2x32xf32>
    %164 = arith.mulf %162, %146 : vector<2x32xf32>
    %165 = arith.mulf %161, %160 : vector<2x32xf32>
    %166 = arith.addf %164, %165 : vector<2x32xf32>
    %167 = math.tanh %166 : vector<2x32xf32>
    %168 = arith.mulf %163, %167 : vector<2x32xf32>
    %169 = arith.truncf %168 : vector<2x32xf32> to vector<2x32xbf16>
    %c0_26 = arith.constant 0 : index
    %c0_27 = arith.constant 0 : index
    %170 = vector.load %arg5[%c0_26, %c0_27] : memref<32x128xbf16, #tpu.memory_space<vmem>>, vector<32x128xbf16>
    %c0_28 = arith.constant 0 : index
    %c0_29 = arith.constant 0 : index
    %171 = vector.load %arg6[%c0_28, %c0_29] : memref<32x128xbf16, #tpu.memory_space<vmem>>, vector<32x128xbf16>
    %c0_30 = arith.constant 0 : index
    %c0_31 = arith.constant 0 : index
    %172 = vector.load %arg7[%c0_30, %c0_31] : memref<1x128xf32, #tpu.memory_space<vmem>>, vector<1x128xf32>
    %cst_32 = arith.constant 0.000000e+00 : bf16
    %173 = vector.broadcast %cst_32 : bf16 to vector<2x32xbf16>
    %cst_33 = arith.constant 0.000000e+00 : f32
    %174 = vector.broadcast %cst_33 : f32 to vector<2x32xf32>
    %cst_34 = arith.constant dense<0.000000e+00> : vector<2x128xf32>
    %175 = tpu.matmul %29, %170, %cst_34 {dimension_numbers = #tpu.dot_dimension_numbers<[1], [0], [0], [1], [0, 0, 1, 1], [], []>} : vector<2x32xbf16>, vector<32x128xbf16>, vector<2x128xf32> -> vector<2x128xf32>
    %176 = vector.broadcast %172 : vector<1x128xf32> to vector<2x128xf32>
    %177 = arith.addf %175, %176 : vector<2x128xf32>
    %cst_35 = arith.constant dense<0.000000e+00> : vector<2x128xf32>
    %178 = tpu.matmul %173, %171, %cst_35 {dimension_numbers = #tpu.dot_dimension_numbers<[1], [0], [0], [1], [0, 0, 1, 1], [], []>} : vector<2x32xbf16>, vector<32x128xbf16>, vector<2x128xf32> -> vector<2x128xf32>
    %179 = arith.addf %177, %178 : vector<2x128xf32>
    %180 = vector.extract_strided_slice %179 {offsets = [0, 0], sizes = [2, 96], strides = [1, 1]} : vector<2x128xf32> to vector<2x96xf32>
    %181 = arith.negf %180 : vector<2x96xf32>
    %182 = math.exp %181 : vector<2x96xf32>
    %cst_36 = arith.constant 1.000000e+00 : f32
    %183 = vector.broadcast %cst_36 : f32 to vector<2x96xf32>
    %184 = arith.addf %183, %182 : vector<2x96xf32>
    %185 = arith.divf %183, %184 : vector<2x96xf32>
    %186 = vector.extract_strided_slice %179 {offsets = [0, 96], sizes = [2, 32], strides = [1, 1]} : vector<2x128xf32> to vector<2x32xf32>
    %187 = math.tanh %186 : vector<2x32xf32>
    %188 = vector.extract_strided_slice %185 {offsets = [0, 0], sizes = [2, 32], strides = [1, 1]} : vector<2x96xf32> to vector<2x32xf32>
    %189 = vector.extract_strided_slice %185 {offsets = [0, 32], sizes = [2, 32], strides = [1, 1]} : vector<2x96xf32> to vector<2x32xf32>
    %190 = vector.extract_strided_slice %185 {offsets = [0, 64], sizes = [2, 32], strides = [1, 1]} : vector<2x96xf32> to vector<2x32xf32>
    %191 = arith.mulf %189, %174 : vector<2x32xf32>
    %192 = arith.mulf %188, %187 : vector<2x32xf32>
    %193 = arith.addf %191, %192 : vector<2x32xf32>
    %194 = math.tanh %193 : vector<2x32xf32>
    %195 = arith.mulf %190, %194 : vector<2x32xf32>
    %196 = arith.truncf %195 : vector<2x32xf32> to vector<2x32xbf16>
    %cst_37 = arith.constant dense<0.000000e+00> : vector<2x128xf32>
    %197 = tpu.matmul %49, %170, %cst_37 {dimension_numbers = #tpu.dot_dimension_numbers<[1], [0], [0], [1], [0, 0, 1, 1], [], []>} : vector<2x32xbf16>, vector<32x128xbf16>, vector<2x128xf32> -> vector<2x128xf32>
    %198 = vector.broadcast %172 : vector<1x128xf32> to vector<2x128xf32>
    %199 = arith.addf %197, %198 : vector<2x128xf32>
    %cst_38 = arith.constant dense<0.000000e+00> : vector<2x128xf32>
    %200 = tpu.matmul %196, %171, %cst_38 {dimension_numbers = #tpu.dot_dimension_numbers<[1], [0], [0], [1], [0, 0, 1, 1], [], []>} : vector<2x32xbf16>, vector<32x128xbf16>, vector<2x128xf32> -> vector<2x128xf32>
    %201 = arith.addf %199, %200 : vector<2x128xf32>
    %202 = vector.extract_strided_slice %201 {offsets = [0, 0], sizes = [2, 96], strides = [1, 1]} : vector<2x128xf32> to vector<2x96xf32>
    %203 = arith.negf %202 : vector<2x96xf32>
    %204 = math.exp %203 : vector<2x96xf32>
    %cst_39 = arith.constant 1.000000e+00 : f32
    %205 = vector.broadcast %cst_39 : f32 to vector<2x96xf32>
    %206 = arith.addf %205, %204 : vector<2x96xf32>
    %207 = arith.divf %205, %206 : vector<2x96xf32>
    %208 = vector.extract_strided_slice %201 {offsets = [0, 96], sizes = [2, 32], strides = [1, 1]} : vector<2x128xf32> to vector<2x32xf32>
    %209 = math.tanh %208 : vector<2x32xf32>
    %210 = vector.extract_strided_slice %207 {offsets = [0, 0], sizes = [2, 32], strides = [1, 1]} : vector<2x96xf32> to vector<2x32xf32>
    %211 = vector.extract_strided_slice %207 {offsets = [0, 32], sizes = [2, 32], strides = [1, 1]} : vector<2x96xf32> to vector<2x32xf32>
    %212 = vector.extract_strided_slice %207 {offsets = [0, 64], sizes = [2, 32], strides = [1, 1]} : vector<2x96xf32> to vector<2x32xf32>
    %213 = arith.mulf %211, %193 : vector<2x32xf32>
    %214 = arith.mulf %210, %209 : vector<2x32xf32>
    %215 = arith.addf %213, %214 : vector<2x32xf32>
    %216 = math.tanh %215 : vector<2x32xf32>
    %217 = arith.mulf %212, %216 : vector<2x32xf32>
    %218 = arith.truncf %217 : vector<2x32xf32> to vector<2x32xbf16>
    %cst_40 = arith.constant dense<0.000000e+00> : vector<2x128xf32>
    %219 = tpu.matmul %69, %170, %cst_40 {dimension_numbers = #tpu.dot_dimension_numbers<[1], [0], [0], [1], [0, 0, 1, 1], [], []>} : vector<2x32xbf16>, vector<32x128xbf16>, vector<2x128xf32> -> vector<2x128xf32>
    %220 = vector.broadcast %172 : vector<1x128xf32> to vector<2x128xf32>
    %221 = arith.addf %219, %220 : vector<2x128xf32>
    %cst_41 = arith.constant dense<0.000000e+00> : vector<2x128xf32>
    %222 = tpu.matmul %218, %171, %cst_41 {dimension_numbers = #tpu.dot_dimension_numbers<[1], [0], [0], [1], [0, 0, 1, 1], [], []>} : vector<2x32xbf16>, vector<32x128xbf16>, vector<2x128xf32> -> vector<2x128xf32>
    %223 = arith.addf %221, %222 : vector<2x128xf32>
    %224 = vector.extract_strided_slice %223 {offsets = [0, 0], sizes = [2, 96], strides = [1, 1]} : vector<2x128xf32> to vector<2x96xf32>
    %225 = arith.negf %224 : vector<2x96xf32>
    %226 = math.exp %225 : vector<2x96xf32>
    %cst_42 = arith.constant 1.000000e+00 : f32
    %227 = vector.broadcast %cst_42 : f32 to vector<2x96xf32>
    %228 = arith.addf %227, %226 : vector<2x96xf32>
    %229 = arith.divf %227, %228 : vector<2x96xf32>
    %230 = vector.extract_strided_slice %223 {offsets = [0, 96], sizes = [2, 32], strides = [1, 1]} : vector<2x128xf32> to vector<2x32xf32>
    %231 = math.tanh %230 : vector<2x32xf32>
    %232 = vector.extract_strided_slice %229 {offsets = [0, 0], sizes = [2, 32], strides = [1, 1]} : vector<2x96xf32> to vector<2x32xf32>
    %233 = vector.extract_strided_slice %229 {offsets = [0, 32], sizes = [2, 32], strides = [1, 1]} : vector<2x96xf32> to vector<2x32xf32>
    %234 = vector.extract_strided_slice %229 {offsets = [0, 64], sizes = [2, 32], strides = [1, 1]} : vector<2x96xf32> to vector<2x32xf32>
    %235 = arith.mulf %233, %215 : vector<2x32xf32>
    %236 = arith.mulf %232, %231 : vector<2x32xf32>
    %237 = arith.addf %235, %236 : vector<2x32xf32>
    %238 = math.tanh %237 : vector<2x32xf32>
    %239 = arith.mulf %234, %238 : vector<2x32xf32>
    %240 = arith.truncf %239 : vector<2x32xf32> to vector<2x32xbf16>
    %cst_43 = arith.constant dense<0.000000e+00> : vector<2x128xf32>
    %241 = tpu.matmul %89, %170, %cst_43 {dimension_numbers = #tpu.dot_dimension_numbers<[1], [0], [0], [1], [0, 0, 1, 1], [], []>} : vector<2x32xbf16>, vector<32x128xbf16>, vector<2x128xf32> -> vector<2x128xf32>
    %242 = vector.broadcast %172 : vector<1x128xf32> to vector<2x128xf32>
    %243 = arith.addf %241, %242 : vector<2x128xf32>
    %cst_44 = arith.constant dense<0.000000e+00> : vector<2x128xf32>
    %244 = tpu.matmul %240, %171, %cst_44 {dimension_numbers = #tpu.dot_dimension_numbers<[1], [0], [0], [1], [0, 0, 1, 1], [], []>} : vector<2x32xbf16>, vector<32x128xbf16>, vector<2x128xf32> -> vector<2x128xf32>
    %245 = arith.addf %243, %244 : vector<2x128xf32>
    %246 = vector.extract_strided_slice %245 {offsets = [0, 0], sizes = [2, 96], strides = [1, 1]} : vector<2x128xf32> to vector<2x96xf32>
    %247 = arith.negf %246 : vector<2x96xf32>
    %248 = math.exp %247 : vector<2x96xf32>
    %cst_45 = arith.constant 1.000000e+00 : f32
    %249 = vector.broadcast %cst_45 : f32 to vector<2x96xf32>
    %250 = arith.addf %249, %248 : vector<2x96xf32>
    %251 = arith.divf %249, %250 : vector<2x96xf32>
    %252 = vector.extract_strided_slice %245 {offsets = [0, 96], sizes = [2, 32], strides = [1, 1]} : vector<2x128xf32> to vector<2x32xf32>
    %253 = math.tanh %252 : vector<2x32xf32>
    %254 = vector.extract_strided_slice %251 {offsets = [0, 0], sizes = [2, 32], strides = [1, 1]} : vector<2x96xf32> to vector<2x32xf32>
    %255 = vector.extract_strided_slice %251 {offsets = [0, 32], sizes = [2, 32], strides = [1, 1]} : vector<2x96xf32> to vector<2x32xf32>
    %256 = vector.extract_strided_slice %251 {offsets = [0, 64], sizes = [2, 32], strides = [1, 1]} : vector<2x96xf32> to vector<2x32xf32>
    %257 = arith.mulf %255, %237 : vector<2x32xf32>
    %258 = arith.mulf %254, %253 : vector<2x32xf32>
    %259 = arith.addf %257, %258 : vector<2x32xf32>
    %260 = math.tanh %259 : vector<2x32xf32>
    %261 = arith.mulf %256, %260 : vector<2x32xf32>
    %262 = arith.truncf %261 : vector<2x32xf32> to vector<2x32xbf16>
    %cst_46 = arith.constant dense<0.000000e+00> : vector<2x128xf32>
    %263 = tpu.matmul %109, %170, %cst_46 {dimension_numbers = #tpu.dot_dimension_numbers<[1], [0], [0], [1], [0, 0, 1, 1], [], []>} : vector<2x32xbf16>, vector<32x128xbf16>, vector<2x128xf32> -> vector<2x128xf32>
    %264 = vector.broadcast %172 : vector<1x128xf32> to vector<2x128xf32>
    %265 = arith.addf %263, %264 : vector<2x128xf32>
    %cst_47 = arith.constant dense<0.000000e+00> : vector<2x128xf32>
    %266 = tpu.matmul %262, %171, %cst_47 {dimension_numbers = #tpu.dot_dimension_numbers<[1], [0], [0], [1], [0, 0, 1, 1], [], []>} : vector<2x32xbf16>, vector<32x128xbf16>, vector<2x128xf32> -> vector<2x128xf32>
    %267 = arith.addf %265, %266 : vector<2x128xf32>
    %268 = vector.extract_strided_slice %267 {offsets = [0, 0], sizes = [2, 96], strides = [1, 1]} : vector<2x128xf32> to vector<2x96xf32>
    %269 = arith.negf %268 : vector<2x96xf32>
    %270 = math.exp %269 : vector<2x96xf32>
    %cst_48 = arith.constant 1.000000e+00 : f32
    %271 = vector.broadcast %cst_48 : f32 to vector<2x96xf32>
    %272 = arith.addf %271, %270 : vector<2x96xf32>
    %273 = arith.divf %271, %272 : vector<2x96xf32>
    %274 = vector.extract_strided_slice %267 {offsets = [0, 96], sizes = [2, 32], strides = [1, 1]} : vector<2x128xf32> to vector<2x32xf32>
    %275 = math.tanh %274 : vector<2x32xf32>
    %276 = vector.extract_strided_slice %273 {offsets = [0, 0], sizes = [2, 32], strides = [1, 1]} : vector<2x96xf32> to vector<2x32xf32>
    %277 = vector.extract_strided_slice %273 {offsets = [0, 32], sizes = [2, 32], strides = [1, 1]} : vector<2x96xf32> to vector<2x32xf32>
    %278 = vector.extract_strided_slice %273 {offsets = [0, 64], sizes = [2, 32], strides = [1, 1]} : vector<2x96xf32> to vector<2x32xf32>
    %279 = arith.mulf %277, %259 : vector<2x32xf32>
    %280 = arith.mulf %276, %275 : vector<2x32xf32>
    %281 = arith.addf %279, %280 : vector<2x32xf32>
    %282 = math.tanh %281 : vector<2x32xf32>
    %283 = arith.mulf %278, %282 : vector<2x32xf32>
    %284 = arith.truncf %283 : vector<2x32xf32> to vector<2x32xbf16>
    %cst_49 = arith.constant dense<0.000000e+00> : vector<2x128xf32>
    %285 = tpu.matmul %129, %170, %cst_49 {dimension_numbers = #tpu.dot_dimension_numbers<[1], [0], [0], [1], [0, 0, 1, 1], [], []>} : vector<2x32xbf16>, vector<32x128xbf16>, vector<2x128xf32> -> vector<2x128xf32>
    %286 = vector.broadcast %172 : vector<1x128xf32> to vector<2x128xf32>
    %287 = arith.addf %285, %286 : vector<2x128xf32>
    %cst_50 = arith.constant dense<0.000000e+00> : vector<2x128xf32>
    %288 = tpu.matmul %284, %171, %cst_50 {dimension_numbers = #tpu.dot_dimension_numbers<[1], [0], [0], [1], [0, 0, 1, 1], [], []>} : vector<2x32xbf16>, vector<32x128xbf16>, vector<2x128xf32> -> vector<2x128xf32>
    %289 = arith.addf %287, %288 : vector<2x128xf32>
    %290 = vector.extract_strided_slice %289 {offsets = [0, 0], sizes = [2, 96], strides = [1, 1]} : vector<2x128xf32> to vector<2x96xf32>
    %291 = arith.negf %290 : vector<2x96xf32>
    %292 = math.exp %291 : vector<2x96xf32>
    %cst_51 = arith.constant 1.000000e+00 : f32
    %293 = vector.broadcast %cst_51 : f32 to vector<2x96xf32>
    %294 = arith.addf %293, %292 : vector<2x96xf32>
    %295 = arith.divf %293, %294 : vector<2x96xf32>
    %296 = vector.extract_strided_slice %289 {offsets = [0, 96], sizes = [2, 32], strides = [1, 1]} : vector<2x128xf32> to vector<2x32xf32>
    %297 = math.tanh %296 : vector<2x32xf32>
    %298 = vector.extract_strided_slice %295 {offsets = [0, 0], sizes = [2, 32], strides = [1, 1]} : vector<2x96xf32> to vector<2x32xf32>
    %299 = vector.extract_strided_slice %295 {offsets = [0, 32], sizes = [2, 32], strides = [1, 1]} : vector<2x96xf32> to vector<2x32xf32>
    %300 = vector.extract_strided_slice %295 {offsets = [0, 64], sizes = [2, 32], strides = [1, 1]} : vector<2x96xf32> to vector<2x32xf32>
    %301 = arith.mulf %299, %281 : vector<2x32xf32>
    %302 = arith.mulf %298, %297 : vector<2x32xf32>
    %303 = arith.addf %301, %302 : vector<2x32xf32>
    %304 = math.tanh %303 : vector<2x32xf32>
    %305 = arith.mulf %300, %304 : vector<2x32xf32>
    %306 = arith.truncf %305 : vector<2x32xf32> to vector<2x32xbf16>
    %cst_52 = arith.constant dense<0.000000e+00> : vector<2x128xf32>
    %307 = tpu.matmul %149, %170, %cst_52 {dimension_numbers = #tpu.dot_dimension_numbers<[1], [0], [0], [1], [0, 0, 1, 1], [], []>} : vector<2x32xbf16>, vector<32x128xbf16>, vector<2x128xf32> -> vector<2x128xf32>
    %308 = vector.broadcast %172 : vector<1x128xf32> to vector<2x128xf32>
    %309 = arith.addf %307, %308 : vector<2x128xf32>
    %cst_53 = arith.constant dense<0.000000e+00> : vector<2x128xf32>
    %310 = tpu.matmul %306, %171, %cst_53 {dimension_numbers = #tpu.dot_dimension_numbers<[1], [0], [0], [1], [0, 0, 1, 1], [], []>} : vector<2x32xbf16>, vector<32x128xbf16>, vector<2x128xf32> -> vector<2x128xf32>
    %311 = arith.addf %309, %310 : vector<2x128xf32>
    %312 = vector.extract_strided_slice %311 {offsets = [0, 0], sizes = [2, 96], strides = [1, 1]} : vector<2x128xf32> to vector<2x96xf32>
    %313 = arith.negf %312 : vector<2x96xf32>
    %314 = math.exp %313 : vector<2x96xf32>
    %cst_54 = arith.constant 1.000000e+00 : f32
    %315 = vector.broadcast %cst_54 : f32 to vector<2x96xf32>
    %316 = arith.addf %315, %314 : vector<2x96xf32>
    %317 = arith.divf %315, %316 : vector<2x96xf32>
    %318 = vector.extract_strided_slice %311 {offsets = [0, 96], sizes = [2, 32], strides = [1, 1]} : vector<2x128xf32> to vector<2x32xf32>
    %319 = math.tanh %318 : vector<2x32xf32>
    %320 = vector.extract_strided_slice %317 {offsets = [0, 0], sizes = [2, 32], strides = [1, 1]} : vector<2x96xf32> to vector<2x32xf32>
    %321 = vector.extract_strided_slice %317 {offsets = [0, 32], sizes = [2, 32], strides = [1, 1]} : vector<2x96xf32> to vector<2x32xf32>
    %322 = vector.extract_strided_slice %317 {offsets = [0, 64], sizes = [2, 32], strides = [1, 1]} : vector<2x96xf32> to vector<2x32xf32>
    %323 = arith.mulf %321, %303 : vector<2x32xf32>
    %324 = arith.mulf %320, %319 : vector<2x32xf32>
    %325 = arith.addf %323, %324 : vector<2x32xf32>
    %326 = math.tanh %325 : vector<2x32xf32>
    %327 = arith.mulf %322, %326 : vector<2x32xf32>
    %328 = arith.truncf %327 : vector<2x32xf32> to vector<2x32xbf16>
    %cst_55 = arith.constant dense<0.000000e+00> : vector<2x128xf32>
    %329 = tpu.matmul %169, %170, %cst_55 {dimension_numbers = #tpu.dot_dimension_numbers<[1], [0], [0], [1], [0, 0, 1, 1], [], []>} : vector<2x32xbf16>, vector<32x128xbf16>, vector<2x128xf32> -> vector<2x128xf32>
    %330 = vector.broadcast %172 : vector<1x128xf32> to vector<2x128xf32>
    %331 = arith.addf %329, %330 : vector<2x128xf32>
    %cst_56 = arith.constant dense<0.000000e+00> : vector<2x128xf32>
    %332 = tpu.matmul %328, %171, %cst_56 {dimension_numbers = #tpu.dot_dimension_numbers<[1], [0], [0], [1], [0, 0, 1, 1], [], []>} : vector<2x32xbf16>, vector<32x128xbf16>, vector<2x128xf32> -> vector<2x128xf32>
    %333 = arith.addf %331, %332 : vector<2x128xf32>
    %334 = vector.extract_strided_slice %333 {offsets = [0, 0], sizes = [2, 96], strides = [1, 1]} : vector<2x128xf32> to vector<2x96xf32>
    %335 = arith.negf %334 : vector<2x96xf32>
    %336 = math.exp %335 : vector<2x96xf32>
    %cst_57 = arith.constant 1.000000e+00 : f32
    %337 = vector.broadcast %cst_57 : f32 to vector<2x96xf32>
    %338 = arith.addf %337, %336 : vector<2x96xf32>
    %339 = arith.divf %337, %338 : vector<2x96xf32>
    %340 = vector.extract_strided_slice %333 {offsets = [0, 96], sizes = [2, 32], strides = [1, 1]} : vector<2x128xf32> to vector<2x32xf32>
    %341 = math.tanh %340 : vector<2x32xf32>
    %342 = vector.extract_strided_slice %339 {offsets = [0, 0], sizes = [2, 32], strides = [1, 1]} : vector<2x96xf32> to vector<2x32xf32>
    %343 = vector.extract_strided_slice %339 {offsets = [0, 32], sizes = [2, 32], strides = [1, 1]} : vector<2x96xf32> to vector<2x32xf32>
    %344 = vector.extract_strided_slice %339 {offsets = [0, 64], sizes = [2, 32], strides = [1, 1]} : vector<2x96xf32> to vector<2x32xf32>
    %345 = arith.mulf %343, %325 : vector<2x32xf32>
    %346 = arith.mulf %342, %341 : vector<2x32xf32>
    %347 = arith.addf %345, %346 : vector<2x32xf32>
    %348 = math.tanh %347 : vector<2x32xf32>
    %349 = arith.mulf %344, %348 : vector<2x32xf32>
    %350 = arith.truncf %349 : vector<2x32xf32> to vector<2x32xbf16>
    %c0_58 = arith.constant 0 : index
    %c0_59 = arith.constant 0 : index
    %351 = vector.load %arg8[%c0_58, %c0_59] : memref<32x768xbf16, #tpu.memory_space<vmem>>, vector<32x768xbf16>
    %c0_60 = arith.constant 0 : index
    %c0_61 = arith.constant 0 : index
    %352 = vector.load %arg9[%c0_60, %c0_61] : memref<1x768xf32, #tpu.memory_space<vmem>>, vector<1x768xf32>
    %cst_62 = arith.constant dense<0.000000e+00> : vector<2x768xf32>
    %353 = tpu.matmul %350, %351, %cst_62 {dimension_numbers = #tpu.dot_dimension_numbers<[1], [0], [0], [1], [0, 0, 1, 1], [], []>} : vector<2x32xbf16>, vector<32x768xbf16>, vector<2x768xf32> -> vector<2x768xf32>
    %354 = vector.broadcast %352 : vector<1x768xf32> to vector<2x768xf32>
    %355 = arith.addf %353, %354 : vector<2x768xf32>
    %cst_63 = arith.constant 0.000000e+00 : f32
    %356 = vector.broadcast %cst_63 : f32 to vector<2x768xf32>
    %357 = arith.maximumf %355, %356 : vector<2x768xf32>
    %c0_64 = arith.constant 0 : index
    %c0_65 = arith.constant 0 : index
    %358 = vector.load %arg10[%c0_64, %c0_65] : memref<768x640xbf16, #tpu.memory_space<vmem>>, vector<768x640xbf16>
    %c0_66 = arith.constant 0 : index
    %c0_67 = arith.constant 0 : index
    %359 = vector.load %arg11[%c0_66, %c0_67] : memref<1x640xf32, #tpu.memory_space<vmem>>, vector<1x640xf32>
    %360 = arith.truncf %357 : vector<2x768xf32> to vector<2x768xbf16>
    %cst_68 = arith.constant dense<0.000000e+00> : vector<2x640xf32>
    %361 = tpu.matmul %360, %358, %cst_68 {dimension_numbers = #tpu.dot_dimension_numbers<[1], [0], [0], [1], [0, 0, 1, 1], [], []>} : vector<2x768xbf16>, vector<768x640xbf16>, vector<2x640xf32> -> vector<2x640xf32>
    %362 = vector.broadcast %359 : vector<1x640xf32> to vector<2x640xf32>
    %363 = arith.addf %361, %362 : vector<2x640xf32>
    %cst_69 = arith.constant 0.000000e+00 : f32
    %364 = vector.broadcast %cst_69 : f32 to vector<2x640xf32>
    %365 = arith.maximumf %363, %364 : vector<2x640xf32>
    %c0_70 = arith.constant 0 : index
    %c0_71 = arith.constant 0 : index
    %366 = vector.load %arg12[%c0_70, %c0_71] : memref<640x384xbf16, #tpu.memory_space<vmem>>, vector<640x384xbf16>
    %c0_72 = arith.constant 0 : index
    %c0_73 = arith.constant 0 : index
    %367 = vector.load %arg13[%c0_72, %c0_73] : memref<1x384xf32, #tpu.memory_space<vmem>>, vector<1x384xf32>
    %368 = arith.truncf %365 : vector<2x640xf32> to vector<2x640xbf16>
    %cst_74 = arith.constant dense<0.000000e+00> : vector<2x384xf32>
    %369 = tpu.matmul %368, %366, %cst_74 {dimension_numbers = #tpu.dot_dimension_numbers<[1], [0], [0], [1], [0, 0, 1, 1], [], []>} : vector<2x640xbf16>, vector<640x384xbf16>, vector<2x384xf32> -> vector<2x384xf32>
    %370 = vector.broadcast %367 : vector<1x384xf32> to vector<2x384xf32>
    %371 = arith.addf %369, %370 : vector<2x384xf32>
    %cst_75 = arith.constant 0.000000e+00 : f32
    %372 = vector.broadcast %cst_75 : f32 to vector<2x384xf32>
    %373 = arith.maximumf %371, %372 : vector<2x384xf32>
    %c0_76 = arith.constant 0 : index
    %c0_77 = arith.constant 0 : index
    %374 = vector.load %arg14[%c0_76, %c0_77] : memref<384x256xbf16, #tpu.memory_space<vmem>>, vector<384x256xbf16>
    %c0_78 = arith.constant 0 : index
    %c0_79 = arith.constant 0 : index
    %375 = vector.load %arg15[%c0_78, %c0_79] : memref<1x256xf32, #tpu.memory_space<vmem>>, vector<1x256xf32>
    %376 = arith.truncf %373 : vector<2x384xf32> to vector<2x384xbf16>
    %cst_80 = arith.constant dense<0.000000e+00> : vector<2x256xf32>
    %377 = tpu.matmul %376, %374, %cst_80 {dimension_numbers = #tpu.dot_dimension_numbers<[1], [0], [0], [1], [0, 0, 1, 1], [], []>} : vector<2x384xbf16>, vector<384x256xbf16>, vector<2x256xf32> -> vector<2x256xf32>
    %378 = vector.broadcast %375 : vector<1x256xf32> to vector<2x256xf32>
    %379 = arith.addf %377, %378 : vector<2x256xf32>
    %cst_81 = arith.constant 0.000000e+00 : f32
    %380 = vector.broadcast %cst_81 : f32 to vector<2x256xf32>
    %381 = arith.maximumf %379, %380 : vector<2x256xf32>
    %c0_82 = arith.constant 0 : index
    %c0_83 = arith.constant 0 : index
    %382 = vector.load %arg16[%c0_82, %c0_83] : memref<256x128xbf16, #tpu.memory_space<vmem>>, vector<256x128xbf16>
    %c0_84 = arith.constant 0 : index
    %c0_85 = arith.constant 0 : index
    %383 = vector.load %arg17[%c0_84, %c0_85] : memref<1x128xf32, #tpu.memory_space<vmem>>, vector<1x128xf32>
    %384 = arith.truncf %381 : vector<2x256xf32> to vector<2x256xbf16>
    %cst_86 = arith.constant dense<0.000000e+00> : vector<2x128xf32>
    %385 = tpu.matmul %384, %382, %cst_86 {dimension_numbers = #tpu.dot_dimension_numbers<[1], [0], [0], [1], [0, 0, 1, 1], [], []>} : vector<2x256xbf16>, vector<256x128xbf16>, vector<2x128xf32> -> vector<2x128xf32>
    %386 = vector.broadcast %383 : vector<1x128xf32> to vector<2x128xf32>
    %387 = arith.addf %385, %386 : vector<2x128xf32>
    %cst_87 = arith.constant 0.000000e+00 : f32
    %388 = vector.broadcast %cst_87 : f32 to vector<2x128xf32>
    %389 = arith.maximumf %387, %388 : vector<2x128xf32>
    %c0_88 = arith.constant 0 : index
    %c0_89 = arith.constant 0 : index
    %390 = vector.load %arg18[%c0_88, %c0_89] : memref<128x1xbf16, #tpu.memory_space<vmem>>, vector<128x1xbf16>
    %c0_90 = arith.constant 0 : index
    %c0_91 = arith.constant 0 : index
    %391 = vector.load %arg19[%c0_90, %c0_91] : memref<1x1xf32, #tpu.memory_space<vmem>>, vector<1x1xf32>
    %392 = arith.truncf %389 : vector<2x128xf32> to vector<2x128xbf16>
    %cst_92 = arith.constant dense<0.000000e+00> : vector<2x1xf32>
    %393 = tpu.matmul %392, %390, %cst_92 {dimension_numbers = #tpu.dot_dimension_numbers<[1], [0], [0], [1], [0, 0, 1, 1], [], []>} : vector<2x128xbf16>, vector<128x1xbf16>, vector<2x1xf32> -> vector<2x1xf32>
    %394 = vector.broadcast %391 : vector<1x1xf32> to vector<2x1xf32>
    %395 = arith.addf %393, %394 : vector<2x1xf32>
    %396 = arith.negf %395 : vector<2x1xf32>
    %397 = math.exp %396 : vector<2x1xf32>
    %cst_93 = arith.constant 1.000000e+00 : f32
    %398 = vector.broadcast %cst_93 : f32 to vector<2x1xf32>
    %399 = arith.addf %398, %397 : vector<2x1xf32>
    %400 = arith.divf %398, %399 : vector<2x1xf32>
    %c0_94 = arith.constant 0 : index
    %c0_95 = arith.constant 0 : index
    %c0_96 = arith.constant 0 : index
    %401 = vector.load %arg20[%c0_94, %c0_95, %c0_96] : memref<1x2x1xf32, #tpu.memory_space<vmem>>, vector<1x2x1xf32>
    %402 = vector.shape_cast %401 : vector<1x2x1xf32> to vector<2x1xf32>
    %403 = vector.shape_cast %400 : vector<2x1xf32> to vector<1x2x1xf32>
    tpu.vector_store %arg20[%c0_94, %c0_95, %c0_96], %403 {strides = array<i32>} : memref<1x2x1xf32, #tpu.memory_space<vmem>>, vector<1x2x1xf32>,
    return
  }
  func.func @transform_0(%arg0: i32) -> (i32, i32, i32) {
    %c0_i32 = arith.constant 0 : i32
    %c0_i32_0 = arith.constant 0 : i32
    %c0_i32_1 = arith.constant 0 : i32
    return %arg0, %c0_i32, %c0_i32_0 : i32, i32, i32
  }
  func.func @transform_1(%arg0: i32) -> (i32, i32) {
    %c0_i32 = arith.constant 0 : i32
    %c0_i32_0 = arith.constant 0 : i32
    %c0_i32_1 = arith.constant 0 : i32
    return %c0_i32, %c0_i32_0 : i32, i32
  }
  func.func @transform_2(%arg0: i32) -> (i32, i32) {
    %c0_i32 = arith.constant 0 : i32
    %c0_i32_0 = arith.constant 0 : i32
    %c0_i32_1 = arith.constant 0 : i32
    return %c0_i32, %c0_i32_0 : i32, i32
  }
  func.func @transform_3(%arg0: i32) -> (i32, i32) {
    %c0_i32 = arith.constant 0 : i32
    %c0_i32_0 = arith.constant 0 : i32
    %c0_i32_1 = arith.constant 0 : i32
    return %c0_i32, %c0_i32_0 : i32, i32
  }
  func.func @transform_4(%arg0: i32) -> (i32, i32) {
    %c0_i32 = arith.constant 0 : i32
    %c0_i32_0 = arith.constant 0 : i32
    %c0_i32_1 = arith.constant 0 : i32
    return %c0_i32, %c0_i32_0 : i32, i32
  }
  func.func @transform_5(%arg0: i32) -> (i32, i32) {
    %c0_i32 = arith.constant 0 : i32
    %c0_i32_0 = arith.constant 0 : i32
    %c0_i32_1 = arith.constant 0 : i32
    return %c0_i32, %c0_i32_0 : i32, i32
  }
  func.func @transform_6(%arg0: i32) -> (i32, i32) {
    %c0_i32 = arith.constant 0 : i32
    %c0_i32_0 = arith.constant 0 : i32
    %c0_i32_1 = arith.constant 0 : i32
    return %c0_i32, %c0_i32_0 : i32, i32
  }
  func.func @transform_7(%arg0: i32) -> (i32, i32) {
    %c0_i32 = arith.constant 0 : i32
    %c0_i32_0 = arith.constant 0 : i32
    %c0_i32_1 = arith.constant 0 : i32
    return %c0_i32, %c0_i32_0 : i32, i32
  }
  func.func @transform_8(%arg0: i32) -> (i32, i32) {
    %c0_i32 = arith.constant 0 : i32
    %c0_i32_0 = arith.constant 0 : i32
    %c0_i32_1 = arith.constant 0 : i32
    return %c0_i32, %c0_i32_0 : i32, i32
  }
  func.func @transform_9(%arg0: i32) -> (i32, i32) {
    %c0_i32 = arith.constant 0 : i32
    %c0_i32_0 = arith.constant 0 : i32
    %c0_i32_1 = arith.constant 0 : i32
    return %c0_i32, %c0_i32_0 : i32, i32
  }
  func.func @transform_10(%arg0: i32) -> (i32, i32) {
    %c0_i32 = arith.constant 0 : i32
    %c0_i32_0 = arith.constant 0 : i32
    %c0_i32_1 = arith.constant 0 : i32
    return %c0_i32, %c0_i32_0 : i32, i32
  }
  func.func @transform_11(%arg0: i32) -> (i32, i32) {
    %c0_i32 = arith.constant 0 : i32
    %c0_i32_0 = arith.constant 0 : i32
    %c0_i32_1 = arith.constant 0 : i32
    return %c0_i32, %c0_i32_0 : i32, i32
  }
  func.func @transform_12(%arg0: i32) -> (i32, i32) {
    %c0_i32 = arith.constant 0 : i32
    %c0_i32_0 = arith.constant 0 : i32
    %c0_i32_1 = arith.constant 0 : i32
    return %c0_i32, %c0_i32_0 : i32, i32
  }
  func.func @transform_13(%arg0: i32) -> (i32, i32) {
    %c0_i32 = arith.constant 0 : i32
    %c0_i32_0 = arith.constant 0 : i32
    %c0_i32_1 = arith.constant 0 : i32
    return %c0_i32, %c0_i32_0 : i32, i32
  }
  func.func @transform_14(%arg0: i32) -> (i32, i32) {
    %c0_i32 = arith.constant 0 : i32
    %c0_i32_0 = arith.constant 0 : i32
    %c0_i32_1 = arith.constant 0 : i32
    return %c0_i32, %c0_i32_0 : i32, i32
  }
  func.func @transform_15(%arg0: i32) -> (i32, i32) {
    %c0_i32 = arith.constant 0 : i32
    %c0_i32_0 = arith.constant 0 : i32
    %c0_i32_1 = arith.constant 0 : i32
    return %c0_i32, %c0_i32_0 : i32, i32
  }
  func.func @transform_16(%arg0: i32) -> (i32, i32) {
    %c0_i32 = arith.constant 0 : i32
    %c0_i32_0 = arith.constant 0 : i32
    %c0_i32_1 = arith.constant 0 : i32
    return %c0_i32, %c0_i32_0 : i32, i32
  }
  func.func @transform_17(%arg0: i32) -> (i32, i32) {
    %c0_i32 = arith.constant 0 : i32
    %c0_i32_0 = arith.constant 0 : i32
    %c0_i32_1 = arith.constant 0 : i32
    return %c0_i32, %c0_i32_0 : i32, i32
  }
  func.func @transform_18(%arg0: i32) -> (i32, i32) {
    %c0_i32 = arith.constant 0 : i32
    %c0_i32_0 = arith.constant 0 : i32
    %c0_i32_1 = arith.constant 0 : i32
    return %c0_i32, %c0_i32_0 : i32, i32
  }
  func.func @transform_19(%arg0: i32) -> (i32, i32, i32) {
    %c0_i32 = arith.constant 0 : i32
    %c0_i32_0 = arith.constant 0 : i32
    %c0_i32_1 = arith.constant 0 : i32
    return %arg0, %c0_i32, %c0_i32_0 : i32, i32, i32
  }
}

</mosaic_0001>

<bundles_post_ra>
// kernel: erfh5_rnn_forward.1
= control target key start
LH: loop header
LB: loop body
LE: loop exit
PB: predicated region body
PF: predicated region fallthrough
CT: control target
= control target key end

     0   :  { %v7430_v0 = vmov 0.0   ;;  %vm7431_vm0 = vmmov 0   ;;  %vm91_vm1 = vcmask 130048   ;;  %v7432_v5 = vmov 0   ;;  %s7433_s29 = smov 32   ;;  %s9351_s1 = inlined_call_operand.vmem [shape: bf16[16,128], index: 1, kind: input, shape index: {}]   ;;  %s9352_s2 = inlined_call_operand.vmem [shape: bf16[32,128], index: 2, kind: input, shape index: {}]   ;;  %s9353_s0 = inlined_call_operand.vmem [shape: bf16[1,16,16], index: 0, kind: input, shape index: {}]   ;;  %s9354_s3 = inlined_call_operand.vmem [shape: f32[1,128], index: 3, kind: input, shape index: {}]   ;;  %s9355_s4 = inlined_call_operand.vmem [shape: bf16[32,128], index: 4, kind: input, shape index: {}]   ;;  %s9356_s5 = inlined_call_operand.vmem [shape: bf16[32,128], index: 5, kind: input, shape index: {}]   ;;  %s9357_s6 = inlined_call_operand.vmem [shape: f32[1,128], index: 6, kind: input, shape index: {}]   ;;  %s9358_s7 = inlined_call_operand.vmem [shape: bf16[32,768], index: 7, kind: input, shape index: {}]   ;;  %s9359_s9 = inlined_call_operand.vmem [shape: bf16[768,640], index: 9, kind: input, shape index: {}]   ;;  %s9360_s8 = inlined_call_operand.vmem [shape: f32[1,768], index: 8, kind: input, shape index: {}]   ;;  %s9361_s11 = inlined_call_operand.vmem [shape: bf16[640,384], index: 11, kind: input, shape index: {}]   ;;  %s9362_s10 = inlined_call_operand.vmem [shape: f32[1,640], index: 10, kind: input, shape index: {}]   ;;  %s9363_s13 = inlined_call_operand.vmem [shape: bf16[384,256], index: 13, kind: input, shape index: {}]   ;;  %s9364_s15 = inlined_call_operand.vmem [shape: bf16[256,128], index: 15, kind: input, shape index: {}]   ;;  %s9365_s12 = inlined_call_operand.vmem [shape: f32[1,384], index: 12, kind: input, shape index: {}]   ;;  %s9366_s17 = inlined_call_operand.vmem [shape: bf16[128,1], index: 17, kind: input, shape index: {}]   ;;  %s9367_s14 = inlined_call_operand.vmem [shape: f32[1,256], index: 14, kind: input, shape index: {}]   ;;  %s9368_s18 = inlined_call_operand.<no memory space> [shape: f32[1,1], index: 18, kind: input, shape index: {}]   ;;  %s9369_s16 = inlined_call_operand.vmem [shape: f32[1,128], index: 16, kind: input, shape index: {}]   ;;  %s9370_s19 = inlined_call_operand.vmem [shape: f32[1,2,1], index: 19, kind: output, shape index: {}]  }
   0x1   :  { %9372 = sst [smem:[#allocation3_spill]] %s9351_s1  ;;  %6361 = vmatprep.subr.bf16.mxu0 %v7430_v0  ;;  %6367 = vmatprep.subr.bf16.mxu1 %v7430_v0  ;;  %s7434_s1 = smov 64   ;;  %vm148_vm2 = vcmask 261120   ;;  %vm5632_vm3 = vcmask 1024  }
   0x2   :  { %9373 = sst [smem:[#allocation4_spill]] %s9352_s2  ;;  %s9376_s20 = sld [smem:[#allocation3_spill]]  ;;  %6363 = vmatprep.mubr.msk.bf16.mxu0 %vm7431_vm0, %v7430_v0  ;;  %6371 = vmatprep.mubr.msk.bf16.mxu1 %vm7431_vm0, %v7430_v0 }
   0x3   :  { %9374 = sst [smem:[#allocation5_spill]] %s9353_s0  ;;  %s9377_s22 = sld [smem:[#allocation4_spill]] }
   0x4   :  { %9375 = sst [smem:[#allocation6_spill]] %s9354_s3  ;;  %s9378_s24 = sld [smem:[#allocation5_spill]] }
   0x5   :  { %s9379_s28 = sld [smem:[#allocation6_spill]] }
   0x8   :  { %v6680_v1 = vld [vmem:[%s9376_s20] sm:$0xff]  }
   0x9   :  { %v7543_v2 = vld [vmem:[%s9377_s22] sm:$0xff]   ;;  %6362 = vmatpush3.bf16.msra.mxu0 %v6680_v1  ;;  %v7556_v4 = vld [vmem:[%s9377_s22 + $0x8] sm:$0xff]  }
   0xa   :  { %v6682_v3 = vld [vmem:[%s9378_s24] sm:$0xff]   ;;  %6368 = vmatpush3.bf16.msra.mxu1 %v7543_v2  ;;  %6375 = vmatprep.subr.bf16.mxu0 %v7430_v0 }
   0xb   :  { %6369 = vmatprep.subr.bf16.mxu1 %v7430_v0  ;;  %v5638_v6 = vld [vmem:[%s9379_s28] ss:$0 sm:$0xff] }
   0xc   :  { %6364 = vmatmul.mubr.msk.bf16.vlgmr.msra.gmra.mrb[0].mxu0 %vm91_vm1, %v6682_v3 }
   0xd   :  { %6376 = vmatpush3.bf16.msra.mxu0 %v7543_v2  ;;  %6379 = vmatprep.mubr.msk.bf16.mxu0 %vm7431_vm0, %v7430_v0 }
   0xe   :  { %6370 = vmatpush3.bf16.msra.mxu1 %v7556_v4  ;;  %6377 = vmatprep.subr.bf16.mxu0 %v7430_v0 }
   0xf   :  { %6383 = vmatprep.subr.bf16.mxu1 %v7430_v0 }
  0x11   :  { %6372 = vmatmul.mubr.bf16.vlgmr.msra.gmra.mrb[0].mxu1 %v7432_v5  ;;  %6378 = vmatpush3.bf16.msra.mxu0 %v7556_v4 }
  0x12   :  { %6384 = vmatpush3.bf16.msra.mxu1 %v7543_v2  ;;  %6387 = vmatprep.mubr.msk.bf16.mxu1 %vm7431_vm0, %v7430_v0 }
  0x13   :  { %6385 = vmatprep.subr.bf16.mxu1 %v7430_v0  ;;  %6391 = vmatprep.subr.bf16.mxu0 %v7430_v0 }
  0x16   :  { %6386 = vmatpush3.bf16.msra.mxu1 %v7556_v4 }
  0x17   :  { %6399 = vmatprep.subr.bf16.mxu1 %v7430_v0 }
  0xdf   :  { %v129_v7 = vpop.f32.mrb[0].mxu0 }
  0xe0   :  { %v6365_v8 = vpop.f32.mrb[1].mxu0  ;;  %v7578_v9 = vadd.f32 %v5638_v6, %v129_v7 }
  0xe1   :  { %v132_v10 = vpop.f32.mrb[2].mxu0 }
  0xe2   :  { %v7580_v11 = vadd.f32 %v5638_v6, %v132_v10  ;;  %v6366_v12 = vpop.f32.mrb[3].mxu0 }
  0xe4   :  { %v186_v13 = vpop.f32.mrb[0].mxu1 }
  0xe5   :  { %v192_v14 = vadd.f32 %v186_v13, %v7578_v9  ;;  %v6373_v15 = vpop.f32.mrb[1].mxu1 }
  0xe6   :  { %v189_v16 = vpop.f32.mrb[2].mxu1 }
  0xe7   :  { %7298 = vtanh.f32 %v192_v14  ;;  %v6374_v17 = vpop.f32.mrb[3].mxu1  ;;  %v5644_v19 = vmul.f32 -1.442695, %v192_v14 }
  0xe9   :  { %7300 = vpow2.f32 %v5644_v19 }
  0xf1   :  { %v7299_v18 = vpop.eup %7298 }
  0xf2   :  { %202 = vrot.lane.b32.xlu0 %v7299_v18, %s7433_s29 }
  0xf3   :  { %v7301_v20 = vpop.eup %7300 }
  0xf4   :  { %v196_v21 = vadd.f32 1.0, %v7301_v20 }
  0xf6   :  { %7302 = vrcp.f32 %v196_v21 }
 0x100   :  { %v7303_v22 = vpop.eup %7302 }
 0x101   :  { %v200_v25 = vmul.f32 0.0, %v7303_v22 }
 0x164   :  { %v203_v23 = vpop.permute.xlu0 %202 }
 0x165   :  { %v205_v24 = vmul.f32 %v7303_v22, %v203_v23 }
 0x167   :  { %207 = vrot.lane.b32.xlu0 %v205_v24, %s7433_s29 }
 0x1d9   :  { %v208_v26 = vpop.permute.xlu0 %207 }
 0x1da   :  { %v210_v27 = vadd.f32 %v208_v26, %v200_v25 }
 0x1dc   :  { %7304 = vtanh.f32 %v210_v27  ;;  %v276_v46 = vrot.slane %v210_v27, 6 }
 0x1e6   :  { %v7305_v28 = vpop.eup %7304 }
 0x1e7   :  { %213 = vrot.lane.b32.xlu1 %v7305_v28, %s7433_s29 }
 0x259   :  { %v214_v29 = vpop.permute.xlu1 %213 }
 0x25a   :  { %v216_v30 = vmul.f32 %v7303_v22, %v214_v29 }
 0x25c   :  { %v217_v31 = vpack.c.bf16 %v216_v30, %v216_v30 }
 0x25e   :  { %219 = vrot.lane.b32.xlu1 %v217_v31, %s7434_s1 }
 0x2d0   :  { %v7587_v32 = vpop.permute.xlu1 %219 }
 0x2d1   :  { %6380 = vmatmul.mubr.msk.bf16.vlgmr.msra.gmra.mrb[4].mxu0 %vm148_vm2, %v7587_v32 }
 0x2d2   :  { %6392 = vmatpush3.bf16.msra.mxu0 %v7543_v2  ;;  %6395 = vmatprep.mubr.msk.bf16.mxu0 %vm7431_vm0, %v7430_v0 }
 0x2d3   :  { %6393 = vmatprep.subr.bf16.mxu0 %v7430_v0 }
 0x2d6   :  { %6394 = vmatpush3.bf16.msra.mxu0 %v7556_v4 }
 0x2d7   :  { %6407 = vmatprep.subr.bf16.mxu0 %v7430_v0 }
 0x3a4   :  { %v258_v33 = vpop.f32.mrb[4].mxu0 }
 0x3a5   :  { %v265_v34 = vrot.slane %v258_v33, 6  ;;  %v6381_v35 = vpop.f32.mrb[5].mxu0 }
 0x3a6   :  { %v261_v36 = vpop.f32.mrb[6].mxu0 }
 0x3a7   :  { %v267_v37 = vadd.f32 %v265_v34, %v7578_v9  ;;  %v6382_v38 = vpop.f32.mrb[7].mxu0 }
 0x3a9   :  { %7306 = vtanh.f32 %v267_v37  ;;  %v5646_v40 = vmul.f32 -1.442695, %v267_v37 }
 0x3ab   :  { %7308 = vpow2.f32 %v5646_v40 }
 0x3b3   :  { %v7307_v39 = vpop.eup %7306 }
 0x3b4   :  { %280 = vrot.lane.b32.xlu0 %v7307_v39, %s7433_s29 }
 0x3b5   :  { %v7309_v41 = vpop.eup %7308 }
 0x3b6   :  { %v271_v42 = vadd.f32 1.0, %v7309_v41 }
 0x3b8   :  { %7310 = vrcp.f32 %v271_v42 }
 0x3c2   :  { %v7311_v43 = vpop.eup %7310 }
 0x3c3   :  { %v278_v47 = vmul.f32 %v7311_v43, %v276_v46 }
 0x426   :  { %v281_v44 = vpop.permute.xlu0 %280 }
 0x427   :  { %v283_v45 = vmul.f32 %v7311_v43, %v281_v44 }
 0x429   :  { %285 = vrot.lane.b32.xlu1 %v283_v45, %s7433_s29 }
 0x49b   :  { %v286_v48 = vpop.permute.xlu1 %285 }
 0x49c   :  { %v288_v49 = vadd.f32 %v286_v48, %v278_v47 }
 0x49e   :  { %7312 = vtanh.f32 %v288_v49  ;;  %v355_v10 = vrot.slane %v288_v49, 6 }
 0x4a8   :  { %v7313_v50 = vpop.eup %7312 }
 0x4a9   :  { %291 = vrot.lane.b32.xlu0 %v7313_v50, %s7433_s29 }
 0x51b   :  { %v292_v51 = vpop.permute.xlu0 %291 }
 0x51c   :  { %v294_v52 = vmul.f32 %v7311_v43, %v292_v51 }
 0x51e   :  { %v295_v53 = vpack.c.bf16 %v294_v52, %v294_v52 }
 0x520   :  { %v297_v54 = vrot.slane %v295_v53, 1 }
 0x522   :  { %298 = vrot.lane.b32.xlu1 %v297_v54, %s7434_s1 }
 0x594   :  { %v7602_v55 = vpop.permute.xlu1 %298 }
 0x595   :  { %6388 = vmatmul.mubr.msk.bf16.vlgmr.msra.gmra.mrb[4].mxu1 %vm148_vm2, %v7602_v55 }
 0x596   :  { %6400 = vmatpush3.bf16.msra.mxu1 %v7543_v2  ;;  %6403 = vmatprep.mubr.msk.bf16.mxu1 %vm7431_vm0, %v7430_v0 }
 0x597   :  { %6401 = vmatprep.subr.bf16.mxu1 %v7430_v0 }
 0x59a   :  { %6402 = vmatpush3.bf16.msra.mxu1 %v7556_v4 }
 0x59b   :  { %6415 = vmatprep.subr.bf16.mxu1 %v7430_v0 }
 0x668   :  { %v337_v56 = vpop.f32.mrb[4].mxu1 }
 0x669   :  { %v344_v57 = vrot.slane %v337_v56, 4  ;;  %v6389_v58 = vpop.f32.mrb[5].mxu1 }
 0x66a   :  { %v340_v59 = vpop.f32.mrb[6].mxu1 }
 0x66b   :  { %v346_v60 = vadd.f32 %v344_v57, %v7578_v9  ;;  %v6390_v61 = vpop.f32.mrb[7].mxu1 }
 0x66d   :  { %7314 = vtanh.f32 %v346_v60  ;;  %v5648_v63 = vmul.f32 -1.442695, %v346_v60 }
 0x66f   :  { %7316 = vpow2.f32 %v5648_v63 }
 0x677   :  { %v7315_v62 = vpop.eup %7314 }
 0x678   :  { %359 = vrot.lane.b32.xlu0 %v7315_v62, %s7433_s29 }
 0x679   :  { %v7317_v1 = vpop.eup %7316 }
 0x67a   :  { %v350_v3 = vadd.f32 1.0, %v7317_v1 }
 0x67c   :  { %7318 = vrcp.f32 %v350_v3 }
 0x686   :  { %v7319_v6 = vpop.eup %7318 }
 0x687   :  { %v357_v12 = vmul.f32 %v7319_v6, %v355_v10 }
 0x6ea   :  { %v360_v7 = vpop.permute.xlu0 %359 }
 0x6eb   :  { %v362_v8 = vmul.f32 %v7319_v6, %v360_v7 }
 0x6ed   :  { %364 = vrot.lane.b32.xlu1 %v362_v8, %s7433_s29 }
 0x75f   :  { %v365_v13 = vpop.permute.xlu1 %364 }
 0x760   :  { %v367_v14 = vadd.f32 %v365_v13, %v357_v12 }
 0x762   :  { %7320 = vtanh.f32 %v367_v14  ;;  %v434_v35 = vrot.slane %v367_v14, 6 }
 0x76c   :  { %v7321_v15 = vpop.eup %7320 }
 0x76d   :  { %370 = vrot.lane.b32.xlu0 %v7321_v15, %s7433_s29 }
 0x7df   :  { %v371_v16 = vpop.permute.xlu0 %370 }
 0x7e0   :  { %v373_v17 = vmul.f32 %v7319_v6, %v371_v16 }
 0x7e2   :  { %v374_v18 = vpack.c.bf16 %v373_v17, %v373_v17 }
 0x7e4   :  { %v376_v19 = vrot.slane %v374_v18, 2 }
 0x7e6   :  { %377 = vrot.lane.b32.xlu1 %v376_v19, %s7434_s1 }
 0x858   :  { %v7617_v20 = vpop.permute.xlu1 %377 }
 0x859   :  { %6396 = vmatmul.mubr.msk.bf16.vlgmr.msra.gmra.mrb[8].mxu0 %vm148_vm2, %v7617_v20 }
 0x85a   :  { %6408 = vmatpush3.bf16.msra.mxu0 %v7543_v2  ;;  %6411 = vmatprep.mubr.msk.bf16.mxu0 %vm7431_vm0, %v7430_v0 }
 0x85b   :  { %6409 = vmatprep.subr.bf16.mxu0 %v7430_v0 }
 0x85e   :  { %6410 = vmatpush3.bf16.msra.mxu0 %v7556_v4 }
 0x85f   :  { %6423 = vmatprep.subr.bf16.mxu0 %v7430_v0 }
 0x92c   :  { %v416_v21 = vpop.f32.mrb[8].mxu0 }
 0x92d   :  { %v423_v22 = vrot.slane %v416_v21, 2  ;;  %v6397_v23 = vpop.f32.mrb[9].mxu0 }
 0x92e   :  { %v419_v24 = vpop.f32.mrb[10].mxu0 }
 0x92f   :  { %v425_v25 = vadd.f32 %v423_v22, %v7578_v9  ;;  %v6398_v26 = vpop.f32.mrb[11].mxu0 }
 0x931   :  { %7322 = vtanh.f32 %v425_v25  ;;  %v5650_v28 = vmul.f32 -1.442695, %v425_v25 }
 0x933   :  { %7324 = vpow2.f32 %v5650_v28 }
 0x93b   :  { %v7323_v27 = vpop.eup %7322 }
 0x93c   :  { %438 = vrot.lane.b32.xlu0 %v7323_v27, %s7433_s29 }
 0x93d   :  { %v7325_v29 = vpop.eup %7324 }
 0x93e   :  { %v429_v30 = vadd.f32 1.0, %v7325_v29  ;;  %v7668_v29 = vld [vmem:[%s9355_s4] sm:$0xff]  }
 0x940   :  { %7326 = vrcp.f32 %v429_v30 }
 0x94a   :  { %v7327_v31 = vpop.eup %7326 }
 0x94b   :  { %v436_v36 = vmul.f32 %v7327_v31, %v434_v35 }
 0x9ae   :  { %v439_v33 = vpop.permute.xlu0 %438 }
 0x9af   :  { %v441_v34 = vmul.f32 %v7327_v31, %v439_v33  ;;  %v7687_v33 = vld [vmem:[%s9356_s5] sm:$0xff]  }
 0x9b1   :  { %443 = vrot.lane.b32.xlu1 %v441_v34, %s7433_s29  ;;  %v7696_v34 = vld [vmem:[%s9356_s5 + $0x8] sm:$0xff]  }
 0xa23   :  { %v444_v37 = vpop.permute.xlu1 %443 }
 0xa24   :  { %v446_v38 = vadd.f32 %v444_v37, %v436_v36 }
 0xa26   :  { %7328 = vtanh.f32 %v446_v38  ;;  %v510_v57 = vrot.slane %v446_v38, 6 }
 0xa30   :  { %v7329_v9 = vpop.eup %7328 }
 0xa31   :  { %449 = vrot.lane.b32.xlu0 %v7329_v9, %s7433_s29 }
 0xaa3   :  { %v450_v39 = vpop.permute.xlu0 %449 }
 0xaa4   :  { %v452_v40 = vmul.f32 %v7327_v31, %v450_v39  ;;  %v7678_v31 = vld [vmem:[%s9355_s4 + $0x8] sm:$0xff]   ;;  %v7723_v39 = vld [vmem:[%s9357_s6] ss:$0 sm:$0xff] }
 0xaa6   :  { %v453_v41 = vpack.c.bf16 %v452_v40, %v452_v40 }
 0xaa8   :  { %v455_v42 = vrot.slane %v453_v41, 3 }
 0xaaa   :  { %456 = vrot.lane.b32.xlu1 %v455_v42, %s7434_s1 }
 0xb1c   :  { %v7632_v43 = vpop.permute.xlu1 %456 }
 0xb1d   :  { %6404 = vmatmul.mubr.msk.bf16.vlgmr.msra.gmra.mrb[8].mxu1 %vm148_vm2, %v7632_v43 }
 0xb1e   :  { %6416 = vmatpush3.bf16.msra.mxu1 %v7543_v2  ;;  %6419 = vmatprep.mubr.msk.bf16.mxu1 %vm7431_vm0, %v7430_v0 }
 0xb1f   :  { %6417 = vmatprep.subr.bf16.mxu1 %v7430_v0 }
 0xb22   :  { %6418 = vmatpush3.bf16.msra.mxu1 %v7556_v4 }
 0xb23   :  { %6431 = vmatprep.subr.bf16.mxu1 %v7430_v0 }
 0xbf0   :  { %v495_v44 = vpop.f32.mrb[8].mxu1 }
 0xbf1   :  { %v501_v45 = vadd.f32 %v495_v44, %v7580_v11  ;;  %v6405_v46 = vpop.f32.mrb[9].mxu1 }
 0xbf2   :  { %v498_v47 = vpop.f32.mrb[10].mxu1 }
 0xbf3   :  { %7330 = vtanh.f32 %v501_v45  ;;  %v6406_v48 = vpop.f32.mrb[11].mxu1  ;;  %v5652_v50 = vmul.f32 -1.442695, %v501_v45 }
 0xbf5   :  { %7332 = vpow2.f32 %v5652_v50 }
 0xbfd   :  { %v7331_v49 = vpop.eup %7330 }
 0xbfe   :  { %514 = vrot.lane.b32.xlu0 %v7331_v49, %s7433_s29 }
 0xbff   :  { %v7333_v51 = vpop.eup %7332 }
 0xc00   :  { %v505_v52 = vadd.f32 1.0, %v7333_v51 }
 0xc02   :  { %7334 = vrcp.f32 %v505_v52 }
 0xc0c   :  { %v7335_v53 = vpop.eup %7334 }
 0xc0d   :  { %v512_v58 = vmul.f32 %v7335_v53, %v510_v57 }
 0xc70   :  { %v515_v54 = vpop.permute.xlu0 %514 }
 0xc71   :  { %v517_v56 = vmul.f32 %v7335_v53, %v515_v54 }
 0xc73   :  { %519 = vrot.lane.b32.xlu1 %v517_v56, %s7433_s29 }
 0xce5   :  { %v520_v59 = vpop.permute.xlu1 %519 }
 0xce6   :  { %v522_v60 = vadd.f32 %v520_v59, %v512_v58 }
 0xce8   :  { %7336 = vtanh.f32 %v522_v60  ;;  %v588_v19 = vrot.slane %v522_v60, 6 }
 0xcf2   :  { %v7337_v61 = vpop.eup %7336 }
 0xcf3   :  { %525 = vrot.lane.b32.xlu0 %v7337_v61, %s7433_s29 }
 0xd65   :  { %v526_v62 = vpop.permute.xlu0 %525 }
 0xd66   :  { %v528_v63 = vmul.f32 %v7335_v53, %v526_v62 }
 0xd68   :  { %v529_v1 = vpack.c.bf16 %v528_v63, %v528_v63 }
 0xd6a   :  { %531 = vrot.lane.b32.xlu1 %v529_v1, %s7434_s1 }
 0xddc   :  { %v7647_v3 = vpop.permute.xlu1 %531 }
 0xddd   :  { %6412 = vmatmul.mubr.msk.bf16.vlgmr.msra.gmra.mrb[12].mxu0 %vm148_vm2, %v7647_v3 }
 0xdde   :  { %6424 = vmatpush3.bf16.msra.mxu0 %v7543_v2  ;;  %6427 = vmatprep.mubr.msk.bf16.mxu0 %vm7431_vm0, %v7430_v0 }
 0xddf   :  { %6425 = vmatprep.subr.bf16.mxu0 %v7430_v0 }
 0xde2   :  { %6426 = vmatpush3.bf16.msra.mxu0 %v7556_v4 }
 0xde3   :  { %6447 = vmatprep.subr.bf16.mxu0 %v7430_v0 }
 0xeb0   :  { %v570_v6 = vpop.f32.mrb[12].mxu0 }
 0xeb1   :  { %v577_v7 = vrot.slane %v570_v6, 6  ;;  %v6413_v8 = vpop.f32.mrb[13].mxu0 }
 0xeb2   :  { %v573_v10 = vpop.f32.mrb[14].mxu0 }
 0xeb3   :  { %v579_v12 = vadd.f32 %v577_v7, %v7580_v11  ;;  %v6414_v13 = vpop.f32.mrb[15].mxu0 }
 0xeb5   :  { %7338 = vtanh.f32 %v579_v12  ;;  %v5654_v2 = vmul.f32 -1.442695, %v579_v12 }
 0xeb7   :  { %7340 = vpow2.f32 %v5654_v2 }
 0xebf   :  { %v7339_v14 = vpop.eup %7338 }
 0xec0   :  { %592 = vrot.lane.b32.xlu0 %v7339_v14, %s7433_s29 }
 0xec1   :  { %v7341_v15 = vpop.eup %7340 }
 0xec2   :  { %v583_v16 = vadd.f32 1.0, %v7341_v15 }
 0xec4   :  { %7342 = vrcp.f32 %v583_v16 }
 0xece   :  { %v7343_v17 = vpop.eup %7342 }
 0xecf   :  { %v590_v21 = vmul.f32 %v7343_v17, %v588_v19 }
 0xf32   :  { %v593_v4 = vpop.permute.xlu0 %592 }
 0xf33   :  { %v595_v18 = vmul.f32 %v7343_v17, %v593_v4 }
 0xf35   :  { %597 = vrot.lane.b32.xlu1 %v595_v18, %s7433_s29 }
 0xfa7   :  { %v598_v22 = vpop.permute.xlu1 %597 }
 0xfa8   :  { %v7660_v23 = vadd.f32 %v598_v22, %v590_v21 }
 0xfaa   :  { %7344 = vtanh.f32 %v7660_v23  ;;  %v667_v60 = vrot.slane %v7660_v23, 6 }
 0xfb4   :  { %v7345_v24 = vpop.eup %7344 }
 0xfb5   :  { %603 = vrot.lane.b32.xlu0 %v7345_v24, %s7433_s29 }
0x1027   :  { %v604_v25 = vpop.permute.xlu0 %603 }
0x1028   :  { %v606_v26 = vmul.f32 %v7343_v17, %v604_v25 }
0x102a   :  { %v607_v27 = vpack.c.bf16 %v606_v26, %v606_v26 }
0x102c   :  { %v609_v28 = vrot.slane %v607_v27, 1 }
0x102e   :  { %610 = vrot.lane.b32.xlu1 %v609_v28, %s7434_s1 }
0x10a0   :  { %v7670_v30 = vpop.permute.xlu1 %610 }
0x10a1   :  { %6420 = vmatmul.mubr.msk.bf16.vlgmr.msra.gmra.mrb[12].mxu1 %vm148_vm2, %v7670_v30 }
0x10a2   :  { %6432 = vmatpush3.bf16.msra.mxu1 %v7668_v29  ;;  %6435 = vmatprep.mubr.msk.bf16.mxu1 %vm7431_vm0, %v7430_v0 }
0x10a3   :  { %6433 = vmatprep.subr.bf16.mxu1 %v7430_v0 }
0x10a6   :  { %6434 = vmatpush3.bf16.msra.mxu1 %v7678_v31 }
0x10a7   :  { %6439 = vmatprep.subr.bf16.mxu1 %v7430_v0 }
0x10a9   :  { %6436 = vmatmul.mubr.msk.bf16.vlgmr.msra.gmra.mrb[16].mxu1 %vm148_vm2, %v7587_v32 }
0x10aa   :  { %6440 = vmatpush3.bf16.msra.mxu1 %v7687_v33  ;;  %6443 = vmatprep.mubr.msk.bf16.mxu1 %vm7431_vm0, %v7430_v0 }
0x10ab   :  { %6441 = vmatprep.subr.bf16.mxu1 %v7430_v0 }
0x10ae   :  { %6442 = vmatpush3.bf16.msra.mxu1 %v7696_v34 }
0x10af   :  { %6463 = vmatprep.subr.bf16.mxu1 %v7430_v0 }
0x10b5   :  { %6444 = vmatmul.mubr.bf16.vlgmr.msra.gmra.mrb[16].mxu1 %v7432_v5 }
0x10b6   :  { %6464 = vmatpush3.bf16.msra.mxu1 %v7668_v29  ;;  %6467 = vmatprep.mubr.msk.bf16.mxu1 %vm7431_vm0, %v7430_v0 }
0x10b7   :  { %6465 = vmatprep.subr.bf16.mxu1 %v7430_v0 }
0x10ba   :  { %6466 = vmatpush3.bf16.msra.mxu1 %v7678_v31 }
0x10bb   :  { %6471 = vmatprep.subr.bf16.mxu1 %v7430_v0 }
0x10bd   :  { %6468 = vmatmul.mubr.msk.bf16.vlgmr.msra.gmra.mrb[20].mxu1 %vm148_vm2, %v7617_v20 }
0x10be   :  { %6472 = vmatpush3.bf16.msra.mxu1 %v7687_v33  ;;  %6475 = vmatprep.mubr.msk.bf16.mxu1 %vm7431_vm0, %v7430_v0 }
0x10bf   :  { %6473 = vmatprep.subr.bf16.mxu1 %v7430_v0 }
0x10c2   :  { %6474 = vmatpush3.bf16.msra.mxu1 %v7696_v34 }
0x10c3   :  { %6495 = vmatprep.subr.bf16.mxu1 %v7430_v0 }
0x1174   :  { %v649_v32 = vpop.f32.mrb[12].mxu1 }
0x1175   :  { %v656_v35 = vrot.slane %v649_v32, 4  ;;  %v6421_v36 = vpop.f32.mrb[13].mxu1 }
0x1176   :  { %v652_v37 = vpop.f32.mrb[14].mxu1 }
0x1177   :  { %v658_v38 = vadd.f32 %v656_v35, %v7580_v11  ;;  %v6422_v9 = vpop.f32.mrb[15].mxu1 }
0x1179   :  { %7346 = vtanh.f32 %v658_v38  ;;  %v5656_v47 = vmul.f32 -1.442695, %v658_v38 }
0x1183   :  { %v7347_v20 = vpop.eup %7346 }
0x1184   :  { %671 = vrot.lane.b32.xlu0 %v7347_v20, %s7433_s29 }
0x1188   :  { %v879_v40 = vpop.f32.mrb[16].mxu1 }
0x1189   :  { %v6599_v41 = vadd.f32 %v7723_v39, %v879_v40  ;;  %v6445_v42 = vpop.f32.mrb[17].mxu1 }
0x118a   :  { %v882_v44 = vpop.f32.mrb[18].mxu1 }
0x118b   :  { %7348 = vtanh.f32 %v6599_v41  ;;  %v6446_v45 = vpop.f32.mrb[19].mxu1  ;;  %v5665_v50 = vmul.f32 -1.442695, %v6599_v41 }
0x118c   :  { %7350 = vpow2.f32 %v5656_v47 }
0x1195   :  { %v7349_v46 = vpop.eup %7348 }
0x1196   :  { %895 = vrot.lane.b32.xlu1 %v7349_v46, %s7433_s29  ;;  %v7351_v48 = vpop.eup %7350 }
0x1197   :  { %v662_v49 = vadd.f32 1.0, %v7351_v48 }
0x1199   :  { %7352 = vrcp.f32 %v662_v49 }
0x119a   :  { %7354 = vpow2.f32 %v5665_v50 }
0x11a3   :  { %v7353_v51 = vpop.eup %7352 }
0x11a4   :  { %v7355_v53 = vpop.eup %7354  ;;  %v669_v61 = vmul.f32 %v7353_v51, %v667_v60 }
0x11a5   :  { %v889_v56 = vadd.f32 1.0, %v7355_v53 }
0x11a7   :  { %7356 = vrcp.f32 %v889_v56 }
0x11b1   :  { %v7357_v57 = vpop.eup %7356 }
0x11b2   :  { %v893_v6 = vmul.f32 0.0, %v7357_v57 }
0x11f6   :  { %v672_v52 = vpop.permute.xlu0 %671 }
0x11f7   :  { %v674_v54 = vmul.f32 %v7353_v51, %v672_v52 }
0x11f9   :  { %676 = vrot.lane.b32.xlu0 %v674_v54, %s7433_s29 }
0x1208   :  { %v896_v58 = vpop.permute.xlu1 %895 }
0x1209   :  { %v898_v59 = vmul.f32 %v7357_v57, %v896_v58 }
0x120b   :  { %900 = vrot.lane.b32.xlu1 %v898_v59, %s7433_s29 }
0x126b   :  { %v677_v62 = vpop.permute.xlu0 %676 }
0x126c   :  { %v7730_v63 = vadd.f32 %v677_v62, %v669_v61 }
0x126e   :  { %7358 = vtanh.f32 %v7730_v63 }
0x1278   :  { %v7359_v1 = vpop.eup %7358 }
0x1279   :  { %682 = vrot.lane.b32.xlu0 %v7359_v1, %s7433_s29 }
0x127d   :  { %v901_v7 = vpop.permute.xlu1 %900 }
0x127e   :  { %v903_v8 = vadd.f32 %v901_v7, %v893_v6 }
0x1280   :  { %7360 = vtanh.f32 %v903_v8 }
0x128a   :  { %v7361_v10 = vpop.eup %7360 }
0x128b   :  { %906 = vrot.lane.b32.xlu1 %v7361_v10, %s7433_s29 }
0x12eb   :  { %v683_v12 = vpop.permute.xlu0 %682 }
0x12ec   :  { %v685_v13 = vmul.f32 %v7353_v51, %v683_v12 }
0x12ee   :  { %v686_v14 = vpack.c.bf16 %v685_v13, %v685_v13 }
0x12f0   :  { %v688_v2 = vrot.slane %v686_v14, 2 }
0x12f2   :  { %689 = vrot.lane.b32.xlu0 %v688_v2, %s7434_s1 }
0x12fd   :  { %v907_v15 = vpop.permute.xlu1 %906 }
0x12fe   :  { %v909_v16 = vmul.f32 %v7357_v57, %v907_v15 }
0x1300   :  { %v910_v17 = vpack.c.bf16 %v909_v16, %v909_v16 }
0x1302   :  { %952 = vrot.lane.b32.xlu1 %v910_v17, %s7434_s1 }
0x1364   :  { %v7737_v4 = vpop.permute.xlu0 %689 }
0x1365   :  { %6428 = vmatmul.mubr.msk.bf16.vlgmr.msra.gmra.mrb[16].mxu0 %vm148_vm2, %v7737_v4 }
0x1366   :  { %6448 = vmatpush3.bf16.msra.mxu0 %v7668_v29  ;;  %6451 = vmatprep.mubr.msk.bf16.mxu0 %vm7431_vm0, %v7430_v0 }
0x1367   :  { %6449 = vmatprep.subr.bf16.mxu0 %v7430_v0 }
0x136a   :  { %6450 = vmatpush3.bf16.msra.mxu0 %v7678_v31 }
0x136b   :  { %6455 = vmatprep.subr.bf16.mxu0 %v7430_v0 }
0x136d   :  { %6452 = vmatmul.mubr.msk.bf16.vlgmr.msra.gmra.mrb[20].mxu0 %vm148_vm2, %v7602_v55 }
0x136e   :  { %6456 = vmatpush3.bf16.msra.mxu0 %v7687_v33  ;;  %6459 = vmatprep.mubr.msk.bf16.mxu0 %vm7431_vm0, %v7430_v0 }
0x136f   :  { %6457 = vmatprep.subr.bf16.mxu0 %v7430_v0 }
0x1372   :  { %6458 = vmatpush3.bf16.msra.mxu0 %v7696_v34 }
0x1373   :  { %6479 = vmatprep.subr.bf16.mxu0 %v7430_v0 }
0x1374   :  { %v953_v18 = vpop.permute.xlu1 %952 }
0x1379   :  { %6460 = vmatmul.mubr.msk.bf16.vlgmr.msra.gmra.mrb[20].mxu0 %vm148_vm2, %v953_v18 }
0x137a   :  { %6480 = vmatpush3.bf16.msra.mxu0 %v7668_v29  ;;  %6483 = vmatprep.mubr.msk.bf16.mxu0 %vm7431_vm0, %v7430_v0 }
0x137b   :  { %6481 = vmatprep.subr.bf16.mxu0 %v7430_v0 }
0x137e   :  { %6482 = vmatpush3.bf16.msra.mxu0 %v7678_v31 }
0x137f   :  { %6487 = vmatprep.subr.bf16.mxu0 %v7430_v0 }
0x1381   :  { %6484 = vmatmul.mubr.msk.bf16.vlgmr.msra.gmra.mrb[24].mxu0 %vm148_vm2, %v7632_v43 }
0x1382   :  { %6488 = vmatpush3.bf16.msra.mxu0 %v7687_v33  ;;  %6491 = vmatprep.mubr.msk.bf16.mxu0 %vm7431_vm0, %v7430_v0 }
0x1383   :  { %6489 = vmatprep.subr.bf16.mxu0 %v7430_v0 }
0x1386   :  { %6490 = vmatpush3.bf16.msra.mxu0 %v7696_v34 }
0x1387   :  { %6511 = vmatprep.subr.bf16.mxu0 %v7430_v0 }
0x1438   :  { %v7770_v55 = vpop.f32.mrb[16].mxu0 }
0x1439   :  { %v6429_v19 = vpop.f32.mrb[17].mxu0 }
0x143a   :  { %v731_v21 = vpop.f32.mrb[18].mxu0 }
0x143b   :  { %v6430_v22 = vpop.f32.mrb[19].mxu0 }
0x144c   :  { %v991_v23 = vpop.f32.mrb[20].mxu0 }
0x144d   :  { %v6600_v24 = vadd.f32 %v7723_v39, %v991_v23  ;;  %v6461_v43 = vpop.f32.mrb[21].mxu0 }
0x144e   :  { %v994_v25 = vpop.f32.mrb[22].mxu0 }
0x144f   :  { %7362 = vtanh.f32 %v6600_v24  ;;  %v6462_v26 = vpop.f32.mrb[23].mxu0  ;;  %v5668_v28 = vmul.f32 -1.442695, %v6600_v24 }
0x1451   :  { %7364 = vpow2.f32 %v5668_v28 }
0x1459   :  { %v7363_v27 = vpop.eup %7362 }
0x145a   :  { %1007 = vrot.lane.b32.xlu0 %v7363_v27, %s7433_s29 }
0x145b   :  { %v7365_v32 = vpop.eup %7364 }
0x145c   :  { %v1001_v35 = vadd.f32 1.0, %v7365_v32 }
0x145e   :  { %7366 = vrcp.f32 %v1001_v35 }
0x1468   :  { %v7367_v36 = vpop.eup %7366 }
0x1469   :  { %v1005_v9 = vmul.f32 %v7367_v36, %v903_v8 }
0x14cc   :  { %v1008_v37 = vpop.permute.xlu0 %1007 }
0x14cd   :  { %v1010_v38 = vmul.f32 %v7367_v36, %v1008_v37 }
0x14cf   :  { %1012 = vrot.lane.b32.xlu1 %v1010_v38, %s7433_s29 }
0x1541   :  { %v1013_v20 = vpop.permute.xlu1 %1012 }
0x1542   :  { %v1015_v40 = vadd.f32 %v1013_v20, %v1005_v9 }
0x1544   :  { %7368 = vtanh.f32 %v1015_v40 }
0x154e   :  { %v7369_v41 = vpop.eup %7368 }
0x154f   :  { %1018 = vrot.lane.b32.xlu0 %v7369_v41, %s7433_s29 }
0x15c1   :  { %v1019_v42 = vpop.permute.xlu0 %1018 }
0x15c2   :  { %v1021_v44 = vmul.f32 %v7367_v36, %v1019_v42 }
0x15c4   :  { %v1022_v45 = vpack.c.bf16 %v1021_v44, %v1021_v44 }
0x15c6   :  { %1064 = vrot.lane.b32.xlu1 %v1022_v45, %s7434_s1 }
0x1638   :  { %v1065_v46 = vpop.permute.xlu1 %1064 }
0x1639   :  { %6476 = vmatmul.mubr.msk.bf16.vlgmr.msra.gmra.mrb[20].mxu1 %vm148_vm2, %v1065_v46 }
0x163a   :  { %6496 = vmatpush3.bf16.msra.mxu1 %v7668_v29  ;;  %6499 = vmatprep.mubr.msk.bf16.mxu1 %vm7431_vm0, %v7430_v0 }
0x163b   :  { %6497 = vmatprep.subr.bf16.mxu1 %v7430_v0 }
0x163e   :  { %6498 = vmatpush3.bf16.msra.mxu1 %v7678_v31 }
0x163f   :  { %6503 = vmatprep.subr.bf16.mxu1 %v7430_v0 }
0x1641   :  { %6500 = vmatmul.mubr.msk.bf16.vlgmr.msra.gmra.mrb[24].mxu1 %vm148_vm2, %v7647_v3 }
0x1642   :  { %6504 = vmatpush3.bf16.msra.mxu1 %v7687_v33  ;;  %6507 = vmatprep.mubr.msk.bf16.mxu1 %vm7431_vm0, %v7430_v0 }
0x1643   :  { %6505 = vmatprep.subr.bf16.mxu1 %v7430_v0 }
0x1646   :  { %6506 = vmatpush3.bf16.msra.mxu1 %v7696_v34 }
0x1647   :  { %6527 = vmatprep.subr.bf16.mxu1 %v7430_v0 }
0x170c   :  { %v1103_v47 = vpop.f32.mrb[20].mxu1 }
0x170d   :  { %v6601_v48 = vadd.f32 %v7723_v39, %v1103_v47  ;;  %v6477_v49 = vpop.f32.mrb[21].mxu1 }
0x170e   :  { %v1106_v50 = vpop.f32.mrb[22].mxu1 }
0x170f   :  { %7370 = vtanh.f32 %v6601_v48  ;;  %v6478_v51 = vpop.f32.mrb[23].mxu1  ;;  %v5671_v3 = vmul.f32 -1.442695, %v6601_v48 }
0x1711   :  { %7372 = vpow2.f32 %v5671_v3 }
0x1719   :  { %v7371_v52 = vpop.eup %7370 }
0x171a   :  { %1119 = vrot.lane.b32.xlu0 %v7371_v52, %s7433_s29 }
0x171b   :  { %v7373_v53 = vpop.eup %7372 }
0x171c   :  { %v1113_v54 = vadd.f32 1.0, %v7373_v53 }
0x171e   :  { %7374 = vrcp.f32 %v1113_v54 }
0x1728   :  { %v7375_v56 = vpop.eup %7374 }
0x1729   :  { %v1117_v59 = vmul.f32 %v7375_v56, %v1015_v40 }
0x178c   :  { %v1120_v57 = vpop.permute.xlu0 %1119 }
0x178d   :  { %v1122_v58 = vmul.f32 %v7375_v56, %v1120_v57 }
0x178f   :  { %1124 = vrot.lane.b32.xlu1 %v1122_v58, %s7433_s29 }
0x1801   :  { %v1125_v60 = vpop.permute.xlu1 %1124 }
0x1802   :  { %v1127_v61 = vadd.f32 %v1125_v60, %v1117_v59 }
0x1804   :  { %7376 = vtanh.f32 %v1127_v61 }
0x180e   :  { %v7377_v62 = vpop.eup %7376 }
0x180f   :  { %1130 = vrot.lane.b32.xlu0 %v7377_v62, %s7433_s29 }
0x1881   :  { %v1131_v1 = vpop.permute.xlu0 %1130 }
0x1882   :  { %v1133_v6 = vmul.f32 %v7375_v56, %v1131_v1  ;;  %v735_v1 = vrot.slane %v7770_v55, 2 }
0x1884   :  { %v1134_v7 = vpack.c.bf16 %v1133_v6, %v1133_v6 }
0x1886   :  { %1176 = vrot.lane.b32.xlu1 %v1134_v7, %s7434_s1 }
0x18f8   :  { %v1177_v8 = vpop.permute.xlu1 %1176 }
0x18f9   :  { %6492 = vmatmul.mubr.msk.bf16.vlgmr.msra.gmra.mrb[24].mxu0 %vm148_vm2, %v1177_v8 }
0x18fa   :  { %6512 = vmatpush3.bf16.msra.mxu0 %v7668_v29  ;;  %6515 = vmatprep.mubr.msk.bf16.mxu0 %vm7431_vm0, %v7430_v0 }
0x18fb   :  { %6513 = vmatprep.subr.bf16.mxu0 %v7430_v0 }
0x18fe   :  { %6514 = vmatpush3.bf16.msra.mxu0 %v7678_v31 }
0x18ff   :  { %6519 = vmatprep.subr.bf16.mxu0 %v7430_v0 }
0x1901   :  { %6516 = vmatmul.mubr.msk.bf16.vlgmr.msra.gmra.mrb[28].mxu0 %vm148_vm2, %v7670_v30 }
0x1902   :  { %6520 = vmatpush3.bf16.msra.mxu0 %v7687_v33  ;;  %6523 = vmatprep.mubr.msk.bf16.mxu0 %vm7431_vm0, %v7430_v0 }
0x1903   :  { %6521 = vmatprep.subr.bf16.mxu0 %v7430_v0 }
0x1906   :  { %6522 = vmatpush3.bf16.msra.mxu0 %v7696_v34 }
0x1907   :  { %6543 = vmatprep.subr.bf16.mxu0 %v7430_v0 }
0x19cc   :  { %v1215_v10 = vpop.f32.mrb[24].mxu0 }
0x19cd   :  { %v6602_v12 = vadd.f32 %v7723_v39, %v1215_v10  ;;  %v6493_v13 = vpop.f32.mrb[25].mxu0  ;;  %v737_v10 = vadd.f32 %v735_v1, %v7580_v11  ;;  %v746_v11 = vrot.slane %v7730_v63, 6  ;;  %v6688_v1 = vld [vmem:[%s9358_s7] ss:$24 sps:$4 sm:$0xff]  }
0x19ce   :  { %v1218_v14 = vpop.f32.mrb[26].mxu0 }
0x19cf   :  { %7378 = vtanh.f32 %v6602_v12  ;;  %v6494_v2 = vpop.f32.mrb[27].mxu0  ;;  %v5674_v30 = vmul.f32 -1.442695, %v6602_v12  ;;  %v5658_v14 = vmul.f32 -1.442695, %v737_v10 }
0x19d1   :  { %7380 = vpow2.f32 %v5674_v30 }
0x19d9   :  { %v7379_v15 = vpop.eup %7378 }
0x19da   :  { %1231 = vrot.lane.b32.xlu0 %v7379_v15, %s7433_s29 }
0x19db   :  { %v7381_v16 = vpop.eup %7380 }
0x19dc   :  { %v1225_v17 = vadd.f32 1.0, %v7381_v16 }
0x19de   :  { %7382 = vrcp.f32 %v1225_v17 }
0x19e8   :  { %v7383_v18 = vpop.eup %7382 }
0x19e9   :  { %v1229_v22 = vmul.f32 %v7383_v18, %v1127_v61 }
0x1a4c   :  { %v1232_v19 = vpop.permute.xlu0 %1231 }
0x1a4d   :  { %v1234_v21 = vmul.f32 %v7383_v18, %v1232_v19 }
0x1a4f   :  { %1236 = vrot.lane.b32.xlu1 %v1234_v21, %s7433_s29 }
0x1ac1   :  { %v1237_v23 = vpop.permute.xlu1 %1236 }
0x1ac2   :  { %v1239_v24 = vadd.f32 %v1237_v23, %v1229_v22 }
0x1ac4   :  { %7384 = vtanh.f32 %v1239_v24 }
0x1ace   :  { %v7385_v43 = vpop.eup %7384 }
0x1acf   :  { %1242 = vrot.lane.b32.xlu0 %v7385_v43, %s7433_s29 }
0x1b41   :  { %v1243_v25 = vpop.permute.xlu0 %1242 }
0x1b42   :  { %v1245_v26 = vmul.f32 %v7383_v18, %v1243_v25 }
0x1b44   :  { %v1246_v27 = vpack.c.bf16 %v1245_v26, %v1245_v26 }
0x1b46   :  { %1288 = vrot.lane.b32.xlu1 %v1246_v27, %s7434_s1 }
0x1bb8   :  { %v1289_v28 = vpop.permute.xlu1 %1288 }
0x1bb9   :  { %6508 = vmatmul.mubr.msk.bf16.vlgmr.msra.gmra.mrb[24].mxu1 %vm148_vm2, %v1289_v28 }
0x1bba   :  { %6528 = vmatpush3.bf16.msra.mxu1 %v7668_v29  ;;  %6531 = vmatprep.mubr.msk.bf16.mxu1 %vm7431_vm0, %v7430_v0 }
0x1bbb   :  { %6529 = vmatprep.subr.bf16.mxu1 %v7430_v0 }
0x1bbe   :  { %6530 = vmatpush3.bf16.msra.mxu1 %v7678_v31 }
0x1bbf   :  { %6535 = vmatprep.subr.bf16.mxu1 %v7430_v0 }
0x1bc1   :  { %6532 = vmatmul.mubr.msk.bf16.vlgmr.msra.gmra.mrb[28].mxu1 %vm148_vm2, %v7737_v4 }
0x1bc2   :  { %6536 = vmatpush3.bf16.msra.mxu1 %v7687_v33  ;;  %6539 = vmatprep.mubr.msk.bf16.mxu1 %vm7431_vm0, %v7430_v0 }
0x1bc3   :  { %6537 = vmatprep.subr.bf16.mxu1 %v7430_v0 }
0x1bc6   :  { %6538 = vmatpush3.bf16.msra.mxu1 %v7696_v34 }
0x1c8c   :  { %v1327_v32 = vpop.f32.mrb[24].mxu1 }
0x1c8d   :  { %v6603_v35 = vadd.f32 %v7723_v39, %v1327_v32  ;;  %v6509_v36 = vpop.f32.mrb[25].mxu1 }
0x1c8e   :  { %v1330_v37 = vpop.f32.mrb[26].mxu1 }
0x1c8f   :  { %7386 = vtanh.f32 %v6603_v35  ;;  %v6510_v38 = vpop.f32.mrb[27].mxu1  ;;  %v5677_v4 = vmul.f32 -1.442695, %v6603_v35 }
0x1c91   :  { %7388 = vpow2.f32 %v5677_v4 }
0x1c99   :  { %v7387_v9 = vpop.eup %7386 }
0x1c9a   :  { %1343 = vrot.lane.b32.xlu0 %v7387_v9, %s7433_s29 }
0x1c9b   :  { %v7389_v20 = vpop.eup %7388 }
0x1c9c   :  { %v1337_v40 = vadd.f32 1.0, %v7389_v20 }
0x1c9e   :  { %7390 = vrcp.f32 %v1337_v40 }
0x1ca8   :  { %v7391_v41 = vpop.eup %7390 }
0x1ca9   :  { %v1341_v45 = vmul.f32 %v7391_v41, %v1239_v24 }
0x1d0c   :  { %v1344_v42 = vpop.permute.xlu0 %1343 }
0x1d0d   :  { %v1346_v44 = vmul.f32 %v7391_v41, %v1344_v42 }
0x1d0f   :  { %1348 = vrot.lane.b32.xlu1 %v1346_v44, %s7433_s29 }
0x1d81   :  { %v1349_v46 = vpop.permute.xlu1 %1348 }
0x1d82   :  { %v1351_v47 = vadd.f32 %v1349_v46, %v1341_v45 }
0x1d84   :  { %7392 = vtanh.f32 %v1351_v47 }
0x1d8e   :  { %v7393_v48 = vpop.eup %7392 }
0x1d8f   :  { %1354 = vrot.lane.b32.xlu0 %v7393_v48, %s7433_s29 }
0x1e01   :  { %v1355_v49 = vpop.permute.xlu0 %1354 }
0x1e02   :  { %v1357_v50 = vmul.f32 %v7391_v41, %v1355_v49 }
0x1e04   :  { %v1358_v51 = vpack.c.bf16 %v1357_v50, %v1357_v50 }
0x1e06   :  { %1400 = vrot.lane.b32.xlu1 %v1358_v51, %s7434_s1 }
0x1e78   :  { %v1401_v52 = vpop.permute.xlu1 %1400 }
0x1e79   :  { %6524 = vmatmul.mubr.msk.bf16.vlgmr.msra.gmra.mrb[28].mxu0 %vm148_vm2, %v1401_v52 }
0x1e7a   :  { %6544 = vmatpush3.bf16.msra.mxu0 %v7668_v29  ;;  %6547 = vmatprep.mubr.msk.bf16.mxu0 %vm7431_vm0, %v7430_v0 }
0x1e7b   :  { %6545 = vmatprep.subr.bf16.mxu0 %v7430_v0 }
0x1e7e   :  { %6546 = vmatpush3.bf16.msra.mxu0 %v7678_v31 }
0x1e7f   :  { %6551 = vmatprep.subr.bf16.mxu0 %v7430_v0 }
0x1f4c   :  { %v1439_v3 = vpop.f32.mrb[28].mxu0 }
0x1f4d   :  { %v6604_v53 = vadd.f32 %v7723_v39, %v1439_v3  ;;  %v6525_v54 = vpop.f32.mrb[29].mxu0 }
0x1f4e   :  { %v1442_v56 = vpop.f32.mrb[30].mxu0 }
0x1f4f   :  { %7394 = vtanh.f32 %v6604_v53  ;;  %v6526_v57 = vpop.f32.mrb[31].mxu0  ;;  %v5680_v29 = vmul.f32 -1.442695, %v6604_v53 }
0x1f51   :  { %7396 = vpow2.f32 %v5680_v29 }
0x1f59   :  { %v7395_v58 = vpop.eup %7394 }
0x1f5a   :  { %1455 = vrot.lane.b32.xlu0 %v7395_v58, %s7433_s29 }
0x1f5b   :  { %v7397_v59 = vpop.eup %7396 }
0x1f5c   :  { %v1449_v60 = vadd.f32 1.0, %v7397_v59 }
0x1f5e   :  { %7398 = vrcp.f32 %v1449_v60 }
0x1f68   :  { %v7399_v61 = vpop.eup %7398 }
0x1f69   :  { %v1453_v6 = vmul.f32 %v7399_v61, %v1351_v47 }
0x1fcc   :  { %v1456_v62 = vpop.permute.xlu0 %1455 }
0x1fcd   :  { %v1458_v31 = vmul.f32 %v7399_v61, %v1456_v62 }
0x1fcf   :  { %1460 = vrot.lane.b32.xlu1 %v1458_v31, %s7433_s29 }
0x2041   :  { %v1461_v7 = vpop.permute.xlu1 %1460 }
0x2042   :  { %v1463_v8 = vadd.f32 %v1461_v7, %v1453_v6  ;;  %v6690_v6 = vld [vmem:[%s9358_s7 + $0x4] ss:$24 sps:$4 sm:$0xff]   ;;  %v6691_v7 = vld [vmem:[%s9358_s7 + $0x8] ss:$24 sps:$4 sm:$0xff]  }
0x2043   :  { %1812 = vmatprep.subr.bf16.mxu1 %v6690_v6  ;;  %v6769_v6 = vld [vmem:[%s9359_s9 + $0x198] ss:$20 sps:$4 sm:$0xff]  }
0x2044   :  { %7400 = vtanh.f32 %v1463_v8 }
0x2045   :  { %7402 = vtanh.f32 %v737_v10  ;;  %v6694_v10 = vld [vmem:[%s9358_s7 + $0x30] ss:$24 sps:$4 sm:$0xff]  }
0x2046   :  { %7404 = vpow2.f32 %v5658_v14  ;;  %v6699_v14 = vld [vmem:[%s9358_s7 + $0x3c] ss:$24 sps:$4 sm:$0xff]  }
0x204e   :  { %v7401_v12 = vpop.eup %7400 }
0x204f   :  { %1466 = vrot.lane.b32.xlu0 %v7401_v12, %s7433_s29  ;;  %v7403_v13 = vpop.eup %7402  ;;  %v6696_v12 = vld [vmem:[%s9358_s7 + $0x34] ss:$24 sps:$4 sm:$0xff]  }
0x2050   :  { %v7405_v2 = vpop.eup %7404 }
0x2051   :  { %v741_v15 = vadd.f32 1.0, %v7405_v2 }
0x2053   :  { %750 = vrot.lane.b32.xlu0 %v7403_v13, %s7433_s29  ;;  %7406 = vrcp.f32 %v741_v15  ;;  %v6697_v13 = vld [vmem:[%s9358_s7 + $0x38] ss:$24 sps:$4 sm:$0xff]   ;;  %v6702_v15 = vld [vmem:[%s9358_s7 + $0x14] ss:$24 sps:$4 sm:$0xff]  }
0x205d   :  { %v7407_v17 = vpop.eup %7406 }
0x205e   :  { %v748_v22 = vmul.f32 %v7407_v17, %v746_v11  ;;  %v6706_v11 = vld [vmem:[%s9359_s9] ss:$20 sps:$4 sm:$0xff]  }
0x20c1   :  { %v1467_v30 = vpop.permute.xlu0 %1466 }
0x20c2   :  { %v1469_v55 = vmul.f32 %v7399_v61, %v1467_v30 }
0x20c4   :  { %v1470_v16 = vpack.c.bf16 %v1469_v55, %v1469_v55 }
0x20c5   :  { %v751_v18 = vpop.permute.xlu0 %750 }
0x20c6   :  { %v753_v19 = vmul.f32 %v7407_v17, %v751_v18  ;;  %1512 = vrot.lane.b32.xlu1 %v1470_v16, %s7434_s1  ;;  %v6708_v16 = vld [vmem:[%s9359_s9 + $0x4] ss:$20 sps:$4 sm:$0xff]   ;;  %v6700_v18 = vld [vmem:[%s9358_s7 + $0x10] ss:$24 sps:$4 sm:$0xff]  }
0x20c8   :  { %755 = vrot.lane.b32.xlu0 %v753_v19, %s7433_s29  ;;  %v6705_v19 = vld [vmem:[%s9358_s7 + $0x44] ss:$24 sps:$4 sm:$0xff]  }
0x2138   :  { %v1513_v21 = vpop.permute.xlu1 %1512 }
0x2139   :  { %6540 = vmatmul.mubr.msk.bf16.vlgmr.msra.gmra.mrb[28].mxu1 %vm148_vm2, %v1513_v21 }
0x213a   :  { %v756_v23 = vpop.permute.xlu0 %755  ;;  %1844 = vmatprep.mubr.bf16.mxu1 %v7432_v5  ;;  %1813 = vmatpush1.bf16.msra.mxu1 %v6688_v1  ;;  %v6780_v1 = vld [vmem:[%s9359_s9 + $0x1e4] ss:$20 sps:$4 sm:$0xff]  }
0x213b   :  { %v758_v24 = vadd.f32 %v756_v23, %v748_v22  ;;  %1814 = vmatprep.subr.bf16.mxu1 %v6696_v12  ;;  %v6714_v22 = vld [vmem:[%s9359_s9 + $0x2c] ss:$20 sps:$4 sm:$0xff]  }
0x213c   :  { %v6703_v23 = vld [vmem:[%s9358_s7 + $0x40] ss:$24 sps:$4 sm:$0xff]  }
0x213d   :  { %7408 = vtanh.f32 %v758_v24  ;;  %v6711_v24 = vld [vmem:[%s9359_s9 + $0xc] ss:$20 sps:$4 sm:$0xff]  }
0x213e   :  { %1815 = vmatpush1.bf16.msra.mxu1 %v6694_v10  ;;  %v6786_v10 = vld [vmem:[%s9359_s9 + $0x20c] ss:$20 sps:$4 sm:$0xff]  }
0x213f   :  { %1894 = vmatprep.subr.bf16.mxu1 %v6702_v15  ;;  %v6775_v12 = vld [vmem:[%s9359_s9 + $0x1c0] ss:$20 sps:$4 sm:$0xff]  }
0x2140   :  { %v6789_v15 = vld [vmem:[%s9359_s9 + $0x214] ss:$20 sps:$4 sm:$0xff]  }
0x2147   :  { %v7409_v43 = vpop.eup %7408 }
0x2148   :  { %761 = vrot.lane.b32.xlu0 %v7409_v43, %s7433_s29  ;;  %v6712_v43 = vld [vmem:[%s9359_s9 + $0x28] ss:$20 sps:$4 sm:$0xff]  }
0x21ba   :  { %v762_v25 = vpop.permute.xlu0 %761 }
0x21bb   :  { %v764_v26 = vmul.f32 %v7407_v17, %v762_v25  ;;  %v6720_v25 = vld [vmem:[%s9359_s9 + $0x54] ss:$20 sps:$4 sm:$0xff]  }
0x21bd   :  { %v765_v27 = vpack.c.bf16 %v764_v26, %v764_v26  ;;  %v6709_v26 = vld [vmem:[%s9359_s9 + $0x8] ss:$20 sps:$4 sm:$0xff]  }
0x21bf   :  { %v1584_v28 = vrot.slane %v765_v27, 3  ;;  %v6717_v27 = vld [vmem:[%s9359_s9 + $0x34] ss:$20 sps:$4 sm:$0xff]  }
0x21c1   :  { %1585 = vrot.lane.b32.xlu0 %v1584_v28, %s7434_s1  ;;  %v6718_v28 = vld [vmem:[%s9359_s9 + $0x50] ss:$20 sps:$4 sm:$0xff]  }
0x220c   :  { %v1551_v32 = vpop.f32.mrb[28].mxu1 }
0x220d   :  { %v6605_v63 = vadd.f32 %v7723_v39, %v1551_v32  ;;  %v6541_v35 = vpop.f32.mrb[29].mxu1  ;;  %v6726_v32 = vld [vmem:[%s9359_s9 + $0x7c] ss:$20 sps:$4 sm:$0xff]  }
0x220e   :  { %v1554_v36 = vpop.f32.mrb[30].mxu1  ;;  %v6723_v35 = vld [vmem:[%s9359_s9 + $0x5c] ss:$20 sps:$4 sm:$0xff]  }
0x220f   :  { %7410 = vtanh.f32 %v6605_v63  ;;  %v6542_v37 = vpop.f32.mrb[31].mxu1  ;;  %v5683_v4 = vmul.f32 -1.442695, %v6605_v63  ;;  %v6715_v63 = vld [vmem:[%s9359_s9 + $0x30] ss:$20 sps:$4 sm:$0xff]  }
0x2210   :  { %v6724_v36 = vld [vmem:[%s9359_s9 + $0x78] ss:$20 sps:$4 sm:$0xff]  }
0x2211   :  { %7412 = vpow2.f32 %v5683_v4  ;;  %v6732_v37 = vld [vmem:[%s9359_s9 + $0xa4] ss:$20 sps:$4 sm:$0xff]   ;;  %v6730_v4 = vld [vmem:[%s9359_s9 + $0xa0] ss:$20 sps:$4 sm:$0xff]  }
0x2219   :  { %v7411_v38 = vpop.eup %7410 }
0x221a   :  { %1567 = vrot.lane.b32.xlu1 %v7411_v38, %s7433_s29  ;;  %v6721_v38 = vld [vmem:[%s9359_s9 + $0x58] ss:$20 sps:$4 sm:$0xff]  }
0x221b   :  { %v7413_v20 = vpop.eup %7412 }
0x221c   :  { %v1561_v40 = vadd.f32 1.0, %v7413_v20  ;;  %v6738_v20 = vld [vmem:[%s9359_s9 + $0xcc] ss:$20 sps:$4 sm:$0xff]  }
0x221e   :  { %7414 = vrcp.f32 %v1561_v40  ;;  %v6727_v40 = vld [vmem:[%s9359_s9 + $0x80] ss:$20 sps:$4 sm:$0xff]  }
0x2228   :  { %v7415_v41 = vpop.eup %7414 }
0x2229   :  { %v1565_v45 = vmul.f32 %v7415_v41, %v1463_v8  ;;  %v6693_v8 = vld [vmem:[%s9358_s7 + $0xc] ss:$24 sps:$4 sm:$0xff]  }
0x2233   :  { %v1586_v9 = vpop.permute.xlu0 %1585 }
0x2234   :  { %6548 = vmatmul.mubr.msk.bf16.vlgmr.msra.gmra.mrb[32].mxu0 %vm148_vm2, %v1586_v9  ;;  %v6729_v9 = vld [vmem:[%s9359_s9 + $0x84] ss:$20 sps:$4 sm:$0xff]  }
0x2235   :  { %6552 = vmatpush3.bf16.msra.mxu0 %v7687_v33  ;;  %6555 = vmatprep.mubr.msk.bf16.mxu0 %vm7431_vm0, %v7430_v0 }
0x2236   :  { %6553 = vmatprep.subr.bf16.mxu0 %v7430_v0 }
0x2239   :  { %6554 = vmatpush3.bf16.msra.mxu0 %v7696_v34 }
0x223a   :  { %1853 = vmatprep.subr.bf16.mxu0 %v6693_v8  ;;  %v6778_v8 = vld [vmem:[%s9359_s9 + $0x1e0] ss:$20 sps:$4 sm:$0xff]  }
0x228c   :  { %v1568_v42 = vpop.permute.xlu1 %1567 }
0x228d   :  { %v1570_v44 = vmul.f32 %v7415_v41, %v1568_v42  ;;  %v6736_v42 = vld [vmem:[%s9359_s9 + $0xc8] ss:$20 sps:$4 sm:$0xff]  }
0x228f   :  { %1572 = vrot.lane.b32.xlu1 %v1570_v44, %s7433_s29  ;;  %v6744_v44 = vld [vmem:[%s9359_s9 + $0xf4] ss:$20 sps:$4 sm:$0xff]  }
0x2301   :  { %v1573_v46 = vpop.permute.xlu1 %1572 }
0x2302   :  { %v1575_v33 = vadd.f32 %v1573_v46, %v1565_v45  ;;  %v6733_v45 = vld [vmem:[%s9359_s9 + $0xa8] ss:$20 sps:$4 sm:$0xff]  }
0x2303   :  { %v6741_v46 = vld [vmem:[%s9359_s9 + $0xd4] ss:$20 sps:$4 sm:$0xff]  }
0x2304   :  { %7416 = vtanh.f32 %v1575_v33 }
0x230e   :  { %v7417_v47 = vpop.eup %7416 }
0x230f   :  { %1578 = vrot.lane.b32.xlu1 %v7417_v47, %s7433_s29  ;;  %v6750_v47 = vld [vmem:[%s9359_s9 + $0x11c] ss:$20 sps:$4 sm:$0xff]  }
0x2381   :  { %v1579_v48 = vpop.permute.xlu1 %1578 }
0x2382   :  { %v1581_v49 = vmul.f32 %v7415_v41, %v1579_v48  ;;  %v6735_v41 = vld [vmem:[%s9359_s9 + $0xac] ss:$20 sps:$4 sm:$0xff]   ;;  %v6739_v48 = vld [vmem:[%s9359_s9 + $0xd0] ss:$20 sps:$4 sm:$0xff]  }
0x2384   :  { %v1582_v34 = vpack.c.bf16 %v1581_v49, %v1581_v49  ;;  %v6747_v49 = vld [vmem:[%s9359_s9 + $0xfc] ss:$20 sps:$4 sm:$0xff]  }
0x2386   :  { %1631 = vrot.lane.b32.xlu1 %v1582_v34, %s7434_s1  ;;  %v6748_v34 = vld [vmem:[%s9359_s9 + $0x118] ss:$20 sps:$4 sm:$0xff]  }
0x23f8   :  { %v1632_v50 = vpop.permute.xlu1 %1631 }
0x23f9   :  { %6556 = vmatmul.mubr.msk.bf16.vlgmr.msra.gmra.mrb[32].mxu0 %vm148_vm2, %v1632_v50  ;;  %v6756_v50 = vld [vmem:[%s9359_s9 + $0x144] ss:$20 sps:$4 sm:$0xff]  }
0x23fa   :  { %1885 = vmatprep.mubr.bf16.mxu0 %v7432_v5  ;;  %1854 = vmatpush1.bf16.msra.mxu0 %v6691_v7  ;;  %v6777_v7 = vld [vmem:[%s9359_s9 + $0x1c4] ss:$20 sps:$4 sm:$0xff]  }
0x23fb   :  { %1855 = vmatprep.subr.bf16.mxu0 %v6699_v14  ;;  %v6784_v14 = vld [vmem:[%s9359_s9 + $0x208] ss:$20 sps:$4 sm:$0xff]  }
0x23fe   :  { %1856 = vmatpush1.bf16.msra.mxu0 %v6697_v13  ;;  %v6783_v13 = vld [vmem:[%s9359_s9 + $0x1ec] ss:$20 sps:$4 sm:$0xff]  }
0x23ff   :  { %3510 = vmatprep.subr.bf16.mxu0 %v6708_v16  ;;  %v6795_v16 = vld [vmem:[%s9359_s9 + $0x23c] ss:$20 sps:$4 sm:$0xff]  }
0x24cc   :  { %v1670_v51 = vpop.f32.mrb[32].mxu0 }
0x24cd   :  { %v6606_v52 = vadd.f32 %v7723_v39, %v1670_v51  ;;  %v6557_v3 = vpop.f32.mrb[33].mxu0  ;;  %v6745_v51 = vld [vmem:[%s9359_s9 + $0xf8] ss:$20 sps:$4 sm:$0xff]  }
0x24ce   :  { %v1673_v53 = vpop.f32.mrb[34].mxu0  ;;  %v6754_v3 = vld [vmem:[%s9359_s9 + $0x140] ss:$20 sps:$4 sm:$0xff]  }
0x24cf   :  { %7418 = vtanh.f32 %v6606_v52  ;;  %v6558_v54 = vpop.f32.mrb[35].mxu0  ;;  %v5686_v57 = vmul.f32 -1.442695, %v6606_v52  ;;  %v6753_v52 = vld [vmem:[%s9359_s9 + $0x124] ss:$20 sps:$4 sm:$0xff]  }
0x24d0   :  { %v6762_v53 = vld [vmem:[%s9359_s9 + $0x16c] ss:$20 sps:$4 sm:$0xff]  }
0x24d1   :  { %7420 = vpow2.f32 %v5686_v57  ;;  %v6751_v54 = vld [vmem:[%s9359_s9 + $0x120] ss:$20 sps:$4 sm:$0xff]   ;;  %v6760_v57 = vld [vmem:[%s9359_s9 + $0x168] ss:$20 sps:$4 sm:$0xff]  }
0x24d9   :  { %v7419_v56 = vpop.eup %7418 }
0x24da   :  { %1686 = vrot.lane.b32.xlu0 %v7419_v56, %s7433_s29  ;;  %v6759_v56 = vld [vmem:[%s9359_s9 + $0x14c] ss:$20 sps:$4 sm:$0xff]  }
0x24db   :  { %v7421_v58 = vpop.eup %7420 }
0x24dc   :  { %v1680_v29 = vadd.f32 1.0, %v7421_v58  ;;  %v6768_v58 = vld [vmem:[%s9359_s9 + $0x194] ss:$20 sps:$4 sm:$0xff]  }
0x24de   :  { %7422 = vrcp.f32 %v1680_v29  ;;  %v6757_v29 = vld [vmem:[%s9359_s9 + $0x148] ss:$20 sps:$4 sm:$0xff]  }
0x24e8   :  { %v7423_v59 = vpop.eup %7422 }
0x24e9   :  { %v1684_v62 = vmul.f32 %v7423_v59, %v1575_v33  ;;  %v6742_v33 = vld [vmem:[%s9359_s9 + $0xf0] ss:$20 sps:$4 sm:$0xff]  }
0x254c   :  { %v1687_v60 = vpop.permute.xlu0 %1686 }
0x254d   :  { %v1689_v61 = vmul.f32 %v7423_v59, %v1687_v60  ;;  %v6766_v60 = vld [vmem:[%s9359_s9 + $0x190] ss:$20 sps:$4 sm:$0xff]  }
0x254f   :  { %1691 = vrot.lane.b32.xlu1 %v1689_v61, %s7433_s29  ;;  %v6774_v61 = vld [vmem:[%s9359_s9 + $0x1bc] ss:$20 sps:$4 sm:$0xff]  }
0x25c1   :  { %v1692_v31 = vpop.permute.xlu1 %1691 }
0x25c2   :  { %v1694_v39 = vadd.f32 %v1692_v31, %v1684_v62  ;;  %v6763_v62 = vld [vmem:[%s9359_s9 + $0x170] ss:$20 sps:$4 sm:$0xff]  }
0x25c3   :  { %v6771_v31 = vld [vmem:[%s9359_s9 + $0x19c] ss:$20 sps:$4 sm:$0xff]  }
0x25c4   :  { %7424 = vtanh.f32 %v1694_v39  ;;  %v6772_v39 = vld [vmem:[%s9359_s9 + $0x1b8] ss:$20 sps:$4 sm:$0xff]  }
0x25ce   :  { %v7425_v2 = vpop.eup %7424 }
0x25cf   :  { %1697 = vrot.lane.b32.xlu0 %v7425_v2, %s7433_s29  ;;  %v6781_v2 = vld [vmem:[%s9359_s9 + $0x1e8] ss:$20 sps:$4 sm:$0xff]  }
0x2641   :  { %v1698_v30 = vpop.permute.xlu0 %1697 }
0x2642   :  { %v1700_v55 = vmul.f32 %v7423_v59, %v1698_v30  ;;  %v6765_v59 = vld [vmem:[%s9359_s9 + $0x174] ss:$20 sps:$4 sm:$0xff]   ;;  %v6787_v30 = vld [vmem:[%s9359_s9 + $0x210] ss:$20 sps:$4 sm:$0xff]  }
0x2644   :  { %v1701_v17 = vpack.c.bf16 %v1700_v55, %v1700_v55  ;;  %v6792_v55 = vld [vmem:[%s9359_s9 + $0x234] ss:$20 sps:$4 sm:$0xff]  }
0x2646   :  { %1747 = vrot.lane.b32.xlu1 %v1701_v17, %s7434_s1  ;;  %v6790_v17 = vld [vmem:[%s9359_s9 + $0x230] ss:$20 sps:$4 sm:$0xff]  }
0x26b8   :  { %v1748_v21 = vpop.permute.xlu1 %1747 }
0x26b9   :  { %5699 = vmatmul.mubr.msk.bf16.vlgmr.msra.gmra.mrb[32].mxu1 %vm148_vm2, %v1748_v21  ;;  %5700 = vmatmul.mubr.msk.bf16.vlgmr.msra.gmra.mrb[36].mxu0 %vm148_vm2, %v1748_v21 }
0x26ba   :  { %1895 = vmatpush1.bf16.msra.mxu1 %v6700_v18  ;;  %1926 = vmatprep.mubr.bf16.mxu1 %v7432_v5  ;;  %v6793_v18 = vld [vmem:[%s9359_s9 + $0x238] ss:$20 sps:$4 sm:$0xff]  }
0x26bb   :  { %1896 = vmatprep.subr.bf16.mxu1 %v6705_v19  ;;  %3511 = vmatpush1.bf16.msra.mxu0 %v6706_v11  ;;  %v6798_v19 = vld [vmem:[%s9359_s9 + $0x25c] ss:$20 sps:$4 sm:$0xff]   ;;  %v6801_v11 = vld [vmem:[%s9359_s9 + $0x264] ss:$20 sps:$4 sm:$0xff]  }
0x26bc   :  { %3512 = vmatprep.subr.bf16.mxu0 %v6714_v22  ;;  %v6799_v22 = vld [vmem:[%s9359_s9 + $0x260] ss:$20 sps:$4 sm:$0xff]  }
0x26be   :  { %1897 = vmatpush1.bf16.msra.mxu1 %v6703_v23  ;;  %v6804_v23 = vld [vmem:[%s9359_s9 + $0x284] ss:$20 sps:$4 sm:$0xff]  }
0x26bf   :  { %3633 = vmatprep.subr.bf16.mxu1 %v6711_v24  ;;  %3513 = vmatpush1.bf16.msra.mxu0 %v6712_v43  ;;  %v6807_v24 = vld [vmem:[%s9359_s9 + $0x28c] ss:$20 sps:$4 sm:$0xff]   ;;  %v1716_v43 = vlaneseq }
0x26c0   :  { %3514 = vmatprep.subr.bf16.mxu0 %v6720_v25 }
0x26c1   :  { %5701 = vmatmul.mubr.msk.bf16.vlgmr.msra.gmra.mrb[36].mxu1 %vm148_vm2, %v1748_v21  ;;  %v6796_v21 = vld [vmem:[%s9359_s9 + $0x258] ss:$20 sps:$4 sm:$0xff]   ;;  %v8113_v25 = vshrl.u32 %v1716_v43, 7  ;;  %v6850_v43 = vld [vmem:[%s9359_s9 + $0x3c0] ss:$20 sps:$4 sm:$0xff]  }
0x26c2   :  { %3634 = vmatpush1.bf16.msra.mxu1 %v6709_v26 }
0x26c3   :  { %3635 = vmatprep.subr.bf16.mxu1 %v6717_v27  ;;  %3515 = vmatpush1.bf16.msra.mxu0 %v6718_v28  ;;  %v8116_v26 = vsub.s32 0, %v8113_v25  ;;  %v8121_v27 = vld [vmem:[%s9360_s8] sm:$0x3f]  ;;  %v8124_v28 = vsub.s32 1, %v8113_v25 }
0x26c4   :  { %3516 = vmatprep.subr.bf16.mxu0 %v6726_v32  ;;  %v1730_v32 = vsub.s32 3, %v8113_v25 }
0x26c6   :  { %3636 = vmatpush1.bf16.msra.mxu1 %v6715_v63  ;;  %v1719_v63 = vrot.slane %v8121_v27, %v8116_v26 }
0x26c7   :  { %3637 = vmatprep.subr.bf16.mxu1 %v6723_v35  ;;  %3517 = vmatpush1.bf16.msra.mxu0 %v6724_v36  ;;  %v1723_v35 = vrot.slane %v8121_v27, %v8124_v28  ;;  %v1731_v36 = vrot.slane %v8121_v27, %v1730_v32 }
0x26c8   :  { %3518 = vmatprep.subr.bf16.mxu0 %v6732_v37 }
0x26ca   :  { %3638 = vmatpush1.bf16.msra.mxu1 %v6721_v38 }
0x26cb   :  { %3639 = vmatprep.subr.bf16.mxu1 %v6729_v9  ;;  %3519 = vmatpush1.bf16.msra.mxu0 %v6730_v4 }
0x26cc   :  { %3520 = vmatprep.subr.bf16.mxu0 %v6738_v20 }
0x26ce   :  { %3640 = vmatpush1.bf16.msra.mxu1 %v6727_v40 }
0x26cf   :  { %3641 = vmatprep.subr.bf16.mxu1 %v6735_v41  ;;  %3521 = vmatpush1.bf16.msra.mxu0 %v6736_v42 }
0x26d0   :  { %3522 = vmatprep.subr.bf16.mxu0 %v6744_v44 }
0x26d2   :  { %3642 = vmatpush1.bf16.msra.mxu1 %v6733_v45 }
0x26d3   :  { %3643 = vmatprep.subr.bf16.mxu1 %v6741_v46  ;;  %3523 = vmatpush1.bf16.msra.mxu0 %v6742_v33 }
0x26d4   :  { %3524 = vmatprep.subr.bf16.mxu0 %v6750_v47 }
0x26d6   :  { %3644 = vmatpush1.bf16.msra.mxu1 %v6739_v48 }
0x26d7   :  { %3645 = vmatprep.subr.bf16.mxu1 %v6747_v49  ;;  %3525 = vmatpush1.bf16.msra.mxu0 %v6748_v34  ;;  %v6802_v34 = vld [vmem:[%s9359_s9 + $0x280] ss:$20 sps:$4 sm:$0xff]  }
0x26d8   :  { %3526 = vmatprep.subr.bf16.mxu0 %v6756_v50  ;;  %v6805_v50 = vld [vmem:[%s9359_s9 + $0x288] ss:$20 sps:$4 sm:$0xff]  }
0x26da   :  { %3646 = vmatpush1.bf16.msra.mxu1 %v6745_v51 }
0x26db   :  { %3647 = vmatprep.subr.bf16.mxu1 %v6753_v52  ;;  %3527 = vmatpush1.bf16.msra.mxu0 %v6754_v3  ;;  %v6810_v3 = vld [vmem:[%s9359_s9 + $0x2ac] ss:$20 sps:$4 sm:$0xff]  }
0x26dc   :  { %3528 = vmatprep.subr.bf16.mxu0 %v6762_v53  ;;  %v6813_v53 = vld [vmem:[%s9359_s9 + $0x2b4] ss:$20 sps:$4 sm:$0xff]  }
0x26de   :  { %3648 = vmatpush1.bf16.msra.mxu1 %v6751_v54 }
0x26df   :  { %3649 = vmatprep.subr.bf16.mxu1 %v6759_v56  ;;  %3529 = vmatpush1.bf16.msra.mxu0 %v6760_v57 }
0x26e0   :  { %3530 = vmatprep.subr.bf16.mxu0 %v6768_v58  ;;  %v6808_v58 = vld [vmem:[%s9359_s9 + $0x2a8] ss:$20 sps:$4 sm:$0xff]  }
0x26e2   :  { %3650 = vmatpush1.bf16.msra.mxu1 %v6757_v29  ;;  %v6811_v29 = vld [vmem:[%s9359_s9 + $0x2b0] ss:$20 sps:$4 sm:$0xff]  }
0x26e3   :  { %3651 = vmatprep.subr.bf16.mxu1 %v6765_v59  ;;  %3531 = vmatpush1.bf16.msra.mxu0 %v6766_v60  ;;  %v6816_v60 = vld [vmem:[%s9359_s9 + $0x2d4] ss:$20 sps:$4 sm:$0xff]  }
0x26e4   :  { %3532 = vmatprep.subr.bf16.mxu0 %v6774_v61  ;;  %v6819_v61 = vld [vmem:[%s9359_s9 + $0x2dc] ss:$20 sps:$4 sm:$0xff]  }
0x26e6   :  { %3652 = vmatpush1.bf16.msra.mxu1 %v6763_v62  ;;  %v6814_v62 = vld [vmem:[%s9359_s9 + $0x2d0] ss:$20 sps:$4 sm:$0xff]  }
0x26e7   :  { %3653 = vmatprep.subr.bf16.mxu1 %v6771_v31  ;;  %3533 = vmatpush1.bf16.msra.mxu0 %v6772_v39  ;;  %v6817_v31 = vld [vmem:[%s9359_s9 + $0x2d8] ss:$20 sps:$4 sm:$0xff]   ;;  %v6822_v39 = vld [vmem:[%s9359_s9 + $0x2fc] ss:$20 sps:$4 sm:$0xff]  }
0x26e8   :  { %3534 = vmatprep.subr.bf16.mxu0 %v6780_v1  ;;  %v6825_v1 = vld [vmem:[%s9359_s9 + $0x304] ss:$20 sps:$4 sm:$0xff]  }
0x26ea   :  { %3654 = vmatpush1.bf16.msra.mxu1 %v6769_v6  ;;  %v6820_v6 = vld [vmem:[%s9359_s9 + $0x2f8] ss:$20 sps:$4 sm:$0xff]  }
0x26eb   :  { %3655 = vmatprep.subr.bf16.mxu1 %v6777_v7  ;;  %3535 = vmatpush1.bf16.msra.mxu0 %v6778_v8  ;;  %v6823_v7 = vld [vmem:[%s9359_s9 + $0x300] ss:$20 sps:$4 sm:$0xff]   ;;  %v6828_v8 = vld [vmem:[%s9359_s9 + $0x324] ss:$20 sps:$4 sm:$0xff]  }
0x26ec   :  { %3536 = vmatprep.subr.bf16.mxu0 %v6786_v10  ;;  %v6831_v10 = vld [vmem:[%s9359_s9 + $0x32c] ss:$20 sps:$4 sm:$0xff]  }
0x26ee   :  { %3656 = vmatpush1.bf16.msra.mxu1 %v6775_v12  ;;  %v6826_v12 = vld [vmem:[%s9359_s9 + $0x320] ss:$20 sps:$4 sm:$0xff]  }
0x26ef   :  { %3657 = vmatprep.subr.bf16.mxu1 %v6783_v13  ;;  %3537 = vmatpush1.bf16.msra.mxu0 %v6784_v14  ;;  %v6829_v13 = vld [vmem:[%s9359_s9 + $0x328] ss:$20 sps:$4 sm:$0xff]   ;;  %v6834_v14 = vld [vmem:[%s9359_s9 + $0x34c] ss:$20 sps:$4 sm:$0xff]  }
0x26f0   :  { %3538 = vmatprep.subr.bf16.mxu0 %v6792_v55  ;;  %v6840_v55 = vld [vmem:[%s9359_s9 + $0x374] ss:$20 sps:$4 sm:$0xff]  }
0x26f2   :  { %3658 = vmatpush1.bf16.msra.mxu1 %v6781_v2  ;;  %v6837_v2 = vld [vmem:[%s9359_s9 + $0x354] ss:$20 sps:$4 sm:$0xff]  }
0x26f3   :  { %3659 = vmatprep.subr.bf16.mxu1 %v6789_v15  ;;  %3539 = vmatpush1.bf16.msra.mxu0 %v6790_v17  ;;  %v6832_v15 = vld [vmem:[%s9359_s9 + $0x348] ss:$20 sps:$4 sm:$0xff]   ;;  %v6838_v17 = vld [vmem:[%s9359_s9 + $0x370] ss:$20 sps:$4 sm:$0xff]  }
0x26f4   :  { %3540 = vmatprep.subr.bf16.mxu0 %v6798_v19  ;;  %v6846_v19 = vld [vmem:[%s9359_s9 + $0x39c] ss:$20 sps:$4 sm:$0xff]  }
0x26f6   :  { %3660 = vmatpush1.bf16.msra.mxu1 %v6787_v30  ;;  %v6835_v30 = vld [vmem:[%s9359_s9 + $0x350] ss:$20 sps:$4 sm:$0xff]  }
0x26f7   :  { %3661 = vmatprep.subr.bf16.mxu1 %v6795_v16  ;;  %3541 = vmatpush1.bf16.msra.mxu0 %v6796_v21  ;;  %v6843_v16 = vld [vmem:[%s9359_s9 + $0x37c] ss:$20 sps:$4 sm:$0xff]   ;;  %v6844_v21 = vld [vmem:[%s9359_s9 + $0x398] ss:$20 sps:$4 sm:$0xff]  }
0x26f8   :  { %3551 = vmatprep.subr.bf16.mxu0 %v6804_v23  ;;  %v6852_v23 = vld [vmem:[%s9359_s9 + $0x3c4] ss:$20 sps:$4 sm:$0xff]  }
0x26fa   :  { %3662 = vmatpush1.bf16.msra.mxu1 %v6793_v18  ;;  %v6841_v18 = vld [vmem:[%s9359_s9 + $0x378] ss:$20 sps:$4 sm:$0xff]  }
0x26fb   :  { %3663 = vmatprep.subr.bf16.mxu1 %v6801_v11  ;;  %v6849_v11 = vld [vmem:[%s9359_s9 + $0x3a4] ss:$20 sps:$4 sm:$0xff]  }
0x26fe   :  { %3664 = vmatpush1.bf16.msra.mxu1 %v6799_v22  ;;  %v6847_v22 = vld [vmem:[%s9359_s9 + $0x3a0] ss:$20 sps:$4 sm:$0xff]  }
0x26ff   :  { %3674 = vmatprep.subr.bf16.mxu1 %v6807_v24  ;;  %v6855_v24 = vld [vmem:[%s9359_s9 + $0x3cc] ss:$20 sps:$4 sm:$0xff]  }
0x278c   :  { %v1846_v37 = vpop.f32.mrb[32].mxu1  ;;  %v8134_v38 = vpop.f32.mrb[36].mxu0 }
0x278d   :  { %v1847_v9 = vadd.f32 %v1846_v37, %v1719_v63  ;;  %v1848_v4 = vpop.f32.mrb[33].mxu1  ;;  %v1889_v20 = vpop.f32.mrb[37].mxu0  ;;  %v6853_v63 = vld [vmem:[%s9359_s9 + $0x3c8] ss:$20 sps:$4 sm:$0xff]  }
0x278e   :  { %v1849_v40 = vadd.f32 %v1848_v4, %v1723_v35  ;;  %v1890_v41 = vadd.f32 %v1889_v20, %v1731_v36  ;;  %v1850_v42 = vpop.f32.mrb[34].mxu1  ;;  %v1891_v44 = vpop.f32.mrb[38].mxu0  ;;  %v6858_v35 = vld [vmem:[%s9359_s9 + $0x3ec] ss:$20 sps:$4 sm:$0xff]   ;;  %v6861_v36 = vld [vmem:[%s9359_s9 + $0x3f4] ss:$20 sps:$4 sm:$0xff]  }
0x278f   :  { %v1935_v45 = vmax.f32 %v1847_v9, 0.0  ;;  %v1851_v46 = vpop.f32.mrb[35].mxu1  ;;  %v1892_v33 = vpop.f32.mrb[39].mxu0  ;;  %v6856_v37 = vld [vmem:[%s9359_s9 + $0x3e8] ss:$20 sps:$4 sm:$0xff]  }
0x2790   :  { %v1936_v47 = vmax.f32 %v1849_v40, 0.0  ;;  %v1938_v48 = vmax.f32 %v1890_v41, 0.0  ;;  %v6859_v9 = vld [vmem:[%s9359_s9 + $0x3f0] ss:$20 sps:$4 sm:$0xff]   ;;  %v6864_v4 = vld [vmem:[%s9359_s9 + $0x414] ss:$20 sps:$4 sm:$0xff]  }
0x2791   :  { %v8144_v51 = vpack.c.bf16 %v1935_v45, %v1935_v45  ;;  %v6867_v20 = vld [vmem:[%s9359_s9 + $0x41c] ss:$20 sps:$4 sm:$0xff]   ;;  %v6865_v41 = vld [vmem:[%s9359_s9 + $0x418] ss:$20 sps:$4 sm:$0xff]   ;;  %v6871_v46 = vld [vmem:[%s9359_s9 + $0x440] ss:$20 sps:$4 sm:$0xff]  }
0x2792   :  { %v8136_v49 = vpack.c.bf16 %v1936_v47, %v1936_v47  ;;  %v8156_v54 = vpack.c.bf16 %v1938_v48, %v1938_v48  ;;  %v6862_v40 = vld [vmem:[%s9359_s9 + $0x410] ss:$20 sps:$4 sm:$0xff]   ;;  %v6868_v45 = vld [vmem:[%s9359_s9 + $0x438] ss:$20 sps:$4 sm:$0xff]   ;;  %v6874_v48 = vld [vmem:[%s9359_s9 + $0x460] ss:$20 sps:$4 sm:$0xff]  }
0x2793   :  { %v6870_v42 = vld [vmem:[%s9359_s9 + $0x43c] ss:$20 sps:$4 sm:$0xff]   ;;  %v6873_v44 = vld [vmem:[%s9359_s9 + $0x444] ss:$20 sps:$4 sm:$0xff]   ;;  %v6879_v47 = vld [vmem:[%s9359_s9 + $0x46c] ss:$20 sps:$4 sm:$0xff]  }
0x2794   :  { %v8146_v52 = vpop.f32.mrb[36].mxu1  ;;  %3542 = vmatprep.mubr.bf16.mxu0 %v8136_v49  ;;  %3665 = vmatprep.mubr.bf16.mxu1 %v8136_v49  ;;  %v6876_v33 = vld [vmem:[%s9359_s9 + $0x464] ss:$20 sps:$4 sm:$0xff]  }
0x2795   :  { %v8158_v56 = vpop.f32.mrb[37].mxu1  ;;  %3543 = vmatmul.mubr.bf16.vlgmr.msra.gmra.mrb[40].mxu0 %v8144_v51  ;;  %3666 = vmatmul.mubr.bf16.vlgmr.msra.gmra.mrb[40].mxu1 %v8144_v51 }
0x2796   :  { %3552 = vmatpush1.bf16.msra.mxu0 %v6802_v34  ;;  %3675 = vmatpush1.bf16.msra.mxu1 %v6805_v50  ;;  %v1932_v57 = vpop.f32.mrb[38].mxu1  ;;  %v6877_v34 = vld [vmem:[%s9359_s9 + $0x468] ss:$20 sps:$4 sm:$0xff]   ;;  %v8303_v50 = vsub.s32 2, %v8113_v25 }
0x2797   :  { %3583 = vmatprep.mubr.bf16.mxu0 %v8156_v54  ;;  %3706 = vmatprep.mubr.bf16.mxu1 %v8156_v54  ;;  %v1933_v59 = vpop.f32.mrb[39].mxu1  ;;  %v1738_v57 = vsub.s32 5, %v8113_v25 }
0x2798   :  { %3553 = vmatprep.subr.bf16.mxu0 %v6810_v3  ;;  %3676 = vmatprep.subr.bf16.mxu1 %v6813_v53  ;;  %v6882_v3 = vld [vmem:[%s9359_s9 + $0x48c] ss:$20 sps:$4 sm:$0xff]   ;;  %v6885_v53 = vld [vmem:[%s9359_s9 + $0x494] ss:$20 sps:$4 sm:$0xff]   ;;  %v1727_v59 = vrot.slane %v8121_v27, %v8303_v50 }
0x279a   :  { %3554 = vmatpush1.bf16.msra.mxu0 %v6808_v58  ;;  %3677 = vmatpush1.bf16.msra.mxu1 %v6811_v29  ;;  %v6880_v58 = vld [vmem:[%s9359_s9 + $0x488] ss:$20 sps:$4 sm:$0xff]   ;;  %v6883_v29 = vld [vmem:[%s9359_s9 + $0x490] ss:$20 sps:$4 sm:$0xff]  }
0x279b   :  { %3555 = vmatprep.subr.bf16.mxu0 %v6816_v60  ;;  %3678 = vmatprep.subr.bf16.mxu1 %v6819_v61  ;;  %v6888_v60 = vld [vmem:[%s9359_s9 + $0x4b4] ss:$20 sps:$4 sm:$0xff]   ;;  %v6891_v61 = vld [vmem:[%s9359_s9 + $0x4bc] ss:$20 sps:$4 sm:$0xff]  }
0x279e   :  { %3556 = vmatpush1.bf16.msra.mxu0 %v6814_v62  ;;  %3679 = vmatpush1.bf16.msra.mxu1 %v6817_v31  ;;  %v1739_v62 = vrot.slane %v8121_v27, %v1738_v57  ;;  %v6886_v31 = vld [vmem:[%s9359_s9 + $0x4b0] ss:$20 sps:$4 sm:$0xff]   ;;  %v6951_v57 = vld [vmem:[%s9359_s9 + $0x64c] ss:$20 sps:$4 sm:$0xff]  }
0x279f   :  { %3557 = vmatprep.subr.bf16.mxu0 %v6822_v39  ;;  %3680 = vmatprep.subr.bf16.mxu1 %v6825_v1  ;;  %v6889_v39 = vld [vmem:[%s9359_s9 + $0x4b8] ss:$20 sps:$4 sm:$0xff]   ;;  %v1888_v1 = vadd.f32 %v8134_v38, %v1727_v59  ;;  %v6895_v38 = vld [vmem:[%s9359_s9 + $0x4e0] ss:$20 sps:$4 sm:$0xff]  }
0x27a0   :  { %v6954_v59 = vld [vmem:[%s9359_s9 + $0x66c] ss:$20 sps:$4 sm:$0xff]  }
0x27a2   :  { %3558 = vmatpush1.bf16.msra.mxu0 %v6820_v6  ;;  %3681 = vmatpush1.bf16.msra.mxu1 %v6823_v7  ;;  %v6894_v6 = vld [vmem:[%s9359_s9 + $0x4dc] ss:$20 sps:$4 sm:$0xff]   ;;  %v6897_v7 = vld [vmem:[%s9359_s9 + $0x4e4] ss:$20 sps:$4 sm:$0xff]  }
0x27a3   :  { %3559 = vmatprep.subr.bf16.mxu0 %v6828_v8  ;;  %3682 = vmatprep.subr.bf16.mxu1 %v6831_v10  ;;  %v1931_v8 = vadd.f32 %v8158_v56, %v1739_v62  ;;  %v6892_v10 = vld [vmem:[%s9359_s9 + $0x4d8] ss:$20 sps:$4 sm:$0xff]   ;;  %v6955_v62 = vld [vmem:[%s9359_s9 + $0x670] ss:$20 sps:$4 sm:$0xff]  }
0x27a4   :  { %v6903_v56 = vld [vmem:[%s9359_s9 + $0x50c] ss:$20 sps:$4 sm:$0xff]  }
0x27a6   :  { %3560 = vmatpush1.bf16.msra.mxu0 %v6826_v12  ;;  %3683 = vmatpush1.bf16.msra.mxu1 %v6829_v13  ;;  %v1937_v12 = vmax.f32 %v1888_v1, 0.0  ;;  %v6900_v13 = vld [vmem:[%s9359_s9 + $0x504] ss:$20 sps:$4 sm:$0xff]  }
0x27a7   :  { %3561 = vmatprep.subr.bf16.mxu0 %v6834_v14  ;;  %3684 = vmatprep.subr.bf16.mxu1 %v6837_v2  ;;  %v1940_v14 = vmax.f32 %v1931_v8, 0.0  ;;  %v6898_v2 = vld [vmem:[%s9359_s9 + $0x500] ss:$20 sps:$4 sm:$0xff]   ;;  %v6958_v1 = vld [vmem:[%s9359_s9 + $0x690] ss:$20 sps:$4 sm:$0xff]  }
0x27a8   :  { %v6969_v8 = vld [vmem:[%s9359_s9 + $0x6c4] ss:$20 sps:$4 sm:$0xff]  }
0x27aa   :  { %3562 = vmatpush1.bf16.msra.mxu0 %v6832_v15  ;;  %3685 = vmatpush1.bf16.msra.mxu1 %v6835_v30  ;;  %v8356_v15 = vpack.c.bf16 %v1937_v12, %v1937_v12  ;;  %v6901_v30 = vld [vmem:[%s9359_s9 + $0x508] ss:$20 sps:$4 sm:$0xff]   ;;  %v6972_v12 = vld [vmem:[%s9359_s9 + $0x6e4] ss:$20 sps:$4 sm:$0xff]  }
0x27ab   :  { %3563 = vmatprep.subr.bf16.mxu0 %v6840_v55  ;;  %3686 = vmatprep.subr.bf16.mxu1 %v6843_v16  ;;  %v8361_v55 = vpack.c.bf16 %v1940_v14, %v1940_v14  ;;  %v6906_v16 = vld [vmem:[%s9359_s9 + $0x52c] ss:$20 sps:$4 sm:$0xff]   ;;  %v6973_v14 = vld [vmem:[%s9359_s9 + $0x6e8] ss:$20 sps:$4 sm:$0xff]  }
0x27ae   :  { %3564 = vmatpush1.bf16.msra.mxu0 %v6838_v17  ;;  %3687 = vmatpush1.bf16.msra.mxu1 %v6841_v18  ;;  %v6909_v17 = vld [vmem:[%s9359_s9 + $0x534] ss:$20 sps:$4 sm:$0xff]  }
0x27af   :  { %3565 = vmatprep.subr.bf16.mxu0 %v6846_v19  ;;  %3688 = vmatprep.subr.bf16.mxu1 %v6849_v11  ;;  %v6904_v18 = vld [vmem:[%s9359_s9 + $0x528] ss:$20 sps:$4 sm:$0xff]   ;;  %v6907_v19 = vld [vmem:[%s9359_s9 + $0x530] ss:$20 sps:$4 sm:$0xff]  }
0x27b0   :  { %v6912_v11 = vld [vmem:[%s9359_s9 + $0x554] ss:$20 sps:$4 sm:$0xff]  }
0x27b2   :  { %3566 = vmatpush1.bf16.msra.mxu0 %v6844_v21  ;;  %3689 = vmatpush1.bf16.msra.mxu1 %v6847_v22  ;;  %v6915_v21 = vld [vmem:[%s9359_s9 + $0x55c] ss:$20 sps:$4 sm:$0xff]  }
0x27b3   :  { %3567 = vmatprep.subr.bf16.mxu0 %v6852_v23  ;;  %3690 = vmatprep.subr.bf16.mxu1 %v6855_v24  ;;  %v6910_v22 = vld [vmem:[%s9359_s9 + $0x550] ss:$20 sps:$4 sm:$0xff]   ;;  %v6913_v23 = vld [vmem:[%s9359_s9 + $0x558] ss:$20 sps:$4 sm:$0xff]  }
0x27b4   :  { %v6918_v24 = vld [vmem:[%s9359_s9 + $0x57c] ss:$20 sps:$4 sm:$0xff]  }
0x27b6   :  { %3568 = vmatpush1.bf16.msra.mxu0 %v6850_v43  ;;  %3691 = vmatpush1.bf16.msra.mxu1 %v6853_v63  ;;  %v6921_v43 = vld [vmem:[%s9359_s9 + $0x584] ss:$20 sps:$4 sm:$0xff]  }
0x27b7   :  { %3569 = vmatprep.subr.bf16.mxu0 %v6858_v35  ;;  %3692 = vmatprep.subr.bf16.mxu1 %v6861_v36  ;;  %v6916_v63 = vld [vmem:[%s9359_s9 + $0x578] ss:$20 sps:$4 sm:$0xff]   ;;  %v6919_v35 = vld [vmem:[%s9359_s9 + $0x580] ss:$20 sps:$4 sm:$0xff]  }
0x27b8   :  { %v6924_v36 = vld [vmem:[%s9359_s9 + $0x5a4] ss:$20 sps:$4 sm:$0xff]  }
0x27ba   :  { %3570 = vmatpush1.bf16.msra.mxu0 %v6856_v37  ;;  %3693 = vmatpush1.bf16.msra.mxu1 %v6859_v9  ;;  %v6927_v37 = vld [vmem:[%s9359_s9 + $0x5ac] ss:$20 sps:$4 sm:$0xff]  }
0x27bb   :  { %3571 = vmatprep.subr.bf16.mxu0 %v6864_v4  ;;  %3694 = vmatprep.subr.bf16.mxu1 %v6867_v20  ;;  %v6922_v9 = vld [vmem:[%s9359_s9 + $0x5a0] ss:$20 sps:$4 sm:$0xff]   ;;  %v6925_v4 = vld [vmem:[%s9359_s9 + $0x5a8] ss:$20 sps:$4 sm:$0xff]  }
0x27bc   :  { %v6930_v20 = vld [vmem:[%s9359_s9 + $0x5cc] ss:$20 sps:$4 sm:$0xff]  }
0x27be   :  { %3572 = vmatpush1.bf16.msra.mxu0 %v6862_v40  ;;  %3695 = vmatpush1.bf16.msra.mxu1 %v6865_v41  ;;  %v6933_v40 = vld [vmem:[%s9359_s9 + $0x5d4] ss:$20 sps:$4 sm:$0xff]  }
0x27bf   :  { %3573 = vmatprep.subr.bf16.mxu0 %v6870_v42  ;;  %3696 = vmatprep.subr.bf16.mxu1 %v6873_v44  ;;  %v6928_v41 = vld [vmem:[%s9359_s9 + $0x5c8] ss:$20 sps:$4 sm:$0xff]   ;;  %v6931_v42 = vld [vmem:[%s9359_s9 + $0x5d0] ss:$20 sps:$4 sm:$0xff]  }
0x27c0   :  { %v6936_v44 = vld [vmem:[%s9359_s9 + $0x5f4] ss:$20 sps:$4 sm:$0xff]  }
0x27c2   :  { %3574 = vmatpush1.bf16.msra.mxu0 %v6868_v45  ;;  %3697 = vmatpush1.bf16.msra.mxu1 %v6871_v46  ;;  %v6939_v45 = vld [vmem:[%s9359_s9 + $0x5fc] ss:$20 sps:$4 sm:$0xff]  }
0x27c3   :  { %3575 = vmatprep.subr.bf16.mxu0 %v6876_v33  ;;  %3698 = vmatprep.subr.bf16.mxu1 %v6879_v47  ;;  %v6934_v46 = vld [vmem:[%s9359_s9 + $0x5f0] ss:$20 sps:$4 sm:$0xff]   ;;  %v6937_v33 = vld [vmem:[%s9359_s9 + $0x5f8] ss:$20 sps:$4 sm:$0xff]  }
0x27c4   :  { %v6942_v47 = vld [vmem:[%s9359_s9 + $0x61c] ss:$20 sps:$4 sm:$0xff]  }
0x27c6   :  { %3576 = vmatpush1.bf16.msra.mxu0 %v6874_v48  ;;  %3699 = vmatpush1.bf16.msra.mxu1 %v6877_v34  ;;  %v6945_v48 = vld [vmem:[%s9359_s9 + $0x624] ss:$20 sps:$4 sm:$0xff]  }
0x27c7   :  { %3577 = vmatprep.subr.bf16.mxu0 %v6882_v3  ;;  %3700 = vmatprep.subr.bf16.mxu1 %v6885_v53  ;;  %v6940_v34 = vld [vmem:[%s9359_s9 + $0x618] ss:$20 sps:$4 sm:$0xff]   ;;  %v6943_v3 = vld [vmem:[%s9359_s9 + $0x620] ss:$20 sps:$4 sm:$0xff]  }
0x27c8   :  { %v6948_v53 = vld [vmem:[%s9359_s9 + $0x644] ss:$20 sps:$4 sm:$0xff]  }
0x27ca   :  { %3578 = vmatpush1.bf16.msra.mxu0 %v6880_v58  ;;  %3701 = vmatpush1.bf16.msra.mxu1 %v6883_v29  ;;  %v6946_v58 = vld [vmem:[%s9359_s9 + $0x640] ss:$20 sps:$4 sm:$0xff]   ;;  %v6949_v29 = vld [vmem:[%s9359_s9 + $0x648] ss:$20 sps:$4 sm:$0xff]  }
0x27cb   :  { %3579 = vmatprep.subr.bf16.mxu0 %v6888_v60  ;;  %3702 = vmatprep.subr.bf16.mxu1 %v6891_v61  ;;  %v6952_v60 = vld [vmem:[%s9359_s9 + $0x668] ss:$20 sps:$4 sm:$0xff]  }
0x27cc   :  { %v6957_v61 = vld [vmem:[%s9359_s9 + $0x674] ss:$20 sps:$4 sm:$0xff]  }
0x27ce   :  { %3580 = vmatpush1.bf16.msra.mxu0 %v6886_v31  ;;  %3703 = vmatpush1.bf16.msra.mxu1 %v6889_v39  ;;  %v6960_v31 = vld [vmem:[%s9359_s9 + $0x694] ss:$20 sps:$4 sm:$0xff]   ;;  %v6963_v39 = vld [vmem:[%s9359_s9 + $0x69c] ss:$20 sps:$4 sm:$0xff]  }
0x27cf   :  { %3581 = vmatprep.subr.bf16.mxu0 %v6894_v6  ;;  %3704 = vmatprep.subr.bf16.mxu1 %v6897_v7  ;;  %v6961_v6 = vld [vmem:[%s9359_s9 + $0x698] ss:$20 sps:$4 sm:$0xff]   ;;  %v6966_v7 = vld [vmem:[%s9359_s9 + $0x6bc] ss:$20 sps:$4 sm:$0xff]  }
0x27d2   :  { %3582 = vmatpush1.bf16.msra.mxu0 %v6892_v10  ;;  %3705 = vmatpush1.bf16.msra.mxu1 %v6895_v38  ;;  %v6964_v10 = vld [vmem:[%s9359_s9 + $0x6b8] ss:$20 sps:$4 sm:$0xff]   ;;  %v6967_v38 = vld [vmem:[%s9359_s9 + $0x6c0] ss:$20 sps:$4 sm:$0xff]  }
0x27d3   :  { %3592 = vmatprep.subr.bf16.mxu0 %v6900_v13  ;;  %3715 = vmatprep.subr.bf16.mxu1 %v6903_v56  ;;  %v6975_v13 = vld [vmem:[%s9359_s9 + $0x6ec] ss:$20 sps:$4 sm:$0xff]  }
0x27d4   :  { %v6970_v56 = vld [vmem:[%s9359_s9 + $0x6e0] ss:$20 sps:$4 sm:$0xff]  }
0x27d5   :  { %3584 = vmatmul.mubr.bf16.vlgmr.msra.gmra.mrb[40].mxu0 %v8356_v15  ;;  %3707 = vmatmul.mubr.bf16.vlgmr.msra.gmra.mrb[40].mxu1 %v8356_v15 }
0x27d6   :  { %3593 = vmatpush1.bf16.msra.mxu0 %v6898_v2  ;;  %3624 = vmatprep.mubr.bf16.mxu0 %v8361_v55  ;;  %v6978_v2 = vld [vmem:[%s9359_s9 + $0x70c] ss:$20 sps:$4 sm:$0xff]  }
0x27d7   :  { %3716 = vmatpush1.bf16.msra.mxu1 %v6901_v30  ;;  %3747 = vmatprep.mubr.bf16.mxu1 %v8361_v55  ;;  %v6981_v30 = vld [vmem:[%s9359_s9 + $0x714] ss:$20 sps:$4 sm:$0xff]  }
0x27d8   :  { %3594 = vmatprep.subr.bf16.mxu0 %v6906_v16  ;;  %3717 = vmatprep.subr.bf16.mxu1 %v6909_v17  ;;  %v1734_v16 = vsub.s32 4, %v8113_v25  ;;  %v6976_v17 = vld [vmem:[%s9359_s9 + $0x708] ss:$20 sps:$4 sm:$0xff]  }
0x27da   :  { %3595 = vmatpush1.bf16.msra.mxu0 %v6904_v18  ;;  %v6979_v18 = vld [vmem:[%s9359_s9 + $0x710] ss:$20 sps:$4 sm:$0xff]  }
0x27db   :  { %3718 = vmatpush1.bf16.msra.mxu1 %v6907_v19  ;;  %3596 = vmatprep.subr.bf16.mxu0 %v6912_v11  ;;  %v6984_v19 = vld [vmem:[%s9359_s9 + $0x734] ss:$20 sps:$4 sm:$0xff]   ;;  %v6987_v11 = vld [vmem:[%s9359_s9 + $0x73c] ss:$20 sps:$4 sm:$0xff]  }
0x27dc   :  { %3719 = vmatprep.subr.bf16.mxu1 %v6915_v21  ;;  %v1735_v21 = vrot.slane %v8121_v27, %v1734_v16  ;;  %v6993_v27 = vld [vmem:[%s9359_s9 + $0x764] ss:$20 sps:$4 sm:$0xff]  }
0x27de   :  { %3597 = vmatpush1.bf16.msra.mxu0 %v6910_v22  ;;  %v6982_v22 = vld [vmem:[%s9359_s9 + $0x730] ss:$20 sps:$4 sm:$0xff]  }
0x27df   :  { %3720 = vmatpush1.bf16.msra.mxu1 %v6913_v23  ;;  %3598 = vmatprep.subr.bf16.mxu0 %v6918_v24  ;;  %v6985_v23 = vld [vmem:[%s9359_s9 + $0x738] ss:$20 sps:$4 sm:$0xff]   ;;  %v6990_v24 = vld [vmem:[%s9359_s9 + $0x75c] ss:$20 sps:$4 sm:$0xff]  }
0x27e0   :  { %3721 = vmatprep.subr.bf16.mxu1 %v6921_v43  ;;  %v1929_v43 = vadd.f32 %v8146_v52, %v1735_v21  ;;  %v6995_v52 = vld [vmem:[%s9359_s9 + $0x3d0] ss:$20 sps:$4 sm:$0xff]   ;;  %v7033_v21 = vld [vmem:[%s9359_s9 + $0x588] ss:$20 sps:$4 sm:$0xff]  }
0x27e2   :  { %3599 = vmatpush1.bf16.msra.mxu0 %v6916_v63  ;;  %v6988_v63 = vld [vmem:[%s9359_s9 + $0x758] ss:$20 sps:$4 sm:$0xff]  }
0x27e3   :  { %3722 = vmatpush1.bf16.msra.mxu1 %v6919_v35  ;;  %3600 = vmatprep.subr.bf16.mxu0 %v6924_v36  ;;  %v6991_v35 = vld [vmem:[%s9359_s9 + $0x760] ss:$20 sps:$4 sm:$0xff]   ;;  %v6994_v36 = vld [vmem:[%s9359_s9 + $0x150] ss:$20 sps:$4 sm:$0xff]  }
0x27e4   :  { %3723 = vmatprep.subr.bf16.mxu1 %v6927_v37  ;;  %v1939_v37 = vmax.f32 %v1929_v43, 0.0  ;;  %v7036_v43 = vld [vmem:[%s9359_s9 + $0x718] ss:$20 sps:$4 sm:$0xff]  }
0x27e6   :  { %3601 = vmatpush1.bf16.msra.mxu0 %v6922_v9  ;;  %v6996_v9 = vld [vmem:[%s9359_s9 + $0x10] ss:$20 sps:$4 sm:$0xff]  }
0x27e7   :  { %3724 = vmatpush1.bf16.msra.mxu1 %v6925_v4  ;;  %3602 = vmatprep.subr.bf16.mxu0 %v6930_v20  ;;  %v6997_v4 = vld [vmem:[%s9359_s9 + $0x290] ss:$20 sps:$4 sm:$0xff]   ;;  %v6998_v20 = vld [vmem:[%s9359_s9 + $0x178] ss:$20 sps:$4 sm:$0xff]  }
0x27e8   :  { %3725 = vmatprep.subr.bf16.mxu1 %v6933_v40  ;;  %v8567_v40 = vpack.c.bf16 %v1939_v37, %v1939_v37  ;;  %v7057_v37 = vld [vmem:[%s9361_s11 + $0x78] ss:$12 sps:$4 sm:$0xff]  }
0x27ea   :  { %3603 = vmatpush1.bf16.msra.mxu0 %v6928_v41  ;;  %v6999_v41 = vld [vmem:[%s9359_s9 + $0x3f8] ss:$20 sps:$4 sm:$0xff]  }
0x27eb   :  { %3726 = vmatpush1.bf16.msra.mxu1 %v6931_v42  ;;  %3604 = vmatprep.subr.bf16.mxu0 %v6936_v44  ;;  %v7000_v42 = vld [vmem:[%s9359_s9 + $0x38] ss:$20 sps:$4 sm:$0xff]  }
0x27ec   :  { %3727 = vmatprep.subr.bf16.mxu1 %v6939_v45  ;;  %v7001_v44 = vld [vmem:[%s9359_s9 + $0x2b8] ss:$20 sps:$4 sm:$0xff]   ;;  %v7002_v45 = vld [vmem:[%s9359_s9 + $0x1a0] ss:$20 sps:$4 sm:$0xff]  }
0x27ee   :  { %3605 = vmatpush1.bf16.msra.mxu0 %v6934_v46  ;;  %v7003_v46 = vld [vmem:[%s9359_s9 + $0x420] ss:$20 sps:$4 sm:$0xff]  }
0x27ef   :  { %3728 = vmatpush1.bf16.msra.mxu1 %v6937_v33  ;;  %3606 = vmatprep.subr.bf16.mxu0 %v6942_v47  ;;  %v7004_v33 = vld [vmem:[%s9359_s9 + $0x60] ss:$20 sps:$4 sm:$0xff]  }
0x27f0   :  { %3729 = vmatprep.subr.bf16.mxu1 %v6945_v48  ;;  %v7005_v47 = vld [vmem:[%s9359_s9 + $0x2e0] ss:$20 sps:$4 sm:$0xff]   ;;  %v7008_v48 = vld [vmem:[%s9359_s9 + $0x88] ss:$20 sps:$4 sm:$0xff]  }
0x27f2   :  { %3607 = vmatpush1.bf16.msra.mxu0 %v6940_v34  ;;  %v7009_v34 = vld [vmem:[%s9359_s9 + $0x308] ss:$20 sps:$4 sm:$0xff]  }
0x27f3   :  { %3730 = vmatpush1.bf16.msra.mxu1 %v6943_v3  ;;  %3608 = vmatprep.subr.bf16.mxu0 %v6948_v53  ;;  %v7010_v3 = vld [vmem:[%s9359_s9 + $0x1f0] ss:$20 sps:$4 sm:$0xff]  }
0x27f4   :  { %3731 = vmatprep.subr.bf16.mxu1 %v6951_v57  ;;  %v7011_v53 = vld [vmem:[%s9359_s9 + $0x470] ss:$20 sps:$4 sm:$0xff]  }
0x27f5   :  { %v7012_v57 = vld [vmem:[%s9359_s9 + $0xb0] ss:$20 sps:$4 sm:$0xff]  }
0x27f6   :  { %3609 = vmatpush1.bf16.msra.mxu0 %v6946_v58  ;;  %v7013_v58 = vld [vmem:[%s9359_s9 + $0x330] ss:$20 sps:$4 sm:$0xff]  }
0x27f7   :  { %3732 = vmatpush1.bf16.msra.mxu1 %v6949_v29  ;;  %3610 = vmatprep.subr.bf16.mxu0 %v6954_v59  ;;  %v7014_v29 = vld [vmem:[%s9359_s9 + $0x218] ss:$20 sps:$4 sm:$0xff]  }
0x27f8   :  { %3733 = vmatprep.subr.bf16.mxu1 %v6957_v61  ;;  %v7015_v59 = vld [vmem:[%s9359_s9 + $0x498] ss:$20 sps:$4 sm:$0xff]  }
0x27f9   :  { %v7017_v61 = vld [vmem:[%s9359_s9 + $0x358] ss:$20 sps:$4 sm:$0xff]  }
0x27fa   :  { %3611 = vmatpush1.bf16.msra.mxu0 %v6952_v60  ;;  %v7016_v60 = vld [vmem:[%s9359_s9 + $0xd8] ss:$20 sps:$4 sm:$0xff]  }
0x27fb   :  { %3734 = vmatpush1.bf16.msra.mxu1 %v6955_v62  ;;  %3612 = vmatprep.subr.bf16.mxu0 %v6960_v31  ;;  %v7018_v62 = vld [vmem:[%s9359_s9 + $0x240] ss:$20 sps:$4 sm:$0xff]  }
0x27fc   :  { %3735 = vmatprep.subr.bf16.mxu1 %v6963_v39  ;;  %v7019_v31 = vld [vmem:[%s9359_s9 + $0x4c0] ss:$20 sps:$4 sm:$0xff]  }
0x27fd   :  { %v7020_v39 = vld [vmem:[%s9359_s9 + $0x100] ss:$20 sps:$4 sm:$0xff]  }
0x27fe   :  { %3613 = vmatpush1.bf16.msra.mxu0 %v6958_v1  ;;  %v7021_v1 = vld [vmem:[%s9359_s9 + $0x380] ss:$20 sps:$4 sm:$0xff]  }
0x27ff   :  { %3736 = vmatpush1.bf16.msra.mxu1 %v6961_v6  ;;  %3614 = vmatprep.subr.bf16.mxu0 %v6966_v7  ;;  %v7022_v6 = vld [vmem:[%s9359_s9 + $0x268] ss:$20 sps:$4 sm:$0xff]  }
0x2800   :  { %3737 = vmatprep.subr.bf16.mxu1 %v6969_v8  ;;  %v7023_v7 = vld [vmem:[%s9359_s9 + $0x4e8] ss:$20 sps:$4 sm:$0xff]  }
0x2801   :  { %v7024_v8 = vld [vmem:[%s9359_s9 + $0x128] ss:$20 sps:$4 sm:$0xff]  }
0x2802   :  { %3615 = vmatpush1.bf16.msra.mxu0 %v6964_v10  ;;  %v7025_v10 = vld [vmem:[%s9359_s9 + $0x3a8] ss:$20 sps:$4 sm:$0xff]  }
0x2803   :  { %3738 = vmatpush1.bf16.msra.mxu1 %v6967_v38  ;;  %3616 = vmatprep.subr.bf16.mxu0 %v6972_v12  ;;  %v7026_v38 = vld [vmem:[%s9359_s9 + $0x650] ss:$20 sps:$4 sm:$0xff]  }
0x2804   :  { %3739 = vmatprep.subr.bf16.mxu1 %v6975_v13  ;;  %v7044_v12 = vld [vmem:[%s9361_s11 + $0x4] ss:$12 sps:$4 sm:$0xff]  }
0x2805   :  { %v7027_v13 = vld [vmem:[%s9359_s9 + $0x510] ss:$20 sps:$4 sm:$0xff]  }
0x2806   :  { %3617 = vmatpush1.bf16.msra.mxu0 %v6970_v56  ;;  %v7028_v56 = vld [vmem:[%s9359_s9 + $0x678] ss:$20 sps:$4 sm:$0xff]  }
0x2807   :  { %3740 = vmatpush1.bf16.msra.mxu1 %v6973_v14  ;;  %3618 = vmatprep.subr.bf16.mxu0 %v6978_v2  ;;  %v7042_v14 = vld [vmem:[%s9361_s11] ss:$12 sps:$4 sm:$0xff]   ;;  %v7047_v2 = vld [vmem:[%s9361_s11 + $0x1c] ss:$12 sps:$4 sm:$0xff]  }
0x2808   :  { %3741 = vmatprep.subr.bf16.mxu1 %v6981_v30  ;;  %v7029_v30 = vld [vmem:[%s9359_s9 + $0x538] ss:$20 sps:$4 sm:$0xff]  }
0x280a   :  { %3619 = vmatpush1.bf16.msra.mxu0 %v6976_v17  ;;  %v7030_v17 = vld [vmem:[%s9359_s9 + $0x6a0] ss:$20 sps:$4 sm:$0xff]  }
0x280b   :  { %3742 = vmatpush1.bf16.msra.mxu1 %v6979_v18  ;;  %3620 = vmatprep.subr.bf16.mxu0 %v6984_v19  ;;  %v7032_v18 = vld [vmem:[%s9359_s9 + $0x6c8] ss:$20 sps:$4 sm:$0xff]  }
0x280c   :  { %3743 = vmatprep.subr.bf16.mxu1 %v6987_v11  ;;  %v7048_v19 = vld [vmem:[%s9361_s11 + $0x30] ss:$12 sps:$4 sm:$0xff]   ;;  %v7053_v11 = vld [vmem:[%s9361_s11 + $0x4c] ss:$12 sps:$4 sm:$0xff]  }
0x280e   :  { %3621 = vmatpush1.bf16.msra.mxu0 %v6982_v22  ;;  %v7034_v22 = vld [vmem:[%s9359_s9 + $0x6f0] ss:$20 sps:$4 sm:$0xff]  }
0x280f   :  { %3744 = vmatpush1.bf16.msra.mxu1 %v6985_v23  ;;  %3622 = vmatprep.subr.bf16.mxu0 %v6990_v24  ;;  %v7051_v23 = vld [vmem:[%s9361_s11 + $0x48] ss:$12 sps:$4 sm:$0xff]   ;;  %v7056_v24 = vld [vmem:[%s9361_s11 + $0x64] ss:$12 sps:$4 sm:$0xff]  }
0x2810   :  { %3745 = vmatprep.subr.bf16.mxu1 %v6993_v27  ;;  %v7035_v27 = vld [vmem:[%s9359_s9 + $0x5b0] ss:$20 sps:$4 sm:$0xff]  }
0x2812   :  { %3623 = vmatpush1.bf16.msra.mxu0 %v6988_v63  ;;  %v7054_v63 = vld [vmem:[%s9361_s11 + $0x60] ss:$12 sps:$4 sm:$0xff]  }
0x2813   :  { %3746 = vmatpush1.bf16.msra.mxu1 %v6991_v35  ;;  %6211 = vmatprep.subr.bf16.mxu0 %v6994_v36  ;;  %v7059_v35 = vld [vmem:[%s9361_s11 + $0x7c] ss:$12 sps:$4 sm:$0xff]   ;;  %v7037_v36 = vld [vmem:[%s9359_s9 + $0x5d8] ss:$20 sps:$4 sm:$0xff]  }
0x2814   :  { %6233 = vmatprep.subr.bf16.mxu1 %v6995_v52  ;;  %v7038_v52 = vld [vmem:[%s9359_s9 + $0x740] ss:$20 sps:$4 sm:$0xff]  }
0x2815   :  { %3625 = vmatmul.mubr.bf16.vlgmr.msra.gmra.mrb[40].mxu0 %v8567_v40 }
0x2816   :  { %3748 = vmatmul.mubr.bf16.vlgmr.msra.gmra.mrb[40].mxu1 %v8567_v40  ;;  %6212 = vmatpush3.bf16.msra.mxu0 %v6996_v9  ;;  %v7062_v9 = vld [vmem:[%s9361_s11 + $0x94] ss:$12 sps:$4 sm:$0xff]  }
0x2817   :  { %3788 = vmatprep.mubr.bf16.mxu0 %v8136_v49  ;;  %6234 = vmatpush3.bf16.msra.mxu1 %v6997_v4  ;;  %v7006_v49 = vld [vmem:[%s9359_s9 + $0x1c8] ss:$20 sps:$4 sm:$0xff]   ;;  %v7039_v4 = vld [vmem:[%s9359_s9 + $0x600] ss:$20 sps:$4 sm:$0xff]  }
0x2818   :  { %3828 = vmatprep.mubr.bf16.mxu1 %v8156_v54  ;;  %6213 = vmatprep.subr.bf16.mxu0 %v6998_v20  ;;  %v7007_v54 = vld [vmem:[%s9359_s9 + $0x448] ss:$20 sps:$4 sm:$0xff]  }
0x2819   :  { %6235 = vmatprep.subr.bf16.mxu1 %v6999_v41  ;;  %v7040_v20 = vld [vmem:[%s9359_s9 + $0x768] ss:$20 sps:$4 sm:$0xff]  }
0x281a   :  { %6214 = vmatpush3.bf16.msra.mxu0 %v7000_v42  ;;  %v7060_v41 = vld [vmem:[%s9361_s11 + $0x90] ss:$12 sps:$4 sm:$0xff]   ;;  %v7065_v42 = vld [vmem:[%s9361_s11 + $0xac] ss:$12 sps:$4 sm:$0xff]  }
0x281b   :  { %6236 = vmatpush3.bf16.msra.mxu1 %v7001_v44  ;;  %6215 = vmatprep.subr.bf16.mxu0 %v7002_v45  ;;  %v7041_v44 = vld [vmem:[%s9359_s9 + $0x628] ss:$20 sps:$4 sm:$0xff]  }
0x281c   :  { %6237 = vmatprep.subr.bf16.mxu1 %v7003_v46  ;;  %v7069_v45 = vld [vmem:[%s9361_s11 + $0xc8] ss:$12 sps:$4 sm:$0xff]  }
0x281d   :  { %v7063_v46 = vld [vmem:[%s9361_s11 + $0xa8] ss:$12 sps:$4 sm:$0xff]  }
0x281e   :  { %6216 = vmatpush3.bf16.msra.mxu0 %v7004_v33  ;;  %v7068_v33 = vld [vmem:[%s9361_s11 + $0xc4] ss:$12 sps:$4 sm:$0xff]  }
0x281f   :  { %6238 = vmatpush3.bf16.msra.mxu1 %v7005_v47  ;;  %6217 = vmatprep.subr.bf16.mxu0 %v7006_v49  ;;  %v7070_v47 = vld [vmem:[%s9361_s11 + $0x8] ss:$12 sps:$4 sm:$0xff]   ;;  %v7074_v49 = vld [vmem:[%s9361_s11 + $0xe0] ss:$12 sps:$4 sm:$0xff]  }
0x2820   :  { %6239 = vmatprep.subr.bf16.mxu1 %v7007_v54  ;;  %v7066_v54 = vld [vmem:[%s9361_s11 + $0xc0] ss:$12 sps:$4 sm:$0xff]  }
0x2822   :  { %6218 = vmatpush3.bf16.msra.mxu0 %v7008_v48  ;;  %v7073_v48 = vld [vmem:[%s9361_s11 + $0xdc] ss:$12 sps:$4 sm:$0xff]  }
0x2823   :  { %6240 = vmatpush3.bf16.msra.mxu1 %v7009_v34  ;;  %6219 = vmatprep.subr.bf16.mxu0 %v7010_v3  ;;  %v7075_v34 = vld [vmem:[%s9361_s11 + $0x20] ss:$12 sps:$4 sm:$0xff]   ;;  %v7079_v3 = vld [vmem:[%s9361_s11 + $0xf8] ss:$12 sps:$4 sm:$0xff]  }
0x2824   :  { %6241 = vmatprep.subr.bf16.mxu1 %v7011_v53  ;;  %v7078_v53 = vld [vmem:[%s9361_s11 + $0xf4] ss:$12 sps:$4 sm:$0xff]  }
0x2826   :  { %6220 = vmatpush3.bf16.msra.mxu0 %v7012_v57  ;;  %v7080_v57 = vld [vmem:[%s9361_s11 + $0x38] ss:$12 sps:$4 sm:$0xff]  }
0x2827   :  { %6242 = vmatpush3.bf16.msra.mxu1 %v7013_v58  ;;  %6221 = vmatprep.subr.bf16.mxu0 %v7014_v29  ;;  %v7084_v58 = vld [vmem:[%s9361_s11 + $0x110] ss:$12 sps:$4 sm:$0xff]  }
0x2828   :  { %6243 = vmatprep.subr.bf16.mxu1 %v7015_v59  ;;  %v7076_v29 = vld [vmem:[%s9361_s11 + $0xf0] ss:$12 sps:$4 sm:$0xff]   ;;  %v7083_v59 = vld [vmem:[%s9361_s11 + $0x10c] ss:$12 sps:$4 sm:$0xff]  }
0x282a   :  { %6222 = vmatpush3.bf16.msra.mxu0 %v7016_v60  ;;  %v7085_v60 = vld [vmem:[%s9361_s11 + $0x50] ss:$12 sps:$4 sm:$0xff]  }
0x282b   :  { %6244 = vmatpush3.bf16.msra.mxu1 %v7017_v61  ;;  %6223 = vmatprep.subr.bf16.mxu0 %v7018_v62  ;;  %v7089_v61 = vld [vmem:[%s9361_s11 + $0x128] ss:$12 sps:$4 sm:$0xff]  }
0x282c   :  { %6245 = vmatprep.subr.bf16.mxu1 %v7019_v31  ;;  %v7081_v62 = vld [vmem:[%s9361_s11 + $0x108] ss:$12 sps:$4 sm:$0xff]   ;;  %v7088_v31 = vld [vmem:[%s9361_s11 + $0x124] ss:$12 sps:$4 sm:$0xff]  }
0x282e   :  { %6224 = vmatpush3.bf16.msra.mxu0 %v7020_v39  ;;  %v7090_v39 = vld [vmem:[%s9361_s11 + $0x68] ss:$12 sps:$4 sm:$0xff]  }
0x282f   :  { %6246 = vmatpush3.bf16.msra.mxu1 %v7021_v1  ;;  %6225 = vmatprep.subr.bf16.mxu0 %v7022_v6  ;;  %v7094_v1 = vld [vmem:[%s9361_s11 + $0x140] ss:$12 sps:$4 sm:$0xff]  }
0x2830   :  { %6247 = vmatprep.subr.bf16.mxu1 %v7023_v7  ;;  %v7086_v6 = vld [vmem:[%s9361_s11 + $0x120] ss:$12 sps:$4 sm:$0xff]   ;;  %v7093_v7 = vld [vmem:[%s9361_s11 + $0x13c] ss:$12 sps:$4 sm:$0xff]  }
0x2832   :  { %6226 = vmatpush3.bf16.msra.mxu0 %v7024_v8  ;;  %v7095_v8 = vld [vmem:[%s9361_s11 + $0x80] ss:$12 sps:$4 sm:$0xff]  }
0x2833   :  { %6248 = vmatpush3.bf16.msra.mxu1 %v7025_v10  ;;  %6255 = vmatprep.subr.bf16.mxu0 %v7026_v38  ;;  %v7091_v10 = vld [vmem:[%s9361_s11 + $0x138] ss:$12 sps:$4 sm:$0xff]  }
0x2834   :  { %4703 = vmatprep.subr.bf16.mxu1 %v7044_v12  ;;  %v7099_v38 = vld [vmem:[%s9361_s11 + $0x158] ss:$12 sps:$4 sm:$0xff]   ;;  %v7098_v12 = vld [vmem:[%s9361_s11 + $0x154] ss:$12 sps:$4 sm:$0xff]  }
0x2835   :  { %3789 = vmatmul.mubr.bf16.vlgmr.msra.gmra.mrb[44].mxu0 %v8144_v51  ;;  %v7045_v51 = vld [vmem:[%s9361_s11 + $0x18] ss:$12 sps:$4 sm:$0xff]  }
0x2836   :  { %3829 = vmatmul.mubr.bf16.vlgmr.msra.gmra.mrb[44].mxu1 %v8356_v15  ;;  %6256 = vmatpush3.bf16.msra.mxu0 %v7027_v13  ;;  %v7050_v15 = vld [vmem:[%s9361_s11 + $0x34] ss:$12 sps:$4 sm:$0xff]   ;;  %v7100_v13 = vld [vmem:[%s9361_s11 + $0x98] ss:$12 sps:$4 sm:$0xff]  }
0x2837   :  { %3868 = vmatprep.mubr.bf16.mxu0 %v8361_v55  ;;  %6257 = vmatprep.subr.bf16.mxu0 %v7028_v56  ;;  %v7031_v55 = vld [vmem:[%s9359_s9 + $0x560] ss:$20 sps:$4 sm:$0xff]   ;;  %v7096_v56 = vld [vmem:[%s9361_s11 + $0x150] ss:$12 sps:$4 sm:$0xff]  }
0x2838   :  { %4704 = vmatpush1.bf16.msra.mxu1 %v7042_v14  ;;  %v7104_v14 = vld [vmem:[%s9361_s11 + $0x170] ss:$12 sps:$4 sm:$0xff]  }
0x2839   :  { %4705 = vmatprep.subr.bf16.mxu1 %v7047_v2  ;;  %v7103_v2 = vld [vmem:[%s9361_s11 + $0x16c] ss:$12 sps:$4 sm:$0xff]  }
0x283a   :  { %6258 = vmatpush3.bf16.msra.mxu0 %v7029_v30  ;;  %v7105_v30 = vld [vmem:[%s9361_s11 + $0xb0] ss:$12 sps:$4 sm:$0xff]  }
0x283b   :  { %6259 = vmatprep.subr.bf16.mxu0 %v7030_v17  ;;  %v7101_v17 = vld [vmem:[%s9361_s11 + $0x168] ss:$12 sps:$4 sm:$0xff]  }
0x283c   :  { %4706 = vmatpush1.bf16.msra.mxu1 %v7045_v51  ;;  %v7109_v51 = vld [vmem:[%s9361_s11 + $0x248] ss:$12 sps:$4 sm:$0xff]  }
0x283d   :  { %4707 = vmatprep.subr.bf16.mxu1 %v7050_v15  ;;  %v7108_v15 = vld [vmem:[%s9361_s11 + $0x184] ss:$12 sps:$4 sm:$0xff]  }
0x283e   :  { %6260 = vmatpush3.bf16.msra.mxu0 %v7031_v55  ;;  %v8859_v55 = vld [vmem:[%s9362_s10] sm:$0x1f] }
0x283f   :  { %6261 = vmatprep.subr.bf16.mxu0 %v7032_v18  ;;  %v2240_v18 = vrot.slane %v8859_v55, %v8116_v26 }
0x2840   :  { %4708 = vmatpush1.bf16.msra.mxu1 %v7048_v19  ;;  %v2244_v19 = vrot.slane %v8859_v55, %v8124_v28 }
0x2841   :  { %4709 = vmatprep.subr.bf16.mxu1 %v7053_v11  ;;  %v2252_v11 = vrot.slane %v8859_v55, %v1730_v32  ;;  %v7106_v32 = vld [vmem:[%s9361_s11 + $0x180] ss:$12 sps:$4 sm:$0xff]  }
0x2842   :  { %6262 = vmatpush3.bf16.msra.mxu0 %v7033_v21 }
0x2843   :  { %6263 = vmatprep.subr.bf16.mxu0 %v7034_v22 }
0x2844   :  { %4710 = vmatpush1.bf16.msra.mxu1 %v7051_v23 }
0x2845   :  { %4711 = vmatprep.subr.bf16.mxu1 %v7056_v24 }
0x2846   :  { %6264 = vmatpush3.bf16.msra.mxu0 %v7035_v27 }
0x2847   :  { %6265 = vmatprep.subr.bf16.mxu0 %v7036_v43 }
0x2848   :  { %4712 = vmatpush1.bf16.msra.mxu1 %v7054_v63 }
0x2849   :  { %4713 = vmatprep.subr.bf16.mxu1 %v7059_v35 }
0x284a   :  { %6266 = vmatpush3.bf16.msra.mxu0 %v7037_v36 }
0x284b   :  { %6267 = vmatprep.subr.bf16.mxu0 %v7038_v52 }
0x284c   :  { %4714 = vmatpush1.bf16.msra.mxu1 %v7057_v37 }
0x284d   :  { %4715 = vmatprep.subr.bf16.mxu1 %v7062_v9 }
0x284e   :  { %6268 = vmatpush3.bf16.msra.mxu0 %v7039_v4 }
0x284f   :  { %6269 = vmatprep.subr.bf16.mxu0 %v7040_v20 }
0x2850   :  { %4716 = vmatpush1.bf16.msra.mxu1 %v7060_v41 }
0x2851   :  { %4717 = vmatprep.subr.bf16.mxu1 %v7065_v42  ;;  %v7110_v42 = vld [vmem:[%s9361_s11 + $0x188] ss:$12 sps:$4 sm:$0xff]  }
0x2852   :  { %6270 = vmatpush3.bf16.msra.mxu0 %v7041_v44 }
0x2853   :  { %6277 = vmatprep.subr.bf16.mxu0 %v7069_v45  ;;  %v7113_v45 = vld [vmem:[%s9361_s11 + $0x19c] ss:$12 sps:$4 sm:$0xff]  }
0x2854   :  { %4718 = vmatpush1.bf16.msra.mxu1 %v7063_v46  ;;  %v7114_v46 = vld [vmem:[%s9361_s11 + $0x260] ss:$12 sps:$4 sm:$0xff]  }
0x2855   :  { %3869 = vmatmul.mubr.bf16.vlgmr.msra.gmra.mrb[48].mxu0 %v8567_v40  ;;  %4719 = vmatprep.subr.bf16.mxu1 %v7068_v33  ;;  %v7071_v40 = vld [vmem:[%s9361_s11 + $0xd8] ss:$12 sps:$4 sm:$0xff]  }
0x2856   :  { %6278 = vmatpush3.bf16.msra.mxu0 %v7070_v47  ;;  %v7111_v47 = vld [vmem:[%s9361_s11 + $0x198] ss:$12 sps:$4 sm:$0xff]  }
0x2857   :  { %6279 = vmatprep.subr.bf16.mxu0 %v7074_v49  ;;  %v7115_v49 = vld [vmem:[%s9361_s11 + $0x1a0] ss:$12 sps:$4 sm:$0xff]  }
0x2858   :  { %4720 = vmatpush1.bf16.msra.mxu1 %v7066_v54  ;;  %v7118_v54 = vld [vmem:[%s9361_s11 + $0x1b4] ss:$12 sps:$4 sm:$0xff]  }
0x2859   :  { %4721 = vmatprep.subr.bf16.mxu1 %v7073_v48  ;;  %v7119_v48 = vld [vmem:[%s9361_s11 + $0x278] ss:$12 sps:$4 sm:$0xff]  }
0x285a   :  { %6280 = vmatpush3.bf16.msra.mxu0 %v7075_v34  ;;  %v7116_v34 = vld [vmem:[%s9361_s11 + $0x1b0] ss:$12 sps:$4 sm:$0xff]  }
0x285b   :  { %6281 = vmatprep.subr.bf16.mxu0 %v7079_v3  ;;  %v7120_v3 = vld [vmem:[%s9361_s11 + $0x1b8] ss:$12 sps:$4 sm:$0xff]  }
0x285c   :  { %4722 = vmatpush1.bf16.msra.mxu1 %v7071_v40  ;;  %v7123_v40 = vld [vmem:[%s9361_s11 + $0x1cc] ss:$12 sps:$4 sm:$0xff]  }
0x285d   :  { %4723 = vmatprep.subr.bf16.mxu1 %v7078_v53  ;;  %v7124_v53 = vld [vmem:[%s9361_s11 + $0x290] ss:$12 sps:$4 sm:$0xff]  }
0x285e   :  { %6282 = vmatpush3.bf16.msra.mxu0 %v7080_v57  ;;  %v7121_v57 = vld [vmem:[%s9361_s11 + $0x1c8] ss:$12 sps:$4 sm:$0xff]  }
0x285f   :  { %6283 = vmatprep.subr.bf16.mxu0 %v7084_v58  ;;  %v7125_v58 = vld [vmem:[%s9361_s11 + $0x1d0] ss:$12 sps:$4 sm:$0xff]  }
0x2860   :  { %4724 = vmatpush1.bf16.msra.mxu1 %v7076_v29  ;;  %v7128_v29 = vld [vmem:[%s9361_s11 + $0x1e4] ss:$12 sps:$4 sm:$0xff]  }
0x2861   :  { %4725 = vmatprep.subr.bf16.mxu1 %v7083_v59  ;;  %v7129_v59 = vld [vmem:[%s9361_s11 + $0x2a8] ss:$12 sps:$4 sm:$0xff]  }
0x2862   :  { %6284 = vmatpush3.bf16.msra.mxu0 %v7085_v60  ;;  %v7126_v60 = vld [vmem:[%s9361_s11 + $0x1e0] ss:$12 sps:$4 sm:$0xff]  }
0x2863   :  { %6285 = vmatprep.subr.bf16.mxu0 %v7089_v61  ;;  %v7130_v61 = vld [vmem:[%s9361_s11 + $0x1e8] ss:$12 sps:$4 sm:$0xff]  }
0x2864   :  { %4726 = vmatpush1.bf16.msra.mxu1 %v7081_v62  ;;  %v7133_v62 = vld [vmem:[%s9361_s11 + $0x1fc] ss:$12 sps:$4 sm:$0xff]  }
0x2865   :  { %4727 = vmatprep.subr.bf16.mxu1 %v7088_v31  ;;  %v7134_v31 = vld [vmem:[%s9361_s11 + $0x2c0] ss:$12 sps:$4 sm:$0xff]  }
0x2866   :  { %6286 = vmatpush3.bf16.msra.mxu0 %v7090_v39  ;;  %v7131_v39 = vld [vmem:[%s9361_s11 + $0x1f8] ss:$12 sps:$4 sm:$0xff]  }
0x2867   :  { %6287 = vmatprep.subr.bf16.mxu0 %v7094_v1  ;;  %v7135_v1 = vld [vmem:[%s9361_s11 + $0x200] ss:$12 sps:$4 sm:$0xff]  }
0x2868   :  { %4728 = vmatpush1.bf16.msra.mxu1 %v7086_v6  ;;  %v2248_v6 = vrot.slane %v8859_v55, %v8303_v50 }
0x2869   :  { %4729 = vmatprep.subr.bf16.mxu1 %v7093_v7  ;;  %v7138_v7 = vld [vmem:[%s9361_s11 + $0x214] ss:$12 sps:$4 sm:$0xff]  }
0x286a   :  { %6288 = vmatpush3.bf16.msra.mxu0 %v7095_v8  ;;  %v7139_v8 = vld [vmem:[%s9361_s11 + $0x2d8] ss:$12 sps:$4 sm:$0xff]  }
0x286b   :  { %6289 = vmatprep.subr.bf16.mxu0 %v7099_v38  ;;  %v7140_v38 = vld [vmem:[%s9361_s11 + $0x218] ss:$12 sps:$4 sm:$0xff]  }
0x286c   :  { %4730 = vmatpush1.bf16.msra.mxu1 %v7091_v10  ;;  %v7136_v10 = vld [vmem:[%s9361_s11 + $0x210] ss:$12 sps:$4 sm:$0xff]  }
0x286d   :  { %4731 = vmatprep.subr.bf16.mxu1 %v7098_v12 }
0x286e   :  { %6290 = vmatpush3.bf16.msra.mxu0 %v7100_v13  ;;  %v7143_v13 = vld [vmem:[%s9361_s11 + $0x22c] ss:$12 sps:$4 sm:$0xff]  }
0x286f   :  { %6291 = vmatprep.subr.bf16.mxu0 %v7104_v14 }
0x2870   :  { %4732 = vmatpush1.bf16.msra.mxu1 %v7096_v56  ;;  %v7144_v56 = vld [vmem:[%s9361_s11 + $0x2f0] ss:$12 sps:$4 sm:$0xff]  }
0x2871   :  { %4733 = vmatprep.subr.bf16.mxu1 %v7103_v2  ;;  %v2256_v2 = vrot.slane %v8859_v55, %v1734_v16  ;;  %v7148_v16 = vld [vmem:[%s9361_s11 + $0x244] ss:$12 sps:$4 sm:$0xff]  }
0x2872   :  { %6292 = vmatpush3.bf16.msra.mxu0 %v7105_v30 }
0x2873   :  { %6299 = vmatprep.subr.bf16.mxu0 %v7109_v51 }
0x2874   :  { %4734 = vmatpush1.bf16.msra.mxu1 %v7101_v17 }
0x2875   :  { %4744 = vmatprep.subr.bf16.mxu1 %v7108_v15 }
0x28e8   :  { %v3626_v21 = vpop.f32.mrb[40].mxu0 }
0x28e9   :  { %v6607_v22 = vadd.f32 %v3626_v21, %v2240_v18  ;;  %v8868_v23 = vpop.f32.mrb[40].mxu1  ;;  %v3628_v24 = vpop.f32.mrb[41].mxu0 }
0x28ea   :  { %v6608_v27 = vadd.f32 %v3628_v24, %v2244_v19  ;;  %v3751_v43 = vpop.f32.mrb[41].mxu1  ;;  %v3630_v63 = vpop.f32.mrb[42].mxu0  ;;  %v6609_v12 = vadd.f32 %v8868_v23, %v2248_v6  ;;  %v7141_v19 = vld [vmem:[%s9361_s11 + $0x228] ss:$12 sps:$4 sm:$0xff]  }
0x28eb   :  { %v3876_v35 = vmax.f32 %v6607_v22, 0.0  ;;  %v6610_v36 = vadd.f32 %v3751_v43, %v2252_v11  ;;  %v3753_v52 = vpop.f32.mrb[42].mxu1  ;;  %v3631_v37 = vpop.f32.mrb[43].mxu0  ;;  %v7145_v11 = vld [vmem:[%s9361_s11 + $0x230] ss:$12 sps:$4 sm:$0xff]  }
0x28ec   :  { %v3877_v9 = vmax.f32 %v6608_v27, 0.0  ;;  %v3754_v4 = vpop.f32.mrb[43].mxu1  ;;  %v3878_v21 = vmax.f32 %v6609_v12, 0.0  ;;  %v7146_v43 = vld [vmem:[%s9361_s11 + $0x240] ss:$12 sps:$4 sm:$0xff]  }
0x28ed   :  { %v3879_v20 = vmax.f32 %v6610_v36, 0.0  ;;  %v4042_v44 = vpack.c.bf16 %v3876_v35, %v3876_v35  ;;  %v7149_v63 = vld [vmem:[%s9361_s11 + $0x308] ss:$12 sps:$4 sm:$0xff]   ;;  %v7150_v52 = vld [vmem:[%s9361_s11 + $0x258] ss:$12 sps:$4 sm:$0xff]  }
0x28ee   :  { %v4043_v41 = vpack.c.bf16 %v3877_v9, %v3877_v9  ;;  %v8977_v35 = vpack.c.bf16 %v3878_v21, %v3878_v21  ;;  %v7152_v36 = vld [vmem:[%s9361_s11 + $0x25c] ss:$12 sps:$4 sm:$0xff]   ;;  %v7153_v37 = vld [vmem:[%s9361_s11 + $0x320] ss:$12 sps:$4 sm:$0xff]   ;;  %v7205_v21 = vld [vmem:[%s9363_s13 + $0x10] ss:$8 sps:$4 sm:$0xff]  }
0x28ef   :  { %v4045_v33 = vpack.c.bf16 %v3879_v20, %v3879_v20  ;;  %v7156_v9 = vld [vmem:[%s9361_s11 + $0x274] ss:$12 sps:$4 sm:$0xff]   ;;  %v7154_v4 = vld [vmem:[%s9361_s11 + $0x270] ss:$12 sps:$4 sm:$0xff]   ;;  %v7157_v20 = vld [vmem:[%s9361_s11 + $0x338] ss:$12 sps:$4 sm:$0xff]  }
0x28f0   :  { %4735 = vmatprep.mubr.bf16.mxu1 %v4043_v41  ;;  %4858 = vmatprep.mubr.bf16.mxu0 %v4043_v41  ;;  %v7160_v41 = vld [vmem:[%s9361_s11 + $0x28c] ss:$12 sps:$4 sm:$0xff]   ;;  %v7187_v12 = vld [vmem:[%s9361_s11 + $0x348] ss:$12 sps:$4 sm:$0xff]  }
0x28f1   :  { %4736 = vmatmul.mubr.bf16.vlgmr.msra.gmra.mrb[48].mxu1 %v4042_v44  ;;  %4859 = vmatmul.mubr.bf16.vlgmr.msra.gmra.mrb[52].mxu0 %v4042_v44  ;;  %v7164_v44 = vld [vmem:[%s9361_s11 + $0x2a4] ss:$12 sps:$4 sm:$0xff]  }
0x28f2   :  { %4745 = vmatpush1.bf16.msra.mxu1 %v7106_v32  ;;  %6300 = vmatpush3.bf16.msra.mxu0 %v7110_v42  ;;  %v7158_v32 = vld [vmem:[%s9361_s11 + $0x288] ss:$12 sps:$4 sm:$0xff]   ;;  %v7161_v42 = vld [vmem:[%s9361_s11 + $0x350] ss:$12 sps:$4 sm:$0xff]  }
0x28f3   :  { %4776 = vmatprep.mubr.bf16.mxu1 %v4045_v33  ;;  %4898 = vmatprep.mubr.bf16.mxu0 %v4045_v33  ;;  %v7168_v33 = vld [vmem:[%s9361_s11 + $0x2bc] ss:$12 sps:$4 sm:$0xff]  }
0x28f4   :  { %4746 = vmatprep.subr.bf16.mxu1 %v7113_v45  ;;  %6301 = vmatprep.subr.bf16.mxu0 %v7114_v46  ;;  %v7162_v45 = vld [vmem:[%s9361_s11 + $0x2a0] ss:$12 sps:$4 sm:$0xff]   ;;  %v7165_v46 = vld [vmem:[%s9361_s11 + $0x368] ss:$12 sps:$4 sm:$0xff]  }
0x28f6   :  { %4747 = vmatpush1.bf16.msra.mxu1 %v7111_v47  ;;  %6302 = vmatpush3.bf16.msra.mxu0 %v7115_v49  ;;  %v7166_v47 = vld [vmem:[%s9361_s11 + $0x2b8] ss:$12 sps:$4 sm:$0xff]   ;;  %v7169_v49 = vld [vmem:[%s9361_s11 + $0x380] ss:$12 sps:$4 sm:$0xff]  }
0x28f7   :  { %4748 = vmatprep.subr.bf16.mxu1 %v7118_v54  ;;  %6303 = vmatprep.subr.bf16.mxu0 %v7119_v48  ;;  %v7172_v54 = vld [vmem:[%s9361_s11 + $0x2d4] ss:$12 sps:$4 sm:$0xff]   ;;  %v7170_v48 = vld [vmem:[%s9361_s11 + $0x2d0] ss:$12 sps:$4 sm:$0xff]  }
0x28fa   :  { %4749 = vmatpush1.bf16.msra.mxu1 %v7116_v34  ;;  %6304 = vmatpush3.bf16.msra.mxu0 %v7120_v3  ;;  %v7173_v34 = vld [vmem:[%s9361_s11 + $0x398] ss:$12 sps:$4 sm:$0xff]  }
0x28fb   :  { %4750 = vmatprep.subr.bf16.mxu1 %v7123_v40  ;;  %6305 = vmatprep.subr.bf16.mxu0 %v7124_v53  ;;  %v7176_v3 = vld [vmem:[%s9361_s11 + $0x2ec] ss:$12 sps:$4 sm:$0xff]  }
0x28fe   :  { %4751 = vmatpush1.bf16.msra.mxu1 %v7121_v57  ;;  %6306 = vmatpush3.bf16.msra.mxu0 %v7125_v58 }
0x28ff   :  { %4752 = vmatprep.subr.bf16.mxu1 %v7128_v29  ;;  %6307 = vmatprep.subr.bf16.mxu0 %v7129_v59  ;;  %v7174_v29 = vld [vmem:[%s9361_s11 + $0x2e8] ss:$12 sps:$4 sm:$0xff]   ;;  %v7177_v59 = vld [vmem:[%s9361_s11 + $0x3b0] ss:$12 sps:$4 sm:$0xff]  }
0x2902   :  { %4753 = vmatpush1.bf16.msra.mxu1 %v7126_v60  ;;  %6308 = vmatpush3.bf16.msra.mxu0 %v7130_v61  ;;  %v7180_v61 = vld [vmem:[%s9361_s11 + $0x304] ss:$12 sps:$4 sm:$0xff]  }
0x2903   :  { %4754 = vmatprep.subr.bf16.mxu1 %v7133_v62  ;;  %6309 = vmatprep.subr.bf16.mxu0 %v7134_v31 }
0x2906   :  { %4755 = vmatpush1.bf16.msra.mxu1 %v7131_v39  ;;  %6310 = vmatpush3.bf16.msra.mxu0 %v7135_v1  ;;  %v7178_v39 = vld [vmem:[%s9361_s11 + $0x300] ss:$12 sps:$4 sm:$0xff]   ;;  %v7183_v1 = vld [vmem:[%s9361_s11 + $0x31c] ss:$12 sps:$4 sm:$0xff]  }
0x2907   :  { %4756 = vmatprep.subr.bf16.mxu1 %v7138_v7  ;;  %6311 = vmatprep.subr.bf16.mxu0 %v7139_v8  ;;  %v7181_v7 = vld [vmem:[%s9361_s11 + $0x318] ss:$12 sps:$4 sm:$0xff]   ;;  %v7186_v8 = vld [vmem:[%s9361_s11 + $0x334] ss:$12 sps:$4 sm:$0xff]  }
0x2908   :  { %v6227_v14 = vpop.f32.mrb[44].mxu0 }
0x2909   :  { %v6249_v30 = vpop.f32.mrb[44].mxu1  ;;  %v6228_v17 = vpop.f32.mrb[45].mxu0 }
0x290a   :  { %v6229_v51 = vadd.f32 %v6228_v17, %v6227_v14  ;;  %v6250_v15 = vpop.f32.mrb[45].mxu1  ;;  %4757 = vmatpush1.bf16.msra.mxu1 %v7136_v10  ;;  %6312 = vmatpush3.bf16.msra.mxu0 %v7140_v38  ;;  %v6230_v18 = vpop.f32.mrb[46].mxu0  ;;  %v7184_v10 = vld [vmem:[%s9361_s11 + $0x330] ss:$12 sps:$4 sm:$0xff]   ;;  %v7189_v38 = vld [vmem:[%s9361_s11 + $0x34c] ss:$12 sps:$4 sm:$0xff]  }
0x290b   :  { %v6251_v22 = vadd.f32 %v6250_v15, %v6249_v30  ;;  %v6252_v25 = vpop.f32.mrb[46].mxu1  ;;  %v6231_v23 = vpop.f32.mrb[47].mxu0  ;;  %4758 = vmatprep.subr.bf16.mxu1 %v7143_v13  ;;  %6313 = vmatprep.subr.bf16.mxu0 %v7144_v56  ;;  %v7192_v13 = vld [vmem:[%s9361_s11 + $0x364] ss:$12 sps:$4 sm:$0xff]   ;;  %v7190_v56 = vld [vmem:[%s9361_s11 + $0x360] ss:$12 sps:$4 sm:$0xff]  }
0x290c   :  { %v3791_v55 = vadd.f32 %v6229_v51, %v2256_v2  ;;  %v6253_v24 = vpop.f32.mrb[47].mxu1  ;;  %v7195_v14 = vld [vmem:[%s9361_s11 + $0x37c] ss:$12 sps:$4 sm:$0xff]   ;;  %v7193_v2 = vld [vmem:[%s9361_s11 + $0x378] ss:$12 sps:$4 sm:$0xff]  }
0x290d   :  { %v7198_v30 = vld [vmem:[%s9361_s11 + $0x394] ss:$12 sps:$4 sm:$0xff]   ;;  %v7196_v17 = vld [vmem:[%s9361_s11 + $0x390] ss:$12 sps:$4 sm:$0xff]   ;;  %v7201_v51 = vld [vmem:[%s9361_s11 + $0x3ac] ss:$12 sps:$4 sm:$0xff]  }
0x290e   :  { %v8969_v27 = vadd.f32 %v6251_v22, %v3791_v55  ;;  %4759 = vmatpush1.bf16.msra.mxu1 %v7141_v19  ;;  %6314 = vmatpush3.bf16.msra.mxu0 %v7145_v11  ;;  %v7199_v15 = vld [vmem:[%s9361_s11 + $0x3a8] ss:$12 sps:$4 sm:$0xff]   ;;  %v7204_v19 = vld [vmem:[%s9363_s13 + $0x4] ss:$8 sps:$4 sm:$0xff]  }
0x290f   :  { %4760 = vmatprep.subr.bf16.mxu1 %v7148_v16  ;;  %6559 = vmatprep.subr.bf16.mxu0 %v7430_v0  ;;  %v7202_v18 = vld [vmem:[%s9363_s13] ss:$8 sps:$4 sm:$0xff]   ;;  %v7207_v11 = vld [vmem:[%s9363_s13 + $0x14] ss:$8 sps:$4 sm:$0xff]   ;;  %v7210_v22 = vld [vmem:[%s9363_s13 + $0x24] ss:$8 sps:$4 sm:$0xff]  }
0x2910   :  { %v7208_v25 = vld [vmem:[%s9363_s13 + $0x20] ss:$8 sps:$4 sm:$0xff]   ;;  %v7213_v23 = vld [vmem:[%s9363_s13 + $0x34] ss:$8 sps:$4 sm:$0xff]   ;;  %v7211_v16 = vld [vmem:[%s9363_s13 + $0x30] ss:$8 sps:$4 sm:$0xff]  }
0x2911   :  { %4899 = vmatmul.mubr.bf16.vlgmr.msra.gmra.mrb[56].mxu0 %v8977_v35  ;;  %v7216_v55 = vld [vmem:[%s9363_s13 + $0x44] ss:$8 sps:$4 sm:$0xff]   ;;  %v7214_v24 = vld [vmem:[%s9363_s13 + $0x40] ss:$8 sps:$4 sm:$0xff]  }
0x2912   :  { %4761 = vmatpush1.bf16.msra.mxu1 %v7146_v43  ;;  %6560 = vmatpush3.bf16.msra.mxu0 %v7149_v63  ;;  %v7217_v43 = vld [vmem:[%s9363_s13 + $0x50] ss:$8 sps:$4 sm:$0xff]   ;;  %v7222_v63 = vld [vmem:[%s9363_s13 + $0x64] ss:$8 sps:$4 sm:$0xff]  }
0x2913   :  { %4762 = vmatprep.subr.bf16.mxu1 %v7152_v36  ;;  %6561 = vmatprep.subr.bf16.mxu0 %v7430_v0  ;;  %v7225_v36 = vld [vmem:[%s9363_s13 + $0x74] ss:$8 sps:$4 sm:$0xff]  }
0x2914   :  { %6575 = vmatprep.mubr.msk.bf16.mxu0 %vm7431_vm0, %v7430_v0 }
0x2916   :  { %4763 = vmatpush1.bf16.msra.mxu1 %v7150_v52  ;;  %6562 = vmatpush3.bf16.msra.mxu0 %v7153_v37  ;;  %v7223_v52 = vld [vmem:[%s9363_s13 + $0x70] ss:$8 sps:$4 sm:$0xff]   ;;  %v7226_v37 = vld [vmem:[%s9363_s13 + $0x80] ss:$8 sps:$4 sm:$0xff]  }
0x2917   :  { %4764 = vmatprep.subr.bf16.mxu1 %v7156_v9  ;;  %6563 = vmatprep.subr.bf16.mxu0 %v7430_v0  ;;  %v7228_v9 = vld [vmem:[%s9363_s13 + $0x84] ss:$8 sps:$4 sm:$0xff]  }
0x291a   :  { %4765 = vmatpush1.bf16.msra.mxu1 %v7154_v4  ;;  %6564 = vmatpush3.bf16.msra.mxu0 %v7157_v20  ;;  %v7231_v4 = vld [vmem:[%s9363_s13 + $0x94] ss:$8 sps:$4 sm:$0xff]   ;;  %v7229_v20 = vld [vmem:[%s9363_s13 + $0x90] ss:$8 sps:$4 sm:$0xff]  }
0x291b   :  { %4766 = vmatprep.subr.bf16.mxu1 %v7160_v41  ;;  %6565 = vmatprep.subr.bf16.mxu0 %v7430_v0  ;;  %v7234_v41 = vld [vmem:[%s9363_s13 + $0xa4] ss:$8 sps:$4 sm:$0xff]  }
0x291e   :  { %4767 = vmatpush1.bf16.msra.mxu1 %v7158_v32  ;;  %6566 = vmatpush3.bf16.msra.mxu0 %v7161_v42  ;;  %v7232_v32 = vld [vmem:[%s9363_s13 + $0xa0] ss:$8 sps:$4 sm:$0xff]   ;;  %v7237_v42 = vld [vmem:[%s9363_s13 + $0xb4] ss:$8 sps:$4 sm:$0xff]  }
0x291f   :  { %4768 = vmatprep.subr.bf16.mxu1 %v7164_v44  ;;  %6567 = vmatprep.subr.bf16.mxu0 %v7430_v0  ;;  %v7235_v44 = vld [vmem:[%s9363_s13 + $0xb0] ss:$8 sps:$4 sm:$0xff]  }
0x2922   :  { %4769 = vmatpush1.bf16.msra.mxu1 %v7162_v45  ;;  %6568 = vmatpush3.bf16.msra.mxu0 %v7165_v46  ;;  %v7240_v45 = vld [vmem:[%s9363_s13 + $0xc4] ss:$8 sps:$4 sm:$0xff]   ;;  %v7238_v46 = vld [vmem:[%s9363_s13 + $0xc0] ss:$8 sps:$4 sm:$0xff]  }
0x2923   :  { %4770 = vmatprep.subr.bf16.mxu1 %v7168_v33  ;;  %6569 = vmatprep.subr.bf16.mxu0 %v7430_v0  ;;  %v7243_v33 = vld [vmem:[%s9363_s13 + $0xd4] ss:$8 sps:$4 sm:$0xff]  }
0x2926   :  { %4771 = vmatpush1.bf16.msra.mxu1 %v7166_v47  ;;  %6570 = vmatpush3.bf16.msra.mxu0 %v7169_v49  ;;  %v7241_v47 = vld [vmem:[%s9363_s13 + $0xd0] ss:$8 sps:$4 sm:$0xff]   ;;  %v7246_v49 = vld [vmem:[%s9363_s13 + $0xe4] ss:$8 sps:$4 sm:$0xff]  }
0x2927   :  { %4772 = vmatprep.subr.bf16.mxu1 %v7172_v54  ;;  %6571 = vmatprep.subr.bf16.mxu0 %v7430_v0  ;;  %v7244_v54 = vld [vmem:[%s9363_s13 + $0xe0] ss:$8 sps:$4 sm:$0xff]  }
0x2928   :  { %v6271_v40 = vpop.f32.mrb[48].mxu0 }
0x2929   :  { %v6272_v53 = vpop.f32.mrb[49].mxu0 }
0x292a   :  { %v6273_v57 = vadd.f32 %v6272_v53, %v6271_v40  ;;  %4773 = vmatpush1.bf16.msra.mxu1 %v7170_v48  ;;  %v6274_v58 = vpop.f32.mrb[50].mxu0  ;;  %6572 = vmatpush3.bf16.msra.mxu0 %v7173_v34  ;;  %v7249_v48 = vld [vmem:[%s9363_s13 + $0xf4] ss:$8 sps:$4 sm:$0xff]   ;;  %v7247_v34 = vld [vmem:[%s9363_s13 + $0xf0] ss:$8 sps:$4 sm:$0xff]  }
0x292b   :  { %v6275_v60 = vpop.f32.mrb[51].mxu0  ;;  %4774 = vmatprep.subr.bf16.mxu1 %v7176_v3  ;;  %6573 = vmatprep.subr.bf16.mxu0 %v7430_v0  ;;  %v7252_v3 = vld [vmem:[%s9363_s13 + $0x104] ss:$8 sps:$4 sm:$0xff]  }
0x292c   :  { %v3871_v62 = vadd.f32 %v6273_v57, %v8969_v27  ;;  %v7219_v27 = vld [vmem:[%s9363_s13 + $0x54] ss:$8 sps:$4 sm:$0xff]   ;;  %v7275_v60 = vld [vmem:[%s9364_s15] sm:$0xff]  }
0x292e   :  { %v3880_v31 = vmax.f32 %v3871_v62, 0.0  ;;  %4775 = vmatpush1.bf16.msra.mxu1 %v7174_v29  ;;  %6574 = vmatpush3.bf16.msra.mxu0 %v7177_v59  ;;  %v7274_v59 = vld [vmem:[%s9364_s15 + $0x40] sm:$0xff]   ;;  %v7277_v62 = vld [vmem:[%s9364_s15 + $0x8] sm:$0xff]  }
0x292f   :  { %4785 = vmatprep.subr.bf16.mxu1 %v7180_v61  ;;  %5252 = vmatprep.subr.bf16.mxu0 %v7204_v19  ;;  %v7276_v61 = vld [vmem:[%s9364_s15 + $0x48] sm:$0xff]  }
0x2930   :  { %v4046_v6 = vpack.c.bf16 %v3880_v31, %v3880_v31  ;;  %v7278_v31 = vld [vmem:[%s9364_s15 + $0x50] sm:$0xff]  }
0x2931   :  { %4777 = vmatmul.mubr.bf16.vlgmr.msra.gmra.mrb[48].mxu1 %v8977_v35  ;;  %v7220_v35 = vld [vmem:[%s9363_s13 + $0x60] ss:$8 sps:$4 sm:$0xff]  }
0x2932   :  { %4786 = vmatpush1.bf16.msra.mxu1 %v7178_v39  ;;  %6576 = vmatmul.mubr.bf16.vlgmr.msra.gmra.mrb[60].mxu0 %v4046_v6  ;;  %v7279_v39 = vld [vmem:[%s9364_s15 + $0x10] sm:$0xff]  }
0x2933   :  { %4787 = vmatprep.subr.bf16.mxu1 %v7183_v1  ;;  %4817 = vmatprep.mubr.bf16.mxu1 %v7432_v5  ;;  %v7280_v1 = vld [vmem:[%s9364_s15 + $0x58] sm:$0xff]  }
0x2934   :  { %5253 = vmatpush1.bf16.msra.mxu0 %v7202_v18 }
0x2935   :  { %5254 = vmatprep.subr.bf16.mxu0 %v7207_v11 }
0x2936   :  { %4788 = vmatpush1.bf16.msra.mxu1 %v7181_v7  ;;  %v7282_v7 = vld [vmem:[%s9364_s15 + $0x60] sm:$0xff]  }
0x2937   :  { %4789 = vmatprep.subr.bf16.mxu1 %v7186_v8  ;;  %v7283_v8 = vld [vmem:[%s9364_s15 + $0x20] sm:$0xff]  }
0x2938   :  { %5255 = vmatpush1.bf16.msra.mxu0 %v7205_v21 }
0x2939   :  { %5256 = vmatprep.subr.bf16.mxu0 %v7210_v22 }
0x293a   :  { %4790 = vmatpush1.bf16.msra.mxu1 %v7184_v10  ;;  %v7284_v10 = vld [vmem:[%s9364_s15 + $0x68] sm:$0xff]  }
0x293b   :  { %4791 = vmatprep.subr.bf16.mxu1 %v7189_v38  ;;  %v4041_v38 = vld [vmem:[%s9365_s12] sm:$0x7] }
0x293c   :  { %5257 = vmatpush1.bf16.msra.mxu0 %v7208_v25  ;;  %v4051_v25 = vrot.slane %v4041_v38, %v8116_v26 }
0x293d   :  { %5258 = vmatprep.subr.bf16.mxu0 %v7213_v23  ;;  %v4055_v23 = vrot.slane %v4041_v38, %v8124_v28 }
0x293e   :  { %4792 = vmatpush1.bf16.msra.mxu1 %v7187_v12  ;;  %v7285_v12 = vld [vmem:[%s9364_s15 + $0x28] sm:$0xff]  }
0x293f   :  { %4793 = vmatprep.subr.bf16.mxu1 %v7192_v13  ;;  %v4059_v13 = vrot.slane %v4041_v38, %v8303_v50 }
0x2940   :  { %5259 = vmatpush1.bf16.msra.mxu0 %v7211_v16 }
0x2941   :  { %5260 = vmatprep.subr.bf16.mxu0 %v7216_v55 }
0x2942   :  { %4794 = vmatpush1.bf16.msra.mxu1 %v7190_v56 }
0x2943   :  { %4795 = vmatprep.subr.bf16.mxu1 %v7195_v14 }
0x2944   :  { %5261 = vmatpush1.bf16.msra.mxu0 %v7214_v24 }
0x2945   :  { %5262 = vmatprep.subr.bf16.mxu0 %v7219_v27 }
0x2946   :  { %4796 = vmatpush1.bf16.msra.mxu1 %v7193_v2 }
0x2947   :  { %4797 = vmatprep.subr.bf16.mxu1 %v7198_v30 }
0x2948   :  { %5263 = vmatpush1.bf16.msra.mxu0 %v7217_v43 }
0x2949   :  { %5264 = vmatprep.subr.bf16.mxu0 %v7222_v63 }
0x294a   :  { %4798 = vmatpush1.bf16.msra.mxu1 %v7196_v17 }
0x294b   :  { %4799 = vmatprep.subr.bf16.mxu1 %v7201_v51 }
0x294c   :  { %5265 = vmatpush1.bf16.msra.mxu0 %v7220_v35 }
0x294d   :  { %5266 = vmatprep.subr.bf16.mxu0 %v7225_v36 }
0x294e   :  { %4800 = vmatpush1.bf16.msra.mxu1 %v7199_v15 }
0x294f   :  { %6330 = vmatprep.subr.bf16.mxu1 %v7274_v59 }
0x2950   :  { %5267 = vmatpush1.bf16.msra.mxu0 %v7223_v52  ;;  %v7250_v52 = vld [vmem:[%s9363_s13 + $0x100] ss:$8 sps:$4 sm:$0xff]  }
0x2951   :  { %4818 = vmatmul.mubr.bf16.vlgmr.msra.gmra.mrb[48].mxu1 %v4046_v6  ;;  %5268 = vmatprep.subr.bf16.mxu0 %v7228_v9  ;;  %v7281_v6 = vld [vmem:[%s9364_s15 + $0x18] sm:$0xff]  }
0x2952   :  { %6331 = vmatpush3.bf16.msra.mxu1 %v7275_v60  ;;  %v7255_v9 = vld [vmem:[%s9363_s13 + $0x114] ss:$8 sps:$4 sm:$0xff]  }
0x2953   :  { %6332 = vmatprep.subr.bf16.mxu1 %v7276_v61 }
0x2954   :  { %5269 = vmatpush1.bf16.msra.mxu0 %v7226_v37 }
0x2955   :  { %5270 = vmatprep.subr.bf16.mxu0 %v7231_v4  ;;  %v7253_v4 = vld [vmem:[%s9363_s13 + $0x110] ss:$8 sps:$4 sm:$0xff]  }
0x2956   :  { %6333 = vmatpush3.bf16.msra.mxu1 %v7277_v62 }
0x2957   :  { %6334 = vmatprep.subr.bf16.mxu1 %v7278_v31 }
0x2958   :  { %5271 = vmatpush1.bf16.msra.mxu0 %v7229_v20  ;;  %v7258_v20 = vld [vmem:[%s9363_s13 + $0x124] ss:$8 sps:$4 sm:$0xff]  }
0x2959   :  { %5272 = vmatprep.subr.bf16.mxu0 %v7234_v41  ;;  %v7256_v41 = vld [vmem:[%s9363_s13 + $0x120] ss:$8 sps:$4 sm:$0xff]  }
0x295a   :  { %6335 = vmatpush3.bf16.msra.mxu1 %v7279_v39 }
0x295b   :  { %6336 = vmatprep.subr.bf16.mxu1 %v7280_v1 }
0x295c   :  { %5273 = vmatpush1.bf16.msra.mxu0 %v7232_v32  ;;  %v7261_v32 = vld [vmem:[%s9363_s13 + $0x134] ss:$8 sps:$4 sm:$0xff]  }
0x295d   :  { %5274 = vmatprep.subr.bf16.mxu0 %v7237_v42  ;;  %v7264_v42 = vld [vmem:[%s9363_s13 + $0x144] ss:$8 sps:$4 sm:$0xff]  }
0x295e   :  { %6337 = vmatpush3.bf16.msra.mxu1 %v7281_v6 }
0x295f   :  { %6338 = vmatprep.subr.bf16.mxu1 %v7282_v7 }
0x2960   :  { %5275 = vmatpush1.bf16.msra.mxu0 %v7235_v44  ;;  %v7262_v44 = vld [vmem:[%s9363_s13 + $0x140] ss:$8 sps:$4 sm:$0xff]  }
0x2961   :  { %5276 = vmatprep.subr.bf16.mxu0 %v7240_v45  ;;  %v7267_v45 = vld [vmem:[%s9363_s13 + $0x154] ss:$8 sps:$4 sm:$0xff]  }
0x2962   :  { %6339 = vmatpush3.bf16.msra.mxu1 %v7283_v8 }
0x2963   :  { %6340 = vmatprep.subr.bf16.mxu1 %v7284_v10  ;;  %v7290_v10 = vld [vmem:[%s9366_s17] sm:$0xff]  }
0x2964   :  { %5277 = vmatpush1.bf16.msra.mxu0 %v7238_v46  ;;  %v7265_v46 = vld [vmem:[%s9363_s13 + $0x150] ss:$8 sps:$4 sm:$0xff]  }
0x2965   :  { %5278 = vmatprep.subr.bf16.mxu0 %v7243_v33  ;;  %v7270_v33 = vld [vmem:[%s9363_s13 + $0x164] ss:$8 sps:$4 sm:$0xff]  }
0x2966   :  { %6341 = vmatpush3.bf16.msra.mxu1 %v7285_v12  ;;  %v7293_v12 = vld [vmem:[%s9366_s17 + $0x18] sm:$0xff]  }
0x2968   :  { %5279 = vmatpush1.bf16.msra.mxu0 %v7241_v47  ;;  %v7268_v47 = vld [vmem:[%s9363_s13 + $0x160] ss:$8 sps:$4 sm:$0xff]  }
0x2969   :  { %5280 = vmatprep.subr.bf16.mxu0 %v7246_v49  ;;  %v7273_v49 = vld [vmem:[%s9363_s13 + $0x174] ss:$8 sps:$4 sm:$0xff]  }
0x296c   :  { %5281 = vmatpush1.bf16.msra.mxu0 %v7244_v54  ;;  %v7271_v54 = vld [vmem:[%s9363_s13 + $0x170] ss:$8 sps:$4 sm:$0xff]  }
0x296d   :  { %5282 = vmatprep.subr.bf16.mxu0 %v7249_v48 }
0x2970   :  { %5283 = vmatpush1.bf16.msra.mxu0 %v7247_v34 }
0x2971   :  { %5293 = vmatprep.subr.bf16.mxu0 %v7252_v3  ;;  %v7286_v3 = vld [vmem:[%s9364_s15 + $0x70] sm:$0xff]  }
0x2972   :  { %6342 = vmatprep.subr.bf16.mxu1 %v7286_v3 }
0x29c4   :  { %v6293_v40 = vpop.f32.mrb[52].mxu0 }
0x29c5   :  { %v6294_v53 = vpop.f32.mrb[53].mxu0 }
0x29c6   :  { %v6295_v57 = vadd.f32 %v6294_v53, %v6293_v40  ;;  %v6296_v58 = vpop.f32.mrb[54].mxu0  ;;  %v7287_v40 = vld [vmem:[%s9364_s15 + $0x30] sm:$0xff]   ;;  %v7288_v53 = vld [vmem:[%s9364_s15 + $0x78] sm:$0xff]  }
0x29c7   :  { %v6297_v29 = vpop.f32.mrb[55].mxu0  ;;  %6343 = vmatpush3.bf16.msra.mxu1 %v7287_v40  ;;  %v4997_v58 = vld [vmem:[%s9367_s14] sm:$0x3] }
0x29c8   :  { %v4861_v2 = vadd.f32 %v6295_v57, %v4059_v13  ;;  %v7289_v57 = vld [vmem:[%s9364_s15 + $0x38] sm:$0xff]   ;;  %6344 = vmatprep.subr.bf16.mxu1 %v7288_v53  ;;  %v5005_v29 = vrot.slane %v4997_v58, %v8116_v26  ;;  %v5009_v59 = vrot.slane %v4997_v58, %v8124_v28  ;;  %v7291_v26 = vld [vmem:[%s9366_s17 + $0x8] sm:$0xff]   ;;  %v7292_v28 = vld [vmem:[%s9366_s17 + $0x10] sm:$0xff]  }
0x29c9   :  { %v7294_v13 = vld [vmem:[%s9366_s17 + $0x20] sm:$0xff]  }
0x29cb   :  { %6345 = vmatpush3.bf16.msra.mxu1 %v7289_v57 }
0x29cc   :  { %6579 = vmatprep.subr.bf16.mxu1 %v7430_v0 }
0x29e4   :  { %v6315_v56 = vpop.f32.mrb[56].mxu0 }
0x29e5   :  { %v6316_v14 = vpop.f32.mrb[57].mxu0 }
0x29e6   :  { %v6317_v30 = vadd.f32 %v6316_v14, %v6315_v56  ;;  %v6318_v17 = vpop.f32.mrb[58].mxu0  ;;  %v7295_v56 = vld [vmem:[%s9366_s17 + $0x28] sm:$0xff]   ;;  %v7296_v14 = vld [vmem:[%s9366_s17 + $0x30] sm:$0xff]  }
0x29e7   :  { %v6319_v51 = vpop.f32.mrb[59].mxu0 }
0x29e8   :  { %v4901_v15 = vadd.f32 %v6317_v30, %v4861_v2  ;;  %v7297_v2 = vld [vmem:[%s9366_s17 + $0x38] sm:$0xff]   ;;  %v24_v30 = vstv %s9368_s18  ;;  %v6110_v51 = vld [vmem:[%s9369_s16] ss:$0 sm:$0xff] }
0x29e9   :  { %25 = vst [vmem:[#allocation2] sm:$0x1] %v24_v30 }
0x2a05   :  { %v4940_v18 = vpop.f32.mrb[60].mxu0 }
0x2a06   :  { %v4941_v19 = vadd.f32 %v4940_v18, %v4901_v15  ;;  %v6577_v11 = vpop.f32.mrb[61].mxu0 }
0x2a07   :  { %v4943_v21 = vpop.f32.mrb[62].mxu0 }
0x2a08   :  { %v6578_v22 = vpop.f32.mrb[63].mxu0  ;;  %v4948_v48 = vmax.f32 %v4941_v19, 0.0 }
0x2a0a   :  { %v5000_v34 = vpack.c.bf16 %v4948_v48, %v4948_v48 }
0x2a24   :  { %v4819_v16 = vpop.f32.mrb[48].mxu1 }
0x2a25   :  { %v6611_v50 = vadd.f32 %v4819_v16, %v4051_v25  ;;  %v4821_v55 = vpop.f32.mrb[49].mxu1  ;;  %v6127_v25 = vld [vmem:[#allocation2] ss:$0 sm:$0xff] }
0x2a26   :  { %v6612_v24 = vadd.f32 %v4821_v55, %v4055_v23  ;;  %v4823_v27 = vpop.f32.mrb[50].mxu1 }
0x2a27   :  { %v4946_v43 = vmax.f32 %v6611_v50, 0.0  ;;  %v4824_v63 = vpop.f32.mrb[51].mxu1 }
0x2a28   :  { %v4947_v35 = vmax.f32 %v6612_v24, 0.0 }
0x2a29   :  { %v4998_v37 = vpack.c.bf16 %v4946_v43, %v4946_v43 }
0x2a2a   :  { %v4999_v36 = vpack.c.bf16 %v4947_v35, %v4947_v35 }
0x2a2c   :  { %5284 = vmatprep.mubr.bf16.mxu0 %v4999_v36 }
0x2a2d   :  { %5285 = vmatmul.mubr.bf16.vlgmr.msra.gmra.mrb[64].mxu0 %v4998_v37 }
0x2a2e   :  { %5294 = vmatpush1.bf16.msra.mxu0 %v7250_v52  ;;  %5325 = vmatprep.mubr.bf16.mxu0 %v7432_v5  ;;  %v7259_v5 = vld [vmem:[%s9363_s13 + $0x130] ss:$8 sps:$4 sm:$0xff]  }
0x2a2f   :  { %5295 = vmatprep.subr.bf16.mxu0 %v7255_v9 }
0x2a32   :  { %5296 = vmatpush1.bf16.msra.mxu0 %v7253_v4 }
0x2a33   :  { %5297 = vmatprep.subr.bf16.mxu0 %v7258_v20 }
0x2a36   :  { %5298 = vmatpush1.bf16.msra.mxu0 %v7256_v41 }
0x2a37   :  { %5299 = vmatprep.subr.bf16.mxu0 %v7261_v32 }
0x2a3a   :  { %5300 = vmatpush1.bf16.msra.mxu0 %v7259_v5 }
0x2a3b   :  { %5301 = vmatprep.subr.bf16.mxu0 %v7264_v42 }
0x2a3e   :  { %5302 = vmatpush1.bf16.msra.mxu0 %v7262_v44 }
0x2a3f   :  { %5303 = vmatprep.subr.bf16.mxu0 %v7267_v45 }
0x2a42   :  { %5304 = vmatpush1.bf16.msra.mxu0 %v7265_v46 }
0x2a43   :  { %5305 = vmatprep.subr.bf16.mxu0 %v7270_v33 }
0x2a46   :  { %5306 = vmatpush1.bf16.msra.mxu0 %v7268_v47 }
0x2a47   :  { %5307 = vmatprep.subr.bf16.mxu0 %v7273_v49 }
0x2a4a   :  { %5308 = vmatpush1.bf16.msra.mxu0 %v7271_v54 }
0x2a4d   :  { %5326 = vmatmul.mubr.bf16.vlgmr.msra.gmra.mrb[64].mxu0 %v5000_v34 }
0x2b20   :  { %v5327_v60 = vpop.f32.mrb[64].mxu0 }
0x2b21   :  { %v6613_v61 = vadd.f32 %v5327_v60, %v5005_v29  ;;  %v5329_v62 = vpop.f32.mrb[65].mxu0 }
0x2b22   :  { %v6614_v31 = vadd.f32 %v5329_v62, %v5009_v59  ;;  %v5331_v39 = vpop.f32.mrb[66].mxu0 }
0x2b23   :  { %v5334_v1 = vmax.f32 %v6613_v61, 0.0  ;;  %v5332_v6 = vpop.f32.mrb[67].mxu0 }
0x2b24   :  { %v5335_v7 = vmax.f32 %v6614_v31, 0.0 }
0x2b25   :  { %v5369_v38 = vpack.c.bf16 %v5334_v1, %v5334_v1 }
0x2b26   :  { %v5370_v8 = vpack.c.bf16 %v5335_v7, %v5335_v7 }
0x2b28   :  { %5505 = vmatprep.mubr.bf16.mxu1 %v5370_v8 }
0x2b29   :  { %5506 = vmatmul.mubr.bf16.vlgmr.msra.gmra.mrb[52].mxu1 %v5369_v38 }
0x2b2a   :  { %6580 = vmatpush3.bf16.msra.mxu1 %v7290_v10  ;;  %6595 = vmatprep.mubr.msk.bf16.mxu1 %vm7431_vm0, %v7430_v0 }
0x2b2b   :  { %6581 = vmatprep.subr.bf16.mxu1 %v7430_v0 }
0x2b2e   :  { %6582 = vmatpush3.bf16.msra.mxu1 %v7291_v26 }
0x2b2f   :  { %6583 = vmatprep.subr.bf16.mxu1 %v7430_v0 }
0x2b32   :  { %6584 = vmatpush3.bf16.msra.mxu1 %v7292_v28 }
0x2b33   :  { %6585 = vmatprep.subr.bf16.mxu1 %v7430_v0 }
0x2b36   :  { %6586 = vmatpush3.bf16.msra.mxu1 %v7293_v12 }
0x2b37   :  { %6587 = vmatprep.subr.bf16.mxu1 %v7430_v0 }
0x2b3a   :  { %6588 = vmatpush3.bf16.msra.mxu1 %v7294_v13 }
0x2b3b   :  { %6589 = vmatprep.subr.bf16.mxu1 %v7430_v0 }
0x2b3e   :  { %6590 = vmatpush3.bf16.msra.mxu1 %v7295_v56 }
0x2b3f   :  { %6591 = vmatprep.subr.bf16.mxu1 %v7430_v0 }
0x2b42   :  { %6592 = vmatpush3.bf16.msra.mxu1 %v7296_v14 }
0x2b43   :  { %6593 = vmatprep.subr.bf16.mxu1 %v7430_v0 }
0x2b46   :  { %6594 = vmatpush3.bf16.msra.mxu1 %v7297_v2 }
0x2bfc   :  { %v6346_v17 = vpop.f32.mrb[52].mxu1 }
0x2bfd   :  { %v6347_v15 = vpop.f32.mrb[53].mxu1 }
0x2bfe   :  { %v6348_v18 = vadd.f32 %v6347_v15, %v6346_v17  ;;  %v6349_v19 = vpop.f32.mrb[54].mxu1 }
0x2bff   :  { %v6350_v11 = vpop.f32.mrb[55].mxu1 }
0x2c00   :  { %v5508_v0 = vadd.f32 %v6348_v18, %v6110_v51 }
0x2c02   :  { %v5513_v21 = vmax.f32 %v5508_v0, 0.0 }
0x2c04   :  { %v5531_v22 = vpack.c.bf16 %v5513_v21, %v5513_v21 }
0x2c06   :  { %6596 = vmatmul.mubr.bf16.vlgmr.msra.gmra.mrb[56].mxu1 %v5531_v22 }
0x2cd9   :  { %v5620_v23 = vpop.f32.mrb[56].mxu1 }
0x2cda   :  { %v5621_v16 = vadd.f32 %v6127_v25, %v5620_v23  ;;  %v6597_v50 = vpop.f32.mrb[57].mxu1 }
0x2cdb   :  { %v5623_v55 = vpop.f32.mrb[58].mxu1 }
0x2cdc   :  { %v6136_v24 = vmul.f32 -1.442695, %v5621_v16  ;;  %v6598_v27 = vpop.f32.mrb[59].mxu1 }
0x2cde   :  { %7426 = vpow2.f32 %v6136_v24 }
0x2ce8   :  { %v7427_v43 = vpop.eup %7426 }
0x2ce9   :  { %v5629_v63 = vadd.f32 1.0, %v7427_v43 }
0x2ceb   :  { %7428 = vrcp.f32 %v5629_v63 }
0x2cf5   :  { %v7429_v35 = vpop.eup %7428 }
0x2cf6   :  { %5633 = vst.msk [vmem:[%s9370_s19] sm:$0x3] %vm5632_vm3, %v7429_v35 }

</bundles_post_ra>
